<compile_context>
chip_gen: v7x
topology: tpu7x:2x2x1
jax: 0.10.0
libtpu: 0.0.40
codegen_flags: <defaults>
</compile_context>

<pallas_src>
import math
import numpy as np
import jax
import jax.numpy as jnp
from jax import lax
from jax.experimental import pallas as pl
from jax.experimental.pallas import tpu as pltpu

LN_EPS = 1e-5  # VITS-style LayerNorm over the channel dim


# ---------------------------------------------------------------------------
# Fused Pallas kernel: one batch element per grid step
# ---------------------------------------------------------------------------
def _fused_attention_layer_kernel(x_ref, wqkv_ref, bqkv_ref, ekbd_ref, ev_ref,
                                  mrow_ref, mcol_ref, wo_ref, bo_ref, g_ref,
                                  beta_ref, o_ref, attn_ref):
    # x_ref:    (1, C, T)       input in native NCT layout (time on lanes)
    # wqkv_ref: (3C, C)  bf16   stacked [Wq/scale ; Wk ; Wv] in (out, in) layout
    # bqkv_ref: (3C, 1)  f32    stacked [bq/scale ; bk ; bv]
    # ekbd_ref: (H*nr, C) f32   block-diagonal relative-key table (nr = 2W+1)
    # ev_ref:   (nr, d)  f32    relative-value window table
    # mrow_ref: (1, 1, T)       per-position validity (query / lane form)
    # mcol_ref: (1, T, 1)       per-position validity (key / sublane form)
    # wo_ref:   (C, C)   bf16   output projection (out, in)
    # bo/g/beta:(C, 1)   f32
    # o_ref:    (1, C, T)
    # attn_ref: (C, T)   f32    VMEM scratch for the concatenated head outputs
    C, T = x_ref.shape[1], x_ref.shape[2]
    n_rel, d = ev_ref.shape
    H = C // d
    W = (n_rel - 1) // 2
    f32 = jnp.float32

    x = x_ref[0]                                                     # (C, T) f32

    # Fused QKV projection: one (3C, C) @ (C, T) MXU matmul, bf16 in / f32 acc.
    qkv = jnp.dot(wqkv_ref[...], x.astype(jnp.bfloat16),
                  preferred_element_type=f32) + bqkv_ref[...]        # (3C, T)
    q = qkv[0 * C:1 * C, :]           # already pre-scaled by 1/sqrt(d)
    k = qkv[1 * C:2 * C, :]
    v = qkv[2 * C:3 * C, :]

    # Relative-key logits for ALL heads in one matmul: (H*nr, C) @ (C, T).
    relw = jnp.dot(ekbd_ref[...], q, preferred_element_type=f32)     # (H*nr, T)

    # Mask rebuilt in-kernel from the (T,) validity vector (no T^2 HBM read);
    # matches PyTorch masked_fill(mask == 0, -10000) exactly.
    q_valid = mrow_ref[0] > 0.5                                      # (1, T)
    k_valid = mcol_ref[0] > 0.5                                      # (T, 1)
    is_masked = jnp.logical_not(jnp.logical_and(k_valid, q_valid))   # (T, T)

    # Single int32 relative-offset matrix; no materialized band tensors.
    row = lax.broadcasted_iota(jnp.int32, (T, T), 0)   # key index j   (sublanes)
    col = lax.broadcasted_iota(jnp.int32, (T, T), 1)   # query index i (lanes)
    dij = row - col

    ev = ev_ref[...]                                                 # (nr, d)

    for h in range(H):  # TODO(synk): switch to lax.fori_loop for large H
        lo = h * d
        qh = q[lo:lo + d, :]                                         # (d, T)
        kh = k[lo:lo + d, :]
        vh = v[lo:lo + d, :]

        # content-content scores, transposed layout: s[j, i] = q_i . k_j
        # (LHS contracts dim 0 -> free transposed-LHS on the MXU)
        s = lax.dot_general(kh, qh, (((0,), (0,)), ((), ())),
                            preferred_element_type=f32)              # (T, T)

        # content-position: s[j, i] += relw_h[W + j - i, i] on the band |j-i|<=W
        for r in range(n_rel):
            rv = relw[h * n_rel + r:h * n_rel + r + 1, :]            # (1, T)
            s = s + jnp.where(dij == (r - W), rv, f32(0.0))

        s = jnp.where(is_masked, f32(-10000.0), s)

        # softmax over keys (sublane axis); reciprocal goes to the EUP slot
        m = jnp.max(s, axis=0, keepdims=True)
        e = jnp.exp(s - m)
        denom = jnp.sum(e, axis=0, keepdims=True)
        p = e * pl.reciprocal(denom, approx=True)                    # (T, T), p[j,i]
        # TODO(synk): attention dropout (self.drop) is identity in eval mode.

        # out_h[:, i] = sum_j v[:, j] p[j, i]   -- natural MXU orientation
        out_h = jnp.dot(vh, p, preferred_element_type=f32)           # (d, T)

        # relative-value term as one small matmul:
        #   W_all[r, i] = sum_j p[j, i] [j - i == r - W];  out_h += emb_v^T @ W_all
        wrel = jnp.concatenate(
            [jnp.sum(jnp.where(dij == (r - W), p, f32(0.0)),
                     axis=0, keepdims=True) for r in range(n_rel)],
            axis=0)                                                  # (nr, T)
        out_h = out_h + lax.dot_general(ev, wrel, (((0,), (0,)), ((), ())),
                                        preferred_element_type=f32)  # (d, T)

        attn_ref[lo:lo + d, :] = out_h        # sublane-aligned scratch write

    # Single full-C output projection: (C, C) @ (C, T), bf16 in / f32 acc.
    y = jnp.dot(wo_ref[...], attn_ref[...].astype(jnp.bfloat16),
                preferred_element_type=f32) + bo_ref[...]            # (C, T)
    # TODO(synk): layer dropout (self.dropout) is identity in eval mode.

    # residual + channel LayerNorm (channels live on sublanes)
    z = x + y
    mean = jnp.mean(z, axis=0, keepdims=True)
    var = jnp.mean((z - mean) ** 2, axis=0, keepdims=True)
    zhat = (z - mean) * lax.rsqrt(var + LN_EPS)
    o_ref[0] = zhat * g_ref[...] + beta_ref[...]


# ---------------------------------------------------------------------------
# Wrapper: parameter prep + pallas_call
# ---------------------------------------------------------------------------
def attention_layer_forward(x, attn_mask, params):
    # x: (B, C, T) f32; attn_mask: (B, T, T) outer-product sequence mask, or (B, T).
    B, C, T = x.shape
    H = params["n_heads"]
    d = C // H
    W = params["window_size"]
    n_rel = 2 * W + 1
    scale = math.sqrt(d)

    # Only the (B, T) validity vector is DMA'd.  The prior encoder's attn_mask is
    # always the outer product of the sequence mask, whose diagonal recovers it.
    # TODO(synk): a general non-separable (B,T,T) attn_mask would need a dense-mask path.
    if attn_mask.ndim == 3:
        x_mask = jnp.diagonal(attn_mask, axis1=1, axis2=2)
    else:
        x_mask = attn_mask
    x_mask = x_mask.astype(jnp.float32)
    mask_row = x_mask.reshape(B, 1, T)
    mask_col = x_mask.reshape(B, T, 1)

    # Stack QKV in (out, in) layout; fold 1/sqrt(d) into the Q projection.
    # Big-projection weights are cast to bf16 host-side (MXU operands only).
    wqkv = jnp.concatenate(
        [params["wq"] / scale, params["wk"], params["wv"]], axis=0
    ).astype(jnp.bfloat16)                                            # (3C, C)
    bqkv = jnp.concatenate(
        [params["bq"] / scale, params["bk"], params["bv"]]
    ).reshape(3 * C, 1).astype(jnp.float32)
    wo = params["wo"].astype(jnp.bfloat16)                            # (C, C)
    bo = params["bo"].reshape(C, 1).astype(jnp.float32)
    gamma = params["gamma"].reshape(C, 1).astype(jnp.float32)
    beta = params["beta"].reshape(C, 1).astype(jnp.float32)

    emb_k = params["emb_rel_k"][0].astype(jnp.float32)                # (nr, d)
    emb_v = params["emb_rel_v"][0].astype(jnp.float32)
    # Block-diagonal relative-key matrix: one (H*nr, C) matmul covers all heads.
    ekbd = jnp.kron(jnp.eye(H, dtype=jnp.float32), emb_k)             # (H*nr, C)

    return pl.pallas_call(
        _fused_attention_layer_kernel,
        out_shape=jax.ShapeDtypeStruct((B, C, T), jnp.float32),
        grid=(B,),
        in_specs=[
            pl.BlockSpec((1, C, T), lambda b: (b, 0, 0)),             # x (native NCT)
            pl.BlockSpec((3 * C, C), lambda b: (0, 0)),               # wqkv (bf16)
            pl.BlockSpec((3 * C, 1), lambda b: (0, 0)),               # bqkv
            pl.BlockSpec((H * n_rel, C), lambda b: (0, 0)),           # emb_rel_k (block-diag)
            pl.BlockSpec((n_rel, d), lambda b: (0, 0)),               # emb_rel_v
            pl.BlockSpec((1, 1, T), lambda b: (b, 0, 0)),             # validity (row form)
            pl.BlockSpec((1, T, 1), lambda b: (b, 0, 0)),             # validity (col form)
            pl.BlockSpec((C, C), lambda b: (0, 0)),                   # wo (bf16)
            pl.BlockSpec((C, 1), lambda b: (0, 0)),                   # bo
            pl.BlockSpec((C, 1), lambda b: (0, 0)),                   # gamma
            pl.BlockSpec((C, 1), lambda b: (0, 0)),                   # beta
        ],
        out_specs=pl.BlockSpec((1, C, T), lambda b: (b, 0, 0)),
        scratch_shapes=[pltpu.VMEM((C, T), jnp.float32)],
        compiler_params=pltpu.CompilerParams(
            dimension_semantics=("parallel",)),
    )(x.astype(jnp.float32), wqkv, bqkv, ekbd, emb_v,
      mask_row, mask_col, wo, bo, gamma, beta)


# ---------------------------------------------------------------------------
# Pure-JAX reference (mirrors the PyTorch pad/reshape relative-attention trick)
# ---------------------------------------------------------------------------
def _get_relative_embeddings(emb, T, window_size):
    pad_length = max(0, T - (window_size + 1))
    start = max(0, window_size + 1 - T)
    end = start + 2 * T - 1
    padded = jnp.pad(emb, ((0, 0), (pad_length, pad_length), (0, 0)))
    return padded[0, start:end]


def reference_forward(x, attn_mask, params):
    B, C, T = x.shape
    H = params["n_heads"]
    d = C // H
    w = params["window_size"]
    scale = math.sqrt(d)

    def conv1x1(inp, W, b):
        return jnp.einsum("oc,bct->bot", W, inp) + b[None, :, None]

    q = conv1x1(x, params["wq"], params["bq"])
    k = conv1x1(x, params["wk"], params["bk"])
    v = conv1x1(x, params["wv"], params["bv"])
    query = jnp.transpose(q.reshape(B, H, d, T), (0, 1, 3, 2))
    key = jnp.transpose(k.reshape(B, H, d, T), (0, 1, 3, 2))
    value = jnp.transpose(v.reshape(B, H, d, T), (0, 1, 3, 2))
    score = jnp.einsum("bhtd,bhsd->bhts", query, key) / scale

    k_emb = _get_relative_embeddings(params["emb_rel_k"], T, w)
    v_emb = _get_relative_embeddings(params["emb_rel_v"], T, w)
    rel_logits = jnp.einsum("bhtd,md->bhtm", query, k_emb)
    rl = jnp.pad(rel_logits, ((0, 0), (0, 0), (0, 0), (0, 1)))
    rl = rl.reshape(B, H, 2 * T * T)
    rl = jnp.pad(rl, ((0, 0), (0, 0), (0, T - 1)))
    score_loc = rl.reshape(B, H, T + 1, 2 * T - 1)[:, :, :T, T - 1:] / scale
    score = score + score_loc
    score = jnp.where(attn_mask[:, None] == 0, -10000.0, score)
    p = jax.nn.softmax(score, axis=-1)
    out = jnp.einsum("bhts,bhsd->bhtd", p, value)
    pp = jnp.pad(p, ((0, 0), (0, 0), (0, 0), (0, T - 1)))
    pp = pp.reshape(B, H, T * (2 * T - 1))
    pp = jnp.pad(pp, ((0, 0), (0, 0), (T, 0)))
    rel_w = pp.reshape(B, H, T, 2 * T)[:, :, :, 1:]
    out = out + jnp.einsum("bhtm,md->bhtd", rel_w, v_emb)
    attn = jnp.transpose(out, (0, 1, 3, 2)).reshape(B, C, T)
    y = conv1x1(attn, params["wo"], params["bo"])
    z = x + y
    zt = jnp.transpose(z, (0, 2, 1))
    mean = jnp.mean(zt, -1, keepdims=True)
    var = jnp.mean((zt - mean) ** 2, -1, keepdims=True)
    zn = (zt - mean) / jnp.sqrt(var + LN_EPS)
    zn = zn * params["gamma"][None, None, :] + params["beta"][None, None, :]
    return jnp.transpose(zn, (0, 2, 1))


# ---------------------------------------------------------------------------
if __name__ == "__main__":
    B, C, T = 2, 32, 16
    H, window_size = 4, 4
    d = C // H

    key = jax.random.PRNGKey(0)
    ks = jax.random.split(key, 16)

    def xavier(k, shape):
        limit = math.sqrt(6.0 / (shape[0] + shape[1]))
        return jax.random.uniform(k, shape, jnp.float32, -limit, limit)

    params = {
        "n_heads": H, "window_size": window_size,
        "wq": xavier(ks[0], (C, C)), "bq": 0.01 * jax.random.normal(ks[1], (C,)),
        "wk": xavier(ks[2], (C, C)), "bk": 0.01 * jax.random.normal(ks[3], (C,)),
        "wv": xavier(ks[4], (C, C)), "bv": 0.01 * jax.random.normal(ks[5], (C,)),
        "wo": xavier(ks[6], (C, C)), "bo": 0.01 * jax.random.normal(ks[7], (C,)),
        "emb_rel_k": jax.random.normal(ks[8], (1, 2 * window_size + 1, d)) * d ** -0.5,
        "emb_rel_v": jax.random.normal(ks[9], (1, 2 * window_size + 1, d)) * d ** -0.5,
        "gamma": jnp.ones((C,), jnp.float32),
        "beta": jnp.zeros((C,), jnp.float32),
    }

    x = jax.random.normal(ks[10], (B, C, T), jnp.float32)
    lengths = jnp.array([T, T - 5], jnp.int32)
    x_mask = (jnp.arange(T)[None, :] < lengths[:, None]).astype(jnp.float32)  # (B, T)
    attn_mask = x_mask[:, :, None] * x_mask[:, None, :]                        # (B, T, T)

    out = attention_layer_forward(x, attn_mask, params)
    out = jax.block_until_ready(out)

    ref = reference_forward(x, attn_mask, params)
    # bf16 MXU operands (QKV / output projection) + EUP approx reciprocal
    # -> allow ~2e-2 deviation; elementwise math (softmax, LN) is exact f32.
    np.testing.assert_allclose(np.asarray(out), np.asarray(ref), rtol=2e-2, atol=2e-2)
    print("KERNEL_OK")
</pallas_src>

<mosaic_0001>
module attributes {stable_mosaic.version = 11 : i64} {
  func.func @_fused_attention_layer_kernel(%arg0: i32, %arg1: memref<1x32x16xf32, #tpu.memory_space<vmem>>, %arg2: memref<96x32xbf16, #tpu.memory_space<vmem>>, %arg3: memref<96x1xf32, #tpu.memory_space<vmem>>, %arg4: memref<36x32xf32, #tpu.memory_space<vmem>>, %arg5: memref<9x8xf32, #tpu.memory_space<vmem>>, %arg6: memref<1x1x16xf32, #tpu.memory_space<vmem>>, %arg7: memref<1x16x1xf32, #tpu.memory_space<vmem>>, %arg8: memref<32x32xbf16, #tpu.memory_space<vmem>>, %arg9: memref<32x1xf32, #tpu.memory_space<vmem>>, %arg10: memref<32x1xf32, #tpu.memory_space<vmem>>, %arg11: memref<32x1xf32, #tpu.memory_space<vmem>>, %arg12: memref<1x32x16xf32, #tpu.memory_space<vmem>>, %arg13: memref<32x16xf32, #tpu.memory_space<vmem>>) attributes {dimension_semantics = [#tpu.dimension_semantics<parallel>], iteration_bounds = array<i64: 2>, scalar_prefetch = 0 : i64, scratch_operands = 1 : i64, tpu.core_type = #tpu.core_type<tc>, window_params = [{transform_indices = @transform_0, window_bounds = array<i64: 1, 32, 16>}, {pipeline_mode = #tpu.pipeline_mode<synchronous>, transform_indices = @transform_1, window_bounds = array<i64: 96, 32>}, {pipeline_mode = #tpu.pipeline_mode<synchronous>, transform_indices = @transform_2, window_bounds = array<i64: 96, 1>}, {pipeline_mode = #tpu.pipeline_mode<synchronous>, transform_indices = @transform_3, window_bounds = array<i64: 36, 32>}, {pipeline_mode = #tpu.pipeline_mode<synchronous>, transform_indices = @transform_4, window_bounds = array<i64: 9, 8>}, {transform_indices = @transform_5, window_bounds = array<i64: 1, 1, 16>}, {transform_indices = @transform_6, window_bounds = array<i64: 1, 16, 1>}, {pipeline_mode = #tpu.pipeline_mode<synchronous>, transform_indices = @transform_7, window_bounds = array<i64: 32, 32>}, {pipeline_mode = #tpu.pipeline_mode<synchronous>, transform_indices = @transform_8, window_bounds = array<i64: 32, 1>}, {pipeline_mode = #tpu.pipeline_mode<synchronous>, transform_indices = @transform_9, window_bounds = array<i64: 32, 1>}, {pipeline_mode = #tpu.pipeline_mode<synchronous>, transform_indices = @transform_10, window_bounds = array<i64: 32, 1>}, {transform_indices = @transform_11, window_bounds = array<i64: 1, 32, 16>}]} {
    %c0 = arith.constant 0 : index
    %c0_0 = arith.constant 0 : index
    %c0_1 = arith.constant 0 : index
    %0 = vector.load %arg1[%c0, %c0_0, %c0_1] : memref<1x32x16xf32, #tpu.memory_space<vmem>>, vector<1x32x16xf32>
    %1 = vector.shape_cast %0 : vector<1x32x16xf32> to vector<32x16xf32>
    %c0_2 = arith.constant 0 : index
    %c0_3 = arith.constant 0 : index
    %2 = vector.load %arg2[%c0_2, %c0_3] : memref<96x32xbf16, #tpu.memory_space<vmem>>, vector<96x32xbf16>
    %3 = arith.truncf %1 : vector<32x16xf32> to vector<32x16xbf16>
    %cst = arith.constant dense<0.000000e+00> : vector<96x16xf32>
    %4 = tpu.matmul %2, %3, %cst {dimension_numbers = #tpu.dot_dimension_numbers<[1], [0], [0], [1], [0, 0, 1, 1], [], []>} : vector<96x32xbf16>, vector<32x16xbf16>, vector<96x16xf32> -> vector<96x16xf32>
    %c0_4 = arith.constant 0 : index
    %c0_5 = arith.constant 0 : index
    %5 = vector.load %arg3[%c0_4, %c0_5] : memref<96x1xf32, #tpu.memory_space<vmem>>, vector<96x1xf32>
    %6 = vector.broadcast %5 : vector<96x1xf32> to vector<96x16xf32>
    %7 = arith.addf %4, %6 : vector<96x16xf32>
    %8 = vector.extract_strided_slice %7 {offsets = [0, 0], sizes = [32, 16], strides = [1, 1]} : vector<96x16xf32> to vector<32x16xf32>
    %9 = vector.extract_strided_slice %7 {offsets = [32, 0], sizes = [32, 16], strides = [1, 1]} : vector<96x16xf32> to vector<32x16xf32>
    %10 = vector.extract_strided_slice %7 {offsets = [64, 0], sizes = [32, 16], strides = [1, 1]} : vector<96x16xf32> to vector<32x16xf32>
    %c0_6 = arith.constant 0 : index
    %c0_7 = arith.constant 0 : index
    %11 = vector.load %arg4[%c0_6, %c0_7] : memref<36x32xf32, #tpu.memory_space<vmem>>, vector<36x32xf32>
    %cst_8 = arith.constant dense<0.000000e+00> : vector<36x16xf32>
    %12 = tpu.matmul %11, %8, %cst_8 {dimension_numbers = #tpu.dot_dimension_numbers<[1], [0], [0], [1], [0, 0, 1, 1], [], []>} : vector<36x32xf32>, vector<32x16xf32>, vector<36x16xf32> -> vector<36x16xf32>
    %c0_9 = arith.constant 0 : index
    %c0_10 = arith.constant 0 : index
    %c0_11 = arith.constant 0 : index
    %13 = vector.load %arg6[%c0_9, %c0_10, %c0_11] : memref<1x1x16xf32, #tpu.memory_space<vmem>>, vector<1x1x16xf32>
    %14 = vector.shape_cast %13 : vector<1x1x16xf32> to vector<1x16xf32>
    %cst_12 = arith.constant 5.000000e-01 : f32
    %15 = vector.broadcast %cst_12 : f32 to vector<1x16xf32>
    %16 = arith.cmpf ogt, %14, %15 : vector<1x16xf32>
    %c0_13 = arith.constant 0 : index
    %c0_14 = arith.constant 0 : index
    %c0_15 = arith.constant 0 : index
    %17 = vector.load %arg7[%c0_13, %c0_14, %c0_15] : memref<1x16x1xf32, #tpu.memory_space<vmem>>, vector<1x16x1xf32>
    %18 = vector.shape_cast %17 : vector<1x16x1xf32> to vector<16x1xf32>
    %cst_16 = arith.constant 5.000000e-01 : f32
    %19 = vector.broadcast %cst_16 : f32 to vector<16x1xf32>
    %20 = arith.cmpf ogt, %18, %19 : vector<16x1xf32>
    %21 = vector.broadcast %20 : vector<16x1xi1> to vector<16x16xi1>
    %22 = vector.broadcast %16 : vector<1x16xi1> to vector<16x16xi1>
    %23 = arith.andi %21, %22 : vector<16x16xi1>
    %cst_17 = arith.constant dense<true> : vector<16x16xi1>
    %24 = arith.xori %23, %cst_17 : vector<16x16xi1>
    %25 = tpu.iota {dimensions = array<i32: 0>} : vector<16x16xi32>
    %26 = tpu.iota {dimensions = array<i32: 1>} : vector<16x16xi32>
    %27 = arith.subi %25, %26 : vector<16x16xi32>
    %c0_18 = arith.constant 0 : index
    %c0_19 = arith.constant 0 : index
    %28 = vector.load %arg5[%c0_18, %c0_19] : memref<9x8xf32, #tpu.memory_space<vmem>>, vector<9x8xf32>
    %29 = vector.extract_strided_slice %8 {offsets = [0, 0], sizes = [8, 16], strides = [1, 1]} : vector<32x16xf32> to vector<8x16xf32>
    %30 = vector.extract_strided_slice %9 {offsets = [0, 0], sizes = [8, 16], strides = [1, 1]} : vector<32x16xf32> to vector<8x16xf32>
    %31 = vector.extract_strided_slice %10 {offsets = [0, 0], sizes = [8, 16], strides = [1, 1]} : vector<32x16xf32> to vector<8x16xf32>
    %cst_20 = arith.constant dense<0.000000e+00> : vector<16x16xf32>
    %32 = tpu.matmul %30, %29, %cst_20 {dimension_numbers = #tpu.dot_dimension_numbers<[0], [0], [1], [1], [0, 1, 1, 1], [], []>} : vector<8x16xf32>, vector<8x16xf32>, vector<16x16xf32> -> vector<16x16xf32>
    %33 = vector.extract_strided_slice %12 {offsets = [0, 0], sizes = [1, 16], strides = [1, 1]} : vector<36x16xf32> to vector<1x16xf32>
    %c-4_i32 = arith.constant -4 : i32
    %34 = vector.broadcast %c-4_i32 : i32 to vector<16x16xi32>
    %35 = arith.cmpi eq, %27, %34 : vector<16x16xi32>
    %cst_21 = arith.constant 0.000000e+00 : f32
    %36 = vector.shape_cast %33 : vector<1x16xf32> to vector<1x16xf32>
    %37 = vector.broadcast %36 : vector<1x16xf32> to vector<16x16xf32>
    %38 = vector.broadcast %cst_21 : f32 to vector<16x16xf32>
    %39 = arith.select %35, %37, %38 : vector<16x16xi1>, vector<16x16xf32>
    %40 = arith.addf %32, %39 : vector<16x16xf32>
    %41 = vector.extract_strided_slice %12 {offsets = [1, 0], sizes = [1, 16], strides = [1, 1]} : vector<36x16xf32> to vector<1x16xf32>
    %c-3_i32 = arith.constant -3 : i32
    %42 = vector.broadcast %c-3_i32 : i32 to vector<16x16xi32>
    %43 = arith.cmpi eq, %27, %42 : vector<16x16xi32>
    %cst_22 = arith.constant 0.000000e+00 : f32
    %44 = vector.shape_cast %41 : vector<1x16xf32> to vector<1x16xf32>
    %45 = vector.broadcast %44 : vector<1x16xf32> to vector<16x16xf32>
    %46 = vector.broadcast %cst_22 : f32 to vector<16x16xf32>
    %47 = arith.select %43, %45, %46 : vector<16x16xi1>, vector<16x16xf32>
    %48 = arith.addf %40, %47 : vector<16x16xf32>
    %49 = vector.extract_strided_slice %12 {offsets = [2, 0], sizes = [1, 16], strides = [1, 1]} : vector<36x16xf32> to vector<1x16xf32>
    %c-2_i32 = arith.constant -2 : i32
    %50 = vector.broadcast %c-2_i32 : i32 to vector<16x16xi32>
    %51 = arith.cmpi eq, %27, %50 : vector<16x16xi32>
    %cst_23 = arith.constant 0.000000e+00 : f32
    %52 = vector.shape_cast %49 : vector<1x16xf32> to vector<1x16xf32>
    %53 = vector.broadcast %52 : vector<1x16xf32> to vector<16x16xf32>
    %54 = vector.broadcast %cst_23 : f32 to vector<16x16xf32>
    %55 = arith.select %51, %53, %54 : vector<16x16xi1>, vector<16x16xf32>
    %56 = arith.addf %48, %55 : vector<16x16xf32>
    %57 = vector.extract_strided_slice %12 {offsets = [3, 0], sizes = [1, 16], strides = [1, 1]} : vector<36x16xf32> to vector<1x16xf32>
    %c-1_i32 = arith.constant -1 : i32
    %58 = vector.broadcast %c-1_i32 : i32 to vector<16x16xi32>
    %59 = arith.cmpi eq, %27, %58 : vector<16x16xi32>
    %cst_24 = arith.constant 0.000000e+00 : f32
    %60 = vector.shape_cast %57 : vector<1x16xf32> to vector<1x16xf32>
    %61 = vector.broadcast %60 : vector<1x16xf32> to vector<16x16xf32>
    %62 = vector.broadcast %cst_24 : f32 to vector<16x16xf32>
    %63 = arith.select %59, %61, %62 : vector<16x16xi1>, vector<16x16xf32>
    %64 = arith.addf %56, %63 : vector<16x16xf32>
    %65 = vector.extract_strided_slice %12 {offsets = [4, 0], sizes = [1, 16], strides = [1, 1]} : vector<36x16xf32> to vector<1x16xf32>
    %c0_i32 = arith.constant 0 : i32
    %66 = vector.broadcast %c0_i32 : i32 to vector<16x16xi32>
    %67 = arith.cmpi eq, %27, %66 : vector<16x16xi32>
    %cst_25 = arith.constant 0.000000e+00 : f32
    %68 = vector.shape_cast %65 : vector<1x16xf32> to vector<1x16xf32>
    %69 = vector.broadcast %68 : vector<1x16xf32> to vector<16x16xf32>
    %70 = vector.broadcast %cst_25 : f32 to vector<16x16xf32>
    %71 = arith.select %67, %69, %70 : vector<16x16xi1>, vector<16x16xf32>
    %72 = arith.addf %64, %71 : vector<16x16xf32>
    %73 = vector.extract_strided_slice %12 {offsets = [5, 0], sizes = [1, 16], strides = [1, 1]} : vector<36x16xf32> to vector<1x16xf32>
    %c1_i32 = arith.constant 1 : i32
    %74 = vector.broadcast %c1_i32 : i32 to vector<16x16xi32>
    %75 = arith.cmpi eq, %27, %74 : vector<16x16xi32>
    %cst_26 = arith.constant 0.000000e+00 : f32
    %76 = vector.shape_cast %73 : vector<1x16xf32> to vector<1x16xf32>
    %77 = vector.broadcast %76 : vector<1x16xf32> to vector<16x16xf32>
    %78 = vector.broadcast %cst_26 : f32 to vector<16x16xf32>
    %79 = arith.select %75, %77, %78 : vector<16x16xi1>, vector<16x16xf32>
    %80 = arith.addf %72, %79 : vector<16x16xf32>
    %81 = vector.extract_strided_slice %12 {offsets = [6, 0], sizes = [1, 16], strides = [1, 1]} : vector<36x16xf32> to vector<1x16xf32>
    %c2_i32 = arith.constant 2 : i32
    %82 = vector.broadcast %c2_i32 : i32 to vector<16x16xi32>
    %83 = arith.cmpi eq, %27, %82 : vector<16x16xi32>
    %cst_27 = arith.constant 0.000000e+00 : f32
    %84 = vector.shape_cast %81 : vector<1x16xf32> to vector<1x16xf32>
    %85 = vector.broadcast %84 : vector<1x16xf32> to vector<16x16xf32>
    %86 = vector.broadcast %cst_27 : f32 to vector<16x16xf32>
    %87 = arith.select %83, %85, %86 : vector<16x16xi1>, vector<16x16xf32>
    %88 = arith.addf %80, %87 : vector<16x16xf32>
    %89 = vector.extract_strided_slice %12 {offsets = [7, 0], sizes = [1, 16], strides = [1, 1]} : vector<36x16xf32> to vector<1x16xf32>
    %c3_i32 = arith.constant 3 : i32
    %90 = vector.broadcast %c3_i32 : i32 to vector<16x16xi32>
    %91 = arith.cmpi eq, %27, %90 : vector<16x16xi32>
    %cst_28 = arith.constant 0.000000e+00 : f32
    %92 = vector.shape_cast %89 : vector<1x16xf32> to vector<1x16xf32>
    %93 = vector.broadcast %92 : vector<1x16xf32> to vector<16x16xf32>
    %94 = vector.broadcast %cst_28 : f32 to vector<16x16xf32>
    %95 = arith.select %91, %93, %94 : vector<16x16xi1>, vector<16x16xf32>
    %96 = arith.addf %88, %95 : vector<16x16xf32>
    %97 = vector.extract_strided_slice %12 {offsets = [8, 0], sizes = [1, 16], strides = [1, 1]} : vector<36x16xf32> to vector<1x16xf32>
    %c4_i32 = arith.constant 4 : i32
    %98 = vector.broadcast %c4_i32 : i32 to vector<16x16xi32>
    %99 = arith.cmpi eq, %27, %98 : vector<16x16xi32>
    %cst_29 = arith.constant 0.000000e+00 : f32
    %100 = vector.shape_cast %97 : vector<1x16xf32> to vector<1x16xf32>
    %101 = vector.broadcast %100 : vector<1x16xf32> to vector<16x16xf32>
    %102 = vector.broadcast %cst_29 : f32 to vector<16x16xf32>
    %103 = arith.select %99, %101, %102 : vector<16x16xi1>, vector<16x16xf32>
    %104 = arith.addf %96, %103 : vector<16x16xf32>
    %cst_30 = arith.constant -1.000000e+04 : f32
    %105 = vector.broadcast %cst_30 : f32 to vector<16x16xf32>
    %106 = arith.select %24, %105, %104 : vector<16x16xi1>, vector<16x16xf32>
    %cst_31 = arith.constant dense<0xFF800000> : vector<16xf32>
    %107 = vector.multi_reduction <maximumf>, %106, %cst_31 [0] : vector<16x16xf32> to vector<16xf32>
    %108 = vector.shape_cast %107 : vector<16xf32> to vector<1x16xf32>
    %109 = vector.broadcast %108 : vector<1x16xf32> to vector<16x16xf32>
    %110 = arith.subf %106, %109 : vector<16x16xf32>
    %111 = math.exp %110 : vector<16x16xf32>
    %cst_32 = arith.constant dense<0.000000e+00> : vector<16xf32>
    %112 = vector.multi_reduction <add>, %111, %cst_32 [0] : vector<16x16xf32> to vector<16xf32>
    %113 = vector.shape_cast %112 : vector<16xf32> to vector<1x16xf32>
    %114 = tpu.reciprocal %113 {approx = true} : vector<1x16xf32> -> vector<1x16xf32>
    %115 = vector.broadcast %114 : vector<1x16xf32> to vector<16x16xf32>
    %116 = arith.mulf %111, %115 : vector<16x16xf32>
    %cst_33 = arith.constant dense<0.000000e+00> : vector<8x16xf32>
    %117 = tpu.matmul %31, %116, %cst_33 {dimension_numbers = #tpu.dot_dimension_numbers<[1], [0], [0], [1], [0, 0, 1, 1], [], []>} : vector<8x16xf32>, vector<16x16xf32>, vector<8x16xf32> -> vector<8x16xf32>
    %c-4_i32_34 = arith.constant -4 : i32
    %118 = vector.broadcast %c-4_i32_34 : i32 to vector<16x16xi32>
    %119 = arith.cmpi eq, %27, %118 : vector<16x16xi32>
    %cst_35 = arith.constant 0.000000e+00 : f32
    %120 = vector.broadcast %cst_35 : f32 to vector<16x16xf32>
    %121 = arith.select %119, %116, %120 : vector<16x16xi1>, vector<16x16xf32>
    %cst_36 = arith.constant dense<0.000000e+00> : vector<16xf32>
    %122 = vector.multi_reduction <add>, %121, %cst_36 [0] : vector<16x16xf32> to vector<16xf32>
    %123 = vector.shape_cast %122 : vector<16xf32> to vector<1x16xf32>
    %c-3_i32_37 = arith.constant -3 : i32
    %124 = vector.broadcast %c-3_i32_37 : i32 to vector<16x16xi32>
    %125 = arith.cmpi eq, %27, %124 : vector<16x16xi32>
    %cst_38 = arith.constant 0.000000e+00 : f32
    %126 = vector.broadcast %cst_38 : f32 to vector<16x16xf32>
    %127 = arith.select %125, %116, %126 : vector<16x16xi1>, vector<16x16xf32>
    %cst_39 = arith.constant dense<0.000000e+00> : vector<16xf32>
    %128 = vector.multi_reduction <add>, %127, %cst_39 [0] : vector<16x16xf32> to vector<16xf32>
    %129 = vector.shape_cast %128 : vector<16xf32> to vector<1x16xf32>
    %c-2_i32_40 = arith.constant -2 : i32
    %130 = vector.broadcast %c-2_i32_40 : i32 to vector<16x16xi32>
    %131 = arith.cmpi eq, %27, %130 : vector<16x16xi32>
    %cst_41 = arith.constant 0.000000e+00 : f32
    %132 = vector.broadcast %cst_41 : f32 to vector<16x16xf32>
    %133 = arith.select %131, %116, %132 : vector<16x16xi1>, vector<16x16xf32>
    %cst_42 = arith.constant dense<0.000000e+00> : vector<16xf32>
    %134 = vector.multi_reduction <add>, %133, %cst_42 [0] : vector<16x16xf32> to vector<16xf32>
    %135 = vector.shape_cast %134 : vector<16xf32> to vector<1x16xf32>
    %c-1_i32_43 = arith.constant -1 : i32
    %136 = vector.broadcast %c-1_i32_43 : i32 to vector<16x16xi32>
    %137 = arith.cmpi eq, %27, %136 : vector<16x16xi32>
    %cst_44 = arith.constant 0.000000e+00 : f32
    %138 = vector.broadcast %cst_44 : f32 to vector<16x16xf32>
    %139 = arith.select %137, %116, %138 : vector<16x16xi1>, vector<16x16xf32>
    %cst_45 = arith.constant dense<0.000000e+00> : vector<16xf32>
    %140 = vector.multi_reduction <add>, %139, %cst_45 [0] : vector<16x16xf32> to vector<16xf32>
    %141 = vector.shape_cast %140 : vector<16xf32> to vector<1x16xf32>
    %c0_i32_46 = arith.constant 0 : i32
    %142 = vector.broadcast %c0_i32_46 : i32 to vector<16x16xi32>
    %143 = arith.cmpi eq, %27, %142 : vector<16x16xi32>
    %cst_47 = arith.constant 0.000000e+00 : f32
    %144 = vector.broadcast %cst_47 : f32 to vector<16x16xf32>
    %145 = arith.select %143, %116, %144 : vector<16x16xi1>, vector<16x16xf32>
    %cst_48 = arith.constant dense<0.000000e+00> : vector<16xf32>
    %146 = vector.multi_reduction <add>, %145, %cst_48 [0] : vector<16x16xf32> to vector<16xf32>
    %147 = vector.shape_cast %146 : vector<16xf32> to vector<1x16xf32>
    %c1_i32_49 = arith.constant 1 : i32
    %148 = vector.broadcast %c1_i32_49 : i32 to vector<16x16xi32>
    %149 = arith.cmpi eq, %27, %148 : vector<16x16xi32>
    %cst_50 = arith.constant 0.000000e+00 : f32
    %150 = vector.broadcast %cst_50 : f32 to vector<16x16xf32>
    %151 = arith.select %149, %116, %150 : vector<16x16xi1>, vector<16x16xf32>
    %cst_51 = arith.constant dense<0.000000e+00> : vector<16xf32>
    %152 = vector.multi_reduction <add>, %151, %cst_51 [0] : vector<16x16xf32> to vector<16xf32>
    %153 = vector.shape_cast %152 : vector<16xf32> to vector<1x16xf32>
    %c2_i32_52 = arith.constant 2 : i32
    %154 = vector.broadcast %c2_i32_52 : i32 to vector<16x16xi32>
    %155 = arith.cmpi eq, %27, %154 : vector<16x16xi32>
    %cst_53 = arith.constant 0.000000e+00 : f32
    %156 = vector.broadcast %cst_53 : f32 to vector<16x16xf32>
    %157 = arith.select %155, %116, %156 : vector<16x16xi1>, vector<16x16xf32>
    %cst_54 = arith.constant dense<0.000000e+00> : vector<16xf32>
    %158 = vector.multi_reduction <add>, %157, %cst_54 [0] : vector<16x16xf32> to vector<16xf32>
    %159 = vector.shape_cast %158 : vector<16xf32> to vector<1x16xf32>
    %c3_i32_55 = arith.constant 3 : i32
    %160 = vector.broadcast %c3_i32_55 : i32 to vector<16x16xi32>
    %161 = arith.cmpi eq, %27, %160 : vector<16x16xi32>
    %cst_56 = arith.constant 0.000000e+00 : f32
    %162 = vector.broadcast %cst_56 : f32 to vector<16x16xf32>
    %163 = arith.select %161, %116, %162 : vector<16x16xi1>, vector<16x16xf32>
    %cst_57 = arith.constant dense<0.000000e+00> : vector<16xf32>
    %164 = vector.multi_reduction <add>, %163, %cst_57 [0] : vector<16x16xf32> to vector<16xf32>
    %165 = vector.shape_cast %164 : vector<16xf32> to vector<1x16xf32>
    %c4_i32_58 = arith.constant 4 : i32
    %166 = vector.broadcast %c4_i32_58 : i32 to vector<16x16xi32>
    %167 = arith.cmpi eq, %27, %166 : vector<16x16xi32>
    %cst_59 = arith.constant 0.000000e+00 : f32
    %168 = vector.broadcast %cst_59 : f32 to vector<16x16xf32>
    %169 = arith.select %167, %116, %168 : vector<16x16xi1>, vector<16x16xf32>
    %cst_60 = arith.constant dense<0.000000e+00> : vector<16xf32>
    %170 = vector.multi_reduction <add>, %169, %cst_60 [0] : vector<16x16xf32> to vector<16xf32>
    %171 = vector.shape_cast %170 : vector<16xf32> to vector<1x16xf32>
    %172 = tpu.concatenate %123, %129, %135, %141, %147, %153, %159, %165, %171 in 0 : vector<1x16xf32>, vector<1x16xf32>, vector<1x16xf32>, vector<1x16xf32>, vector<1x16xf32>, vector<1x16xf32>, vector<1x16xf32>, vector<1x16xf32>, vector<1x16xf32> -> vector<9x16xf32>
    %cst_61 = arith.constant dense<0.000000e+00> : vector<8x16xf32>
    %173 = tpu.matmul %28, %172, %cst_61 {dimension_numbers = #tpu.dot_dimension_numbers<[0], [0], [1], [1], [0, 1, 1, 1], [], []>} : vector<9x8xf32>, vector<9x16xf32>, vector<8x16xf32> -> vector<8x16xf32>
    %174 = arith.addf %117, %173 : vector<8x16xf32>
    %c0_62 = arith.constant 0 : index
    %c0_63 = arith.constant 0 : index
    %175 = vector.load %arg13[%c0_62, %c0_63] : memref<32x16xf32, #tpu.memory_space<vmem>>, vector<8x16xf32>
    tpu.vector_store %arg13[%c0_62, %c0_63], %174 {strides = array<i32>} : memref<32x16xf32, #tpu.memory_space<vmem>>, vector<8x16xf32>,
    %176 = vector.extract_strided_slice %8 {offsets = [8, 0], sizes = [8, 16], strides = [1, 1]} : vector<32x16xf32> to vector<8x16xf32>
    %177 = vector.extract_strided_slice %9 {offsets = [8, 0], sizes = [8, 16], strides = [1, 1]} : vector<32x16xf32> to vector<8x16xf32>
    %178 = vector.extract_strided_slice %10 {offsets = [8, 0], sizes = [8, 16], strides = [1, 1]} : vector<32x16xf32> to vector<8x16xf32>
    %cst_64 = arith.constant dense<0.000000e+00> : vector<16x16xf32>
    %179 = tpu.matmul %177, %176, %cst_64 {dimension_numbers = #tpu.dot_dimension_numbers<[0], [0], [1], [1], [0, 1, 1, 1], [], []>} : vector<8x16xf32>, vector<8x16xf32>, vector<16x16xf32> -> vector<16x16xf32>
    %180 = vector.extract_strided_slice %12 {offsets = [9, 0], sizes = [1, 16], strides = [1, 1]} : vector<36x16xf32> to vector<1x16xf32>
    %c-4_i32_65 = arith.constant -4 : i32
    %181 = vector.broadcast %c-4_i32_65 : i32 to vector<16x16xi32>
    %182 = arith.cmpi eq, %27, %181 : vector<16x16xi32>
    %cst_66 = arith.constant 0.000000e+00 : f32
    %183 = vector.shape_cast %180 : vector<1x16xf32> to vector<1x16xf32>
    %184 = vector.broadcast %183 : vector<1x16xf32> to vector<16x16xf32>
    %185 = vector.broadcast %cst_66 : f32 to vector<16x16xf32>
    %186 = arith.select %182, %184, %185 : vector<16x16xi1>, vector<16x16xf32>
    %187 = arith.addf %179, %186 : vector<16x16xf32>
    %188 = vector.extract_strided_slice %12 {offsets = [10, 0], sizes = [1, 16], strides = [1, 1]} : vector<36x16xf32> to vector<1x16xf32>
    %c-3_i32_67 = arith.constant -3 : i32
    %189 = vector.broadcast %c-3_i32_67 : i32 to vector<16x16xi32>
    %190 = arith.cmpi eq, %27, %189 : vector<16x16xi32>
    %cst_68 = arith.constant 0.000000e+00 : f32
    %191 = vector.shape_cast %188 : vector<1x16xf32> to vector<1x16xf32>
    %192 = vector.broadcast %191 : vector<1x16xf32> to vector<16x16xf32>
    %193 = vector.broadcast %cst_68 : f32 to vector<16x16xf32>
    %194 = arith.select %190, %192, %193 : vector<16x16xi1>, vector<16x16xf32>
    %195 = arith.addf %187, %194 : vector<16x16xf32>
    %196 = vector.extract_strided_slice %12 {offsets = [11, 0], sizes = [1, 16], strides = [1, 1]} : vector<36x16xf32> to vector<1x16xf32>
    %c-2_i32_69 = arith.constant -2 : i32
    %197 = vector.broadcast %c-2_i32_69 : i32 to vector<16x16xi32>
    %198 = arith.cmpi eq, %27, %197 : vector<16x16xi32>
    %cst_70 = arith.constant 0.000000e+00 : f32
    %199 = vector.shape_cast %196 : vector<1x16xf32> to vector<1x16xf32>
    %200 = vector.broadcast %199 : vector<1x16xf32> to vector<16x16xf32>
    %201 = vector.broadcast %cst_70 : f32 to vector<16x16xf32>
    %202 = arith.select %198, %200, %201 : vector<16x16xi1>, vector<16x16xf32>
    %203 = arith.addf %195, %202 : vector<16x16xf32>
    %204 = vector.extract_strided_slice %12 {offsets = [12, 0], sizes = [1, 16], strides = [1, 1]} : vector<36x16xf32> to vector<1x16xf32>
    %c-1_i32_71 = arith.constant -1 : i32
    %205 = vector.broadcast %c-1_i32_71 : i32 to vector<16x16xi32>
    %206 = arith.cmpi eq, %27, %205 : vector<16x16xi32>
    %cst_72 = arith.constant 0.000000e+00 : f32
    %207 = vector.shape_cast %204 : vector<1x16xf32> to vector<1x16xf32>
    %208 = vector.broadcast %207 : vector<1x16xf32> to vector<16x16xf32>
    %209 = vector.broadcast %cst_72 : f32 to vector<16x16xf32>
    %210 = arith.select %206, %208, %209 : vector<16x16xi1>, vector<16x16xf32>
    %211 = arith.addf %203, %210 : vector<16x16xf32>
    %212 = vector.extract_strided_slice %12 {offsets = [13, 0], sizes = [1, 16], strides = [1, 1]} : vector<36x16xf32> to vector<1x16xf32>
    %c0_i32_73 = arith.constant 0 : i32
    %213 = vector.broadcast %c0_i32_73 : i32 to vector<16x16xi32>
    %214 = arith.cmpi eq, %27, %213 : vector<16x16xi32>
    %cst_74 = arith.constant 0.000000e+00 : f32
    %215 = vector.shape_cast %212 : vector<1x16xf32> to vector<1x16xf32>
    %216 = vector.broadcast %215 : vector<1x16xf32> to vector<16x16xf32>
    %217 = vector.broadcast %cst_74 : f32 to vector<16x16xf32>
    %218 = arith.select %214, %216, %217 : vector<16x16xi1>, vector<16x16xf32>
    %219 = arith.addf %211, %218 : vector<16x16xf32>
    %220 = vector.extract_strided_slice %12 {offsets = [14, 0], sizes = [1, 16], strides = [1, 1]} : vector<36x16xf32> to vector<1x16xf32>
    %c1_i32_75 = arith.constant 1 : i32
    %221 = vector.broadcast %c1_i32_75 : i32 to vector<16x16xi32>
    %222 = arith.cmpi eq, %27, %221 : vector<16x16xi32>
    %cst_76 = arith.constant 0.000000e+00 : f32
    %223 = vector.shape_cast %220 : vector<1x16xf32> to vector<1x16xf32>
    %224 = vector.broadcast %223 : vector<1x16xf32> to vector<16x16xf32>
    %225 = vector.broadcast %cst_76 : f32 to vector<16x16xf32>
    %226 = arith.select %222, %224, %225 : vector<16x16xi1>, vector<16x16xf32>
    %227 = arith.addf %219, %226 : vector<16x16xf32>
    %228 = vector.extract_strided_slice %12 {offsets = [15, 0], sizes = [1, 16], strides = [1, 1]} : vector<36x16xf32> to vector<1x16xf32>
    %c2_i32_77 = arith.constant 2 : i32
    %229 = vector.broadcast %c2_i32_77 : i32 to vector<16x16xi32>
    %230 = arith.cmpi eq, %27, %229 : vector<16x16xi32>
    %cst_78 = arith.constant 0.000000e+00 : f32
    %231 = vector.shape_cast %228 : vector<1x16xf32> to vector<1x16xf32>
    %232 = vector.broadcast %231 : vector<1x16xf32> to vector<16x16xf32>
    %233 = vector.broadcast %cst_78 : f32 to vector<16x16xf32>
    %234 = arith.select %230, %232, %233 : vector<16x16xi1>, vector<16x16xf32>
    %235 = arith.addf %227, %234 : vector<16x16xf32>
    %236 = vector.extract_strided_slice %12 {offsets = [16, 0], sizes = [1, 16], strides = [1, 1]} : vector<36x16xf32> to vector<1x16xf32>
    %c3_i32_79 = arith.constant 3 : i32
    %237 = vector.broadcast %c3_i32_79 : i32 to vector<16x16xi32>
    %238 = arith.cmpi eq, %27, %237 : vector<16x16xi32>
    %cst_80 = arith.constant 0.000000e+00 : f32
    %239 = vector.shape_cast %236 : vector<1x16xf32> to vector<1x16xf32>
    %240 = vector.broadcast %239 : vector<1x16xf32> to vector<16x16xf32>
    %241 = vector.broadcast %cst_80 : f32 to vector<16x16xf32>
    %242 = arith.select %238, %240, %241 : vector<16x16xi1>, vector<16x16xf32>
    %243 = arith.addf %235, %242 : vector<16x16xf32>
    %244 = vector.extract_strided_slice %12 {offsets = [17, 0], sizes = [1, 16], strides = [1, 1]} : vector<36x16xf32> to vector<1x16xf32>
    %c4_i32_81 = arith.constant 4 : i32
    %245 = vector.broadcast %c4_i32_81 : i32 to vector<16x16xi32>
    %246 = arith.cmpi eq, %27, %245 : vector<16x16xi32>
    %cst_82 = arith.constant 0.000000e+00 : f32
    %247 = vector.shape_cast %244 : vector<1x16xf32> to vector<1x16xf32>
    %248 = vector.broadcast %247 : vector<1x16xf32> to vector<16x16xf32>
    %249 = vector.broadcast %cst_82 : f32 to vector<16x16xf32>
    %250 = arith.select %246, %248, %249 : vector<16x16xi1>, vector<16x16xf32>
    %251 = arith.addf %243, %250 : vector<16x16xf32>
    %cst_83 = arith.constant -1.000000e+04 : f32
    %252 = vector.broadcast %cst_83 : f32 to vector<16x16xf32>
    %253 = arith.select %24, %252, %251 : vector<16x16xi1>, vector<16x16xf32>
    %cst_84 = arith.constant dense<0xFF800000> : vector<16xf32>
    %254 = vector.multi_reduction <maximumf>, %253, %cst_84 [0] : vector<16x16xf32> to vector<16xf32>
    %255 = vector.shape_cast %254 : vector<16xf32> to vector<1x16xf32>
    %256 = vector.broadcast %255 : vector<1x16xf32> to vector<16x16xf32>
    %257 = arith.subf %253, %256 : vector<16x16xf32>
    %258 = math.exp %257 : vector<16x16xf32>
    %cst_85 = arith.constant dense<0.000000e+00> : vector<16xf32>
    %259 = vector.multi_reduction <add>, %258, %cst_85 [0] : vector<16x16xf32> to vector<16xf32>
    %260 = vector.shape_cast %259 : vector<16xf32> to vector<1x16xf32>
    %261 = tpu.reciprocal %260 {approx = true} : vector<1x16xf32> -> vector<1x16xf32>
    %262 = vector.broadcast %261 : vector<1x16xf32> to vector<16x16xf32>
    %263 = arith.mulf %258, %262 : vector<16x16xf32>
    %cst_86 = arith.constant dense<0.000000e+00> : vector<8x16xf32>
    %264 = tpu.matmul %178, %263, %cst_86 {dimension_numbers = #tpu.dot_dimension_numbers<[1], [0], [0], [1], [0, 0, 1, 1], [], []>} : vector<8x16xf32>, vector<16x16xf32>, vector<8x16xf32> -> vector<8x16xf32>
    %c-4_i32_87 = arith.constant -4 : i32
    %265 = vector.broadcast %c-4_i32_87 : i32 to vector<16x16xi32>
    %266 = arith.cmpi eq, %27, %265 : vector<16x16xi32>
    %cst_88 = arith.constant 0.000000e+00 : f32
    %267 = vector.broadcast %cst_88 : f32 to vector<16x16xf32>
    %268 = arith.select %266, %263, %267 : vector<16x16xi1>, vector<16x16xf32>
    %cst_89 = arith.constant dense<0.000000e+00> : vector<16xf32>
    %269 = vector.multi_reduction <add>, %268, %cst_89 [0] : vector<16x16xf32> to vector<16xf32>
    %270 = vector.shape_cast %269 : vector<16xf32> to vector<1x16xf32>
    %c-3_i32_90 = arith.constant -3 : i32
    %271 = vector.broadcast %c-3_i32_90 : i32 to vector<16x16xi32>
    %272 = arith.cmpi eq, %27, %271 : vector<16x16xi32>
    %cst_91 = arith.constant 0.000000e+00 : f32
    %273 = vector.broadcast %cst_91 : f32 to vector<16x16xf32>
    %274 = arith.select %272, %263, %273 : vector<16x16xi1>, vector<16x16xf32>
    %cst_92 = arith.constant dense<0.000000e+00> : vector<16xf32>
    %275 = vector.multi_reduction <add>, %274, %cst_92 [0] : vector<16x16xf32> to vector<16xf32>
    %276 = vector.shape_cast %275 : vector<16xf32> to vector<1x16xf32>
    %c-2_i32_93 = arith.constant -2 : i32
    %277 = vector.broadcast %c-2_i32_93 : i32 to vector<16x16xi32>
    %278 = arith.cmpi eq, %27, %277 : vector<16x16xi32>
    %cst_94 = arith.constant 0.000000e+00 : f32
    %279 = vector.broadcast %cst_94 : f32 to vector<16x16xf32>
    %280 = arith.select %278, %263, %279 : vector<16x16xi1>, vector<16x16xf32>
    %cst_95 = arith.constant dense<0.000000e+00> : vector<16xf32>
    %281 = vector.multi_reduction <add>, %280, %cst_95 [0] : vector<16x16xf32> to vector<16xf32>
    %282 = vector.shape_cast %281 : vector<16xf32> to vector<1x16xf32>
    %c-1_i32_96 = arith.constant -1 : i32
    %283 = vector.broadcast %c-1_i32_96 : i32 to vector<16x16xi32>
    %284 = arith.cmpi eq, %27, %283 : vector<16x16xi32>
    %cst_97 = arith.constant 0.000000e+00 : f32
    %285 = vector.broadcast %cst_97 : f32 to vector<16x16xf32>
    %286 = arith.select %284, %263, %285 : vector<16x16xi1>, vector<16x16xf32>
    %cst_98 = arith.constant dense<0.000000e+00> : vector<16xf32>
    %287 = vector.multi_reduction <add>, %286, %cst_98 [0] : vector<16x16xf32> to vector<16xf32>
    %288 = vector.shape_cast %287 : vector<16xf32> to vector<1x16xf32>
    %c0_i32_99 = arith.constant 0 : i32
    %289 = vector.broadcast %c0_i32_99 : i32 to vector<16x16xi32>
    %290 = arith.cmpi eq, %27, %289 : vector<16x16xi32>
    %cst_100 = arith.constant 0.000000e+00 : f32
    %291 = vector.broadcast %cst_100 : f32 to vector<16x16xf32>
    %292 = arith.select %290, %263, %291 : vector<16x16xi1>, vector<16x16xf32>
    %cst_101 = arith.constant dense<0.000000e+00> : vector<16xf32>
    %293 = vector.multi_reduction <add>, %292, %cst_101 [0] : vector<16x16xf32> to vector<16xf32>
    %294 = vector.shape_cast %293 : vector<16xf32> to vector<1x16xf32>
    %c1_i32_102 = arith.constant 1 : i32
    %295 = vector.broadcast %c1_i32_102 : i32 to vector<16x16xi32>
    %296 = arith.cmpi eq, %27, %295 : vector<16x16xi32>
    %cst_103 = arith.constant 0.000000e+00 : f32
    %297 = vector.broadcast %cst_103 : f32 to vector<16x16xf32>
    %298 = arith.select %296, %263, %297 : vector<16x16xi1>, vector<16x16xf32>
    %cst_104 = arith.constant dense<0.000000e+00> : vector<16xf32>
    %299 = vector.multi_reduction <add>, %298, %cst_104 [0] : vector<16x16xf32> to vector<16xf32>
    %300 = vector.shape_cast %299 : vector<16xf32> to vector<1x16xf32>
    %c2_i32_105 = arith.constant 2 : i32
    %301 = vector.broadcast %c2_i32_105 : i32 to vector<16x16xi32>
    %302 = arith.cmpi eq, %27, %301 : vector<16x16xi32>
    %cst_106 = arith.constant 0.000000e+00 : f32
    %303 = vector.broadcast %cst_106 : f32 to vector<16x16xf32>
    %304 = arith.select %302, %263, %303 : vector<16x16xi1>, vector<16x16xf32>
    %cst_107 = arith.constant dense<0.000000e+00> : vector<16xf32>
    %305 = vector.multi_reduction <add>, %304, %cst_107 [0] : vector<16x16xf32> to vector<16xf32>
    %306 = vector.shape_cast %305 : vector<16xf32> to vector<1x16xf32>
    %c3_i32_108 = arith.constant 3 : i32
    %307 = vector.broadcast %c3_i32_108 : i32 to vector<16x16xi32>
    %308 = arith.cmpi eq, %27, %307 : vector<16x16xi32>
    %cst_109 = arith.constant 0.000000e+00 : f32
    %309 = vector.broadcast %cst_109 : f32 to vector<16x16xf32>
    %310 = arith.select %308, %263, %309 : vector<16x16xi1>, vector<16x16xf32>
    %cst_110 = arith.constant dense<0.000000e+00> : vector<16xf32>
    %311 = vector.multi_reduction <add>, %310, %cst_110 [0] : vector<16x16xf32> to vector<16xf32>
    %312 = vector.shape_cast %311 : vector<16xf32> to vector<1x16xf32>
    %c4_i32_111 = arith.constant 4 : i32
    %313 = vector.broadcast %c4_i32_111 : i32 to vector<16x16xi32>
    %314 = arith.cmpi eq, %27, %313 : vector<16x16xi32>
    %cst_112 = arith.constant 0.000000e+00 : f32
    %315 = vector.broadcast %cst_112 : f32 to vector<16x16xf32>
    %316 = arith.select %314, %263, %315 : vector<16x16xi1>, vector<16x16xf32>
    %cst_113 = arith.constant dense<0.000000e+00> : vector<16xf32>
    %317 = vector.multi_reduction <add>, %316, %cst_113 [0] : vector<16x16xf32> to vector<16xf32>
    %318 = vector.shape_cast %317 : vector<16xf32> to vector<1x16xf32>
    %319 = tpu.concatenate %270, %276, %282, %288, %294, %300, %306, %312, %318 in 0 : vector<1x16xf32>, vector<1x16xf32>, vector<1x16xf32>, vector<1x16xf32>, vector<1x16xf32>, vector<1x16xf32>, vector<1x16xf32>, vector<1x16xf32>, vector<1x16xf32> -> vector<9x16xf32>
    %cst_114 = arith.constant dense<0.000000e+00> : vector<8x16xf32>
    %320 = tpu.matmul %28, %319, %cst_114 {dimension_numbers = #tpu.dot_dimension_numbers<[0], [0], [1], [1], [0, 1, 1, 1], [], []>} : vector<9x8xf32>, vector<9x16xf32>, vector<8x16xf32> -> vector<8x16xf32>
    %321 = arith.addf %264, %320 : vector<8x16xf32>
    %c8 = arith.constant 8 : index
    %c0_115 = arith.constant 0 : index
    %322 = vector.load %arg13[%c8, %c0_115] : memref<32x16xf32, #tpu.memory_space<vmem>>, vector<8x16xf32>
    tpu.vector_store %arg13[%c8, %c0_115], %321 {strides = array<i32>} : memref<32x16xf32, #tpu.memory_space<vmem>>, vector<8x16xf32>,
    %323 = vector.extract_strided_slice %8 {offsets = [16, 0], sizes = [8, 16], strides = [1, 1]} : vector<32x16xf32> to vector<8x16xf32>
    %324 = vector.extract_strided_slice %9 {offsets = [16, 0], sizes = [8, 16], strides = [1, 1]} : vector<32x16xf32> to vector<8x16xf32>
    %325 = vector.extract_strided_slice %10 {offsets = [16, 0], sizes = [8, 16], strides = [1, 1]} : vector<32x16xf32> to vector<8x16xf32>
    %cst_116 = arith.constant dense<0.000000e+00> : vector<16x16xf32>
    %326 = tpu.matmul %324, %323, %cst_116 {dimension_numbers = #tpu.dot_dimension_numbers<[0], [0], [1], [1], [0, 1, 1, 1], [], []>} : vector<8x16xf32>, vector<8x16xf32>, vector<16x16xf32> -> vector<16x16xf32>
    %327 = vector.extract_strided_slice %12 {offsets = [18, 0], sizes = [1, 16], strides = [1, 1]} : vector<36x16xf32> to vector<1x16xf32>
    %c-4_i32_117 = arith.constant -4 : i32
    %328 = vector.broadcast %c-4_i32_117 : i32 to vector<16x16xi32>
    %329 = arith.cmpi eq, %27, %328 : vector<16x16xi32>
    %cst_118 = arith.constant 0.000000e+00 : f32
    %330 = vector.shape_cast %327 : vector<1x16xf32> to vector<1x16xf32>
    %331 = vector.broadcast %330 : vector<1x16xf32> to vector<16x16xf32>
    %332 = vector.broadcast %cst_118 : f32 to vector<16x16xf32>
    %333 = arith.select %329, %331, %332 : vector<16x16xi1>, vector<16x16xf32>
    %334 = arith.addf %326, %333 : vector<16x16xf32>
    %335 = vector.extract_strided_slice %12 {offsets = [19, 0], sizes = [1, 16], strides = [1, 1]} : vector<36x16xf32> to vector<1x16xf32>
    %c-3_i32_119 = arith.constant -3 : i32
    %336 = vector.broadcast %c-3_i32_119 : i32 to vector<16x16xi32>
    %337 = arith.cmpi eq, %27, %336 : vector<16x16xi32>
    %cst_120 = arith.constant 0.000000e+00 : f32
    %338 = vector.shape_cast %335 : vector<1x16xf32> to vector<1x16xf32>
    %339 = vector.broadcast %338 : vector<1x16xf32> to vector<16x16xf32>
    %340 = vector.broadcast %cst_120 : f32 to vector<16x16xf32>
    %341 = arith.select %337, %339, %340 : vector<16x16xi1>, vector<16x16xf32>
    %342 = arith.addf %334, %341 : vector<16x16xf32>
    %343 = vector.extract_strided_slice %12 {offsets = [20, 0], sizes = [1, 16], strides = [1, 1]} : vector<36x16xf32> to vector<1x16xf32>
    %c-2_i32_121 = arith.constant -2 : i32
    %344 = vector.broadcast %c-2_i32_121 : i32 to vector<16x16xi32>
    %345 = arith.cmpi eq, %27, %344 : vector<16x16xi32>
    %cst_122 = arith.constant 0.000000e+00 : f32
    %346 = vector.shape_cast %343 : vector<1x16xf32> to vector<1x16xf32>
    %347 = vector.broadcast %346 : vector<1x16xf32> to vector<16x16xf32>
    %348 = vector.broadcast %cst_122 : f32 to vector<16x16xf32>
    %349 = arith.select %345, %347, %348 : vector<16x16xi1>, vector<16x16xf32>
    %350 = arith.addf %342, %349 : vector<16x16xf32>
    %351 = vector.extract_strided_slice %12 {offsets = [21, 0], sizes = [1, 16], strides = [1, 1]} : vector<36x16xf32> to vector<1x16xf32>
    %c-1_i32_123 = arith.constant -1 : i32
    %352 = vector.broadcast %c-1_i32_123 : i32 to vector<16x16xi32>
    %353 = arith.cmpi eq, %27, %352 : vector<16x16xi32>
    %cst_124 = arith.constant 0.000000e+00 : f32
    %354 = vector.shape_cast %351 : vector<1x16xf32> to vector<1x16xf32>
    %355 = vector.broadcast %354 : vector<1x16xf32> to vector<16x16xf32>
    %356 = vector.broadcast %cst_124 : f32 to vector<16x16xf32>
    %357 = arith.select %353, %355, %356 : vector<16x16xi1>, vector<16x16xf32>
    %358 = arith.addf %350, %357 : vector<16x16xf32>
    %359 = vector.extract_strided_slice %12 {offsets = [22, 0], sizes = [1, 16], strides = [1, 1]} : vector<36x16xf32> to vector<1x16xf32>
    %c0_i32_125 = arith.constant 0 : i32
    %360 = vector.broadcast %c0_i32_125 : i32 to vector<16x16xi32>
    %361 = arith.cmpi eq, %27, %360 : vector<16x16xi32>
    %cst_126 = arith.constant 0.000000e+00 : f32
    %362 = vector.shape_cast %359 : vector<1x16xf32> to vector<1x16xf32>
    %363 = vector.broadcast %362 : vector<1x16xf32> to vector<16x16xf32>
    %364 = vector.broadcast %cst_126 : f32 to vector<16x16xf32>
    %365 = arith.select %361, %363, %364 : vector<16x16xi1>, vector<16x16xf32>
    %366 = arith.addf %358, %365 : vector<16x16xf32>
    %367 = vector.extract_strided_slice %12 {offsets = [23, 0], sizes = [1, 16], strides = [1, 1]} : vector<36x16xf32> to vector<1x16xf32>
    %c1_i32_127 = arith.constant 1 : i32
    %368 = vector.broadcast %c1_i32_127 : i32 to vector<16x16xi32>
    %369 = arith.cmpi eq, %27, %368 : vector<16x16xi32>
    %cst_128 = arith.constant 0.000000e+00 : f32
    %370 = vector.shape_cast %367 : vector<1x16xf32> to vector<1x16xf32>
    %371 = vector.broadcast %370 : vector<1x16xf32> to vector<16x16xf32>
    %372 = vector.broadcast %cst_128 : f32 to vector<16x16xf32>
    %373 = arith.select %369, %371, %372 : vector<16x16xi1>, vector<16x16xf32>
    %374 = arith.addf %366, %373 : vector<16x16xf32>
    %375 = vector.extract_strided_slice %12 {offsets = [24, 0], sizes = [1, 16], strides = [1, 1]} : vector<36x16xf32> to vector<1x16xf32>
    %c2_i32_129 = arith.constant 2 : i32
    %376 = vector.broadcast %c2_i32_129 : i32 to vector<16x16xi32>
    %377 = arith.cmpi eq, %27, %376 : vector<16x16xi32>
    %cst_130 = arith.constant 0.000000e+00 : f32
    %378 = vector.shape_cast %375 : vector<1x16xf32> to vector<1x16xf32>
    %379 = vector.broadcast %378 : vector<1x16xf32> to vector<16x16xf32>
    %380 = vector.broadcast %cst_130 : f32 to vector<16x16xf32>
    %381 = arith.select %377, %379, %380 : vector<16x16xi1>, vector<16x16xf32>
    %382 = arith.addf %374, %381 : vector<16x16xf32>
    %383 = vector.extract_strided_slice %12 {offsets = [25, 0], sizes = [1, 16], strides = [1, 1]} : vector<36x16xf32> to vector<1x16xf32>
    %c3_i32_131 = arith.constant 3 : i32
    %384 = vector.broadcast %c3_i32_131 : i32 to vector<16x16xi32>
    %385 = arith.cmpi eq, %27, %384 : vector<16x16xi32>
    %cst_132 = arith.constant 0.000000e+00 : f32
    %386 = vector.shape_cast %383 : vector<1x16xf32> to vector<1x16xf32>
    %387 = vector.broadcast %386 : vector<1x16xf32> to vector<16x16xf32>
    %388 = vector.broadcast %cst_132 : f32 to vector<16x16xf32>
    %389 = arith.select %385, %387, %388 : vector<16x16xi1>, vector<16x16xf32>
    %390 = arith.addf %382, %389 : vector<16x16xf32>
    %391 = vector.extract_strided_slice %12 {offsets = [26, 0], sizes = [1, 16], strides = [1, 1]} : vector<36x16xf32> to vector<1x16xf32>
    %c4_i32_133 = arith.constant 4 : i32
    %392 = vector.broadcast %c4_i32_133 : i32 to vector<16x16xi32>
    %393 = arith.cmpi eq, %27, %392 : vector<16x16xi32>
    %cst_134 = arith.constant 0.000000e+00 : f32
    %394 = vector.shape_cast %391 : vector<1x16xf32> to vector<1x16xf32>
    %395 = vector.broadcast %394 : vector<1x16xf32> to vector<16x16xf32>
    %396 = vector.broadcast %cst_134 : f32 to vector<16x16xf32>
    %397 = arith.select %393, %395, %396 : vector<16x16xi1>, vector<16x16xf32>
    %398 = arith.addf %390, %397 : vector<16x16xf32>
    %cst_135 = arith.constant -1.000000e+04 : f32
    %399 = vector.broadcast %cst_135 : f32 to vector<16x16xf32>
    %400 = arith.select %24, %399, %398 : vector<16x16xi1>, vector<16x16xf32>
    %cst_136 = arith.constant dense<0xFF800000> : vector<16xf32>
    %401 = vector.multi_reduction <maximumf>, %400, %cst_136 [0] : vector<16x16xf32> to vector<16xf32>
    %402 = vector.shape_cast %401 : vector<16xf32> to vector<1x16xf32>
    %403 = vector.broadcast %402 : vector<1x16xf32> to vector<16x16xf32>
    %404 = arith.subf %400, %403 : vector<16x16xf32>
    %405 = math.exp %404 : vector<16x16xf32>
    %cst_137 = arith.constant dense<0.000000e+00> : vector<16xf32>
    %406 = vector.multi_reduction <add>, %405, %cst_137 [0] : vector<16x16xf32> to vector<16xf32>
    %407 = vector.shape_cast %406 : vector<16xf32> to vector<1x16xf32>
    %408 = tpu.reciprocal %407 {approx = true} : vector<1x16xf32> -> vector<1x16xf32>
    %409 = vector.broadcast %408 : vector<1x16xf32> to vector<16x16xf32>
    %410 = arith.mulf %405, %409 : vector<16x16xf32>
    %cst_138 = arith.constant dense<0.000000e+00> : vector<8x16xf32>
    %411 = tpu.matmul %325, %410, %cst_138 {dimension_numbers = #tpu.dot_dimension_numbers<[1], [0], [0], [1], [0, 0, 1, 1], [], []>} : vector<8x16xf32>, vector<16x16xf32>, vector<8x16xf32> -> vector<8x16xf32>
    %c-4_i32_139 = arith.constant -4 : i32
    %412 = vector.broadcast %c-4_i32_139 : i32 to vector<16x16xi32>
    %413 = arith.cmpi eq, %27, %412 : vector<16x16xi32>
    %cst_140 = arith.constant 0.000000e+00 : f32
    %414 = vector.broadcast %cst_140 : f32 to vector<16x16xf32>
    %415 = arith.select %413, %410, %414 : vector<16x16xi1>, vector<16x16xf32>
    %cst_141 = arith.constant dense<0.000000e+00> : vector<16xf32>
    %416 = vector.multi_reduction <add>, %415, %cst_141 [0] : vector<16x16xf32> to vector<16xf32>
    %417 = vector.shape_cast %416 : vector<16xf32> to vector<1x16xf32>
    %c-3_i32_142 = arith.constant -3 : i32
    %418 = vector.broadcast %c-3_i32_142 : i32 to vector<16x16xi32>
    %419 = arith.cmpi eq, %27, %418 : vector<16x16xi32>
    %cst_143 = arith.constant 0.000000e+00 : f32
    %420 = vector.broadcast %cst_143 : f32 to vector<16x16xf32>
    %421 = arith.select %419, %410, %420 : vector<16x16xi1>, vector<16x16xf32>
    %cst_144 = arith.constant dense<0.000000e+00> : vector<16xf32>
    %422 = vector.multi_reduction <add>, %421, %cst_144 [0] : vector<16x16xf32> to vector<16xf32>
    %423 = vector.shape_cast %422 : vector<16xf32> to vector<1x16xf32>
    %c-2_i32_145 = arith.constant -2 : i32
    %424 = vector.broadcast %c-2_i32_145 : i32 to vector<16x16xi32>
    %425 = arith.cmpi eq, %27, %424 : vector<16x16xi32>
    %cst_146 = arith.constant 0.000000e+00 : f32
    %426 = vector.broadcast %cst_146 : f32 to vector<16x16xf32>
    %427 = arith.select %425, %410, %426 : vector<16x16xi1>, vector<16x16xf32>
    %cst_147 = arith.constant dense<0.000000e+00> : vector<16xf32>
    %428 = vector.multi_reduction <add>, %427, %cst_147 [0] : vector<16x16xf32> to vector<16xf32>
    %429 = vector.shape_cast %428 : vector<16xf32> to vector<1x16xf32>
    %c-1_i32_148 = arith.constant -1 : i32
    %430 = vector.broadcast %c-1_i32_148 : i32 to vector<16x16xi32>
    %431 = arith.cmpi eq, %27, %430 : vector<16x16xi32>
    %cst_149 = arith.constant 0.000000e+00 : f32
    %432 = vector.broadcast %cst_149 : f32 to vector<16x16xf32>
    %433 = arith.select %431, %410, %432 : vector<16x16xi1>, vector<16x16xf32>
    %cst_150 = arith.constant dense<0.000000e+00> : vector<16xf32>
    %434 = vector.multi_reduction <add>, %433, %cst_150 [0] : vector<16x16xf32> to vector<16xf32>
    %435 = vector.shape_cast %434 : vector<16xf32> to vector<1x16xf32>
    %c0_i32_151 = arith.constant 0 : i32
    %436 = vector.broadcast %c0_i32_151 : i32 to vector<16x16xi32>
    %437 = arith.cmpi eq, %27, %436 : vector<16x16xi32>
    %cst_152 = arith.constant 0.000000e+00 : f32
    %438 = vector.broadcast %cst_152 : f32 to vector<16x16xf32>
    %439 = arith.select %437, %410, %438 : vector<16x16xi1>, vector<16x16xf32>
    %cst_153 = arith.constant dense<0.000000e+00> : vector<16xf32>
    %440 = vector.multi_reduction <add>, %439, %cst_153 [0] : vector<16x16xf32> to vector<16xf32>
    %441 = vector.shape_cast %440 : vector<16xf32> to vector<1x16xf32>
    %c1_i32_154 = arith.constant 1 : i32
    %442 = vector.broadcast %c1_i32_154 : i32 to vector<16x16xi32>
    %443 = arith.cmpi eq, %27, %442 : vector<16x16xi32>
    %cst_155 = arith.constant 0.000000e+00 : f32
    %444 = vector.broadcast %cst_155 : f32 to vector<16x16xf32>
    %445 = arith.select %443, %410, %444 : vector<16x16xi1>, vector<16x16xf32>
    %cst_156 = arith.constant dense<0.000000e+00> : vector<16xf32>
    %446 = vector.multi_reduction <add>, %445, %cst_156 [0] : vector<16x16xf32> to vector<16xf32>
    %447 = vector.shape_cast %446 : vector<16xf32> to vector<1x16xf32>
    %c2_i32_157 = arith.constant 2 : i32
    %448 = vector.broadcast %c2_i32_157 : i32 to vector<16x16xi32>
    %449 = arith.cmpi eq, %27, %448 : vector<16x16xi32>
    %cst_158 = arith.constant 0.000000e+00 : f32
    %450 = vector.broadcast %cst_158 : f32 to vector<16x16xf32>
    %451 = arith.select %449, %410, %450 : vector<16x16xi1>, vector<16x16xf32>
    %cst_159 = arith.constant dense<0.000000e+00> : vector<16xf32>
    %452 = vector.multi_reduction <add>, %451, %cst_159 [0] : vector<16x16xf32> to vector<16xf32>
    %453 = vector.shape_cast %452 : vector<16xf32> to vector<1x16xf32>
    %c3_i32_160 = arith.constant 3 : i32
    %454 = vector.broadcast %c3_i32_160 : i32 to vector<16x16xi32>
    %455 = arith.cmpi eq, %27, %454 : vector<16x16xi32>
    %cst_161 = arith.constant 0.000000e+00 : f32
    %456 = vector.broadcast %cst_161 : f32 to vector<16x16xf32>
    %457 = arith.select %455, %410, %456 : vector<16x16xi1>, vector<16x16xf32>
    %cst_162 = arith.constant dense<0.000000e+00> : vector<16xf32>
    %458 = vector.multi_reduction <add>, %457, %cst_162 [0] : vector<16x16xf32> to vector<16xf32>
    %459 = vector.shape_cast %458 : vector<16xf32> to vector<1x16xf32>
    %c4_i32_163 = arith.constant 4 : i32
    %460 = vector.broadcast %c4_i32_163 : i32 to vector<16x16xi32>
    %461 = arith.cmpi eq, %27, %460 : vector<16x16xi32>
    %cst_164 = arith.constant 0.000000e+00 : f32
    %462 = vector.broadcast %cst_164 : f32 to vector<16x16xf32>
    %463 = arith.select %461, %410, %462 : vector<16x16xi1>, vector<16x16xf32>
    %cst_165 = arith.constant dense<0.000000e+00> : vector<16xf32>
    %464 = vector.multi_reduction <add>, %463, %cst_165 [0] : vector<16x16xf32> to vector<16xf32>
    %465 = vector.shape_cast %464 : vector<16xf32> to vector<1x16xf32>
    %466 = tpu.concatenate %417, %423, %429, %435, %441, %447, %453, %459, %465 in 0 : vector<1x16xf32>, vector<1x16xf32>, vector<1x16xf32>, vector<1x16xf32>, vector<1x16xf32>, vector<1x16xf32>, vector<1x16xf32>, vector<1x16xf32>, vector<1x16xf32> -> vector<9x16xf32>
    %cst_166 = arith.constant dense<0.000000e+00> : vector<8x16xf32>
    %467 = tpu.matmul %28, %466, %cst_166 {dimension_numbers = #tpu.dot_dimension_numbers<[0], [0], [1], [1], [0, 1, 1, 1], [], []>} : vector<9x8xf32>, vector<9x16xf32>, vector<8x16xf32> -> vector<8x16xf32>
    %468 = arith.addf %411, %467 : vector<8x16xf32>
    %c16 = arith.constant 16 : index
    %c0_167 = arith.constant 0 : index
    %469 = vector.load %arg13[%c16, %c0_167] : memref<32x16xf32, #tpu.memory_space<vmem>>, vector<8x16xf32>
    tpu.vector_store %arg13[%c16, %c0_167], %468 {strides = array<i32>} : memref<32x16xf32, #tpu.memory_space<vmem>>, vector<8x16xf32>,
    %470 = vector.extract_strided_slice %8 {offsets = [24, 0], sizes = [8, 16], strides = [1, 1]} : vector<32x16xf32> to vector<8x16xf32>
    %471 = vector.extract_strided_slice %9 {offsets = [24, 0], sizes = [8, 16], strides = [1, 1]} : vector<32x16xf32> to vector<8x16xf32>
    %472 = vector.extract_strided_slice %10 {offsets = [24, 0], sizes = [8, 16], strides = [1, 1]} : vector<32x16xf32> to vector<8x16xf32>
    %cst_168 = arith.constant dense<0.000000e+00> : vector<16x16xf32>
    %473 = tpu.matmul %471, %470, %cst_168 {dimension_numbers = #tpu.dot_dimension_numbers<[0], [0], [1], [1], [0, 1, 1, 1], [], []>} : vector<8x16xf32>, vector<8x16xf32>, vector<16x16xf32> -> vector<16x16xf32>
    %474 = vector.extract_strided_slice %12 {offsets = [27, 0], sizes = [1, 16], strides = [1, 1]} : vector<36x16xf32> to vector<1x16xf32>
    %c-4_i32_169 = arith.constant -4 : i32
    %475 = vector.broadcast %c-4_i32_169 : i32 to vector<16x16xi32>
    %476 = arith.cmpi eq, %27, %475 : vector<16x16xi32>
    %cst_170 = arith.constant 0.000000e+00 : f32
    %477 = vector.shape_cast %474 : vector<1x16xf32> to vector<1x16xf32>
    %478 = vector.broadcast %477 : vector<1x16xf32> to vector<16x16xf32>
    %479 = vector.broadcast %cst_170 : f32 to vector<16x16xf32>
    %480 = arith.select %476, %478, %479 : vector<16x16xi1>, vector<16x16xf32>
    %481 = arith.addf %473, %480 : vector<16x16xf32>
    %482 = vector.extract_strided_slice %12 {offsets = [28, 0], sizes = [1, 16], strides = [1, 1]} : vector<36x16xf32> to vector<1x16xf32>
    %c-3_i32_171 = arith.constant -3 : i32
    %483 = vector.broadcast %c-3_i32_171 : i32 to vector<16x16xi32>
    %484 = arith.cmpi eq, %27, %483 : vector<16x16xi32>
    %cst_172 = arith.constant 0.000000e+00 : f32
    %485 = vector.shape_cast %482 : vector<1x16xf32> to vector<1x16xf32>
    %486 = vector.broadcast %485 : vector<1x16xf32> to vector<16x16xf32>
    %487 = vector.broadcast %cst_172 : f32 to vector<16x16xf32>
    %488 = arith.select %484, %486, %487 : vector<16x16xi1>, vector<16x16xf32>
    %489 = arith.addf %481, %488 : vector<16x16xf32>
    %490 = vector.extract_strided_slice %12 {offsets = [29, 0], sizes = [1, 16], strides = [1, 1]} : vector<36x16xf32> to vector<1x16xf32>
    %c-2_i32_173 = arith.constant -2 : i32
    %491 = vector.broadcast %c-2_i32_173 : i32 to vector<16x16xi32>
    %492 = arith.cmpi eq, %27, %491 : vector<16x16xi32>
    %cst_174 = arith.constant 0.000000e+00 : f32
    %493 = vector.shape_cast %490 : vector<1x16xf32> to vector<1x16xf32>
    %494 = vector.broadcast %493 : vector<1x16xf32> to vector<16x16xf32>
    %495 = vector.broadcast %cst_174 : f32 to vector<16x16xf32>
    %496 = arith.select %492, %494, %495 : vector<16x16xi1>, vector<16x16xf32>
    %497 = arith.addf %489, %496 : vector<16x16xf32>
    %498 = vector.extract_strided_slice %12 {offsets = [30, 0], sizes = [1, 16], strides = [1, 1]} : vector<36x16xf32> to vector<1x16xf32>
    %c-1_i32_175 = arith.constant -1 : i32
    %499 = vector.broadcast %c-1_i32_175 : i32 to vector<16x16xi32>
    %500 = arith.cmpi eq, %27, %499 : vector<16x16xi32>
    %cst_176 = arith.constant 0.000000e+00 : f32
    %501 = vector.shape_cast %498 : vector<1x16xf32> to vector<1x16xf32>
    %502 = vector.broadcast %501 : vector<1x16xf32> to vector<16x16xf32>
    %503 = vector.broadcast %cst_176 : f32 to vector<16x16xf32>
    %504 = arith.select %500, %502, %503 : vector<16x16xi1>, vector<16x16xf32>
    %505 = arith.addf %497, %504 : vector<16x16xf32>
    %506 = vector.extract_strided_slice %12 {offsets = [31, 0], sizes = [1, 16], strides = [1, 1]} : vector<36x16xf32> to vector<1x16xf32>
    %c0_i32_177 = arith.constant 0 : i32
    %507 = vector.broadcast %c0_i32_177 : i32 to vector<16x16xi32>
    %508 = arith.cmpi eq, %27, %507 : vector<16x16xi32>
    %cst_178 = arith.constant 0.000000e+00 : f32
    %509 = vector.shape_cast %506 : vector<1x16xf32> to vector<1x16xf32>
    %510 = vector.broadcast %509 : vector<1x16xf32> to vector<16x16xf32>
    %511 = vector.broadcast %cst_178 : f32 to vector<16x16xf32>
    %512 = arith.select %508, %510, %511 : vector<16x16xi1>, vector<16x16xf32>
    %513 = arith.addf %505, %512 : vector<16x16xf32>
    %514 = vector.extract_strided_slice %12 {offsets = [32, 0], sizes = [1, 16], strides = [1, 1]} : vector<36x16xf32> to vector<1x16xf32>
    %c1_i32_179 = arith.constant 1 : i32
    %515 = vector.broadcast %c1_i32_179 : i32 to vector<16x16xi32>
    %516 = arith.cmpi eq, %27, %515 : vector<16x16xi32>
    %cst_180 = arith.constant 0.000000e+00 : f32
    %517 = vector.shape_cast %514 : vector<1x16xf32> to vector<1x16xf32>
    %518 = vector.broadcast %517 : vector<1x16xf32> to vector<16x16xf32>
    %519 = vector.broadcast %cst_180 : f32 to vector<16x16xf32>
    %520 = arith.select %516, %518, %519 : vector<16x16xi1>, vector<16x16xf32>
    %521 = arith.addf %513, %520 : vector<16x16xf32>
    %522 = vector.extract_strided_slice %12 {offsets = [33, 0], sizes = [1, 16], strides = [1, 1]} : vector<36x16xf32> to vector<1x16xf32>
    %c2_i32_181 = arith.constant 2 : i32
    %523 = vector.broadcast %c2_i32_181 : i32 to vector<16x16xi32>
    %524 = arith.cmpi eq, %27, %523 : vector<16x16xi32>
    %cst_182 = arith.constant 0.000000e+00 : f32
    %525 = vector.shape_cast %522 : vector<1x16xf32> to vector<1x16xf32>
    %526 = vector.broadcast %525 : vector<1x16xf32> to vector<16x16xf32>
    %527 = vector.broadcast %cst_182 : f32 to vector<16x16xf32>
    %528 = arith.select %524, %526, %527 : vector<16x16xi1>, vector<16x16xf32>
    %529 = arith.addf %521, %528 : vector<16x16xf32>
    %530 = vector.extract_strided_slice %12 {offsets = [34, 0], sizes = [1, 16], strides = [1, 1]} : vector<36x16xf32> to vector<1x16xf32>
    %c3_i32_183 = arith.constant 3 : i32
    %531 = vector.broadcast %c3_i32_183 : i32 to vector<16x16xi32>
    %532 = arith.cmpi eq, %27, %531 : vector<16x16xi32>
    %cst_184 = arith.constant 0.000000e+00 : f32
    %533 = vector.shape_cast %530 : vector<1x16xf32> to vector<1x16xf32>
    %534 = vector.broadcast %533 : vector<1x16xf32> to vector<16x16xf32>
    %535 = vector.broadcast %cst_184 : f32 to vector<16x16xf32>
    %536 = arith.select %532, %534, %535 : vector<16x16xi1>, vector<16x16xf32>
    %537 = arith.addf %529, %536 : vector<16x16xf32>
    %538 = vector.extract_strided_slice %12 {offsets = [35, 0], sizes = [1, 16], strides = [1, 1]} : vector<36x16xf32> to vector<1x16xf32>
    %c4_i32_185 = arith.constant 4 : i32
    %539 = vector.broadcast %c4_i32_185 : i32 to vector<16x16xi32>
    %540 = arith.cmpi eq, %27, %539 : vector<16x16xi32>
    %cst_186 = arith.constant 0.000000e+00 : f32
    %541 = vector.shape_cast %538 : vector<1x16xf32> to vector<1x16xf32>
    %542 = vector.broadcast %541 : vector<1x16xf32> to vector<16x16xf32>
    %543 = vector.broadcast %cst_186 : f32 to vector<16x16xf32>
    %544 = arith.select %540, %542, %543 : vector<16x16xi1>, vector<16x16xf32>
    %545 = arith.addf %537, %544 : vector<16x16xf32>
    %cst_187 = arith.constant -1.000000e+04 : f32
    %546 = vector.broadcast %cst_187 : f32 to vector<16x16xf32>
    %547 = arith.select %24, %546, %545 : vector<16x16xi1>, vector<16x16xf32>
    %cst_188 = arith.constant dense<0xFF800000> : vector<16xf32>
    %548 = vector.multi_reduction <maximumf>, %547, %cst_188 [0] : vector<16x16xf32> to vector<16xf32>
    %549 = vector.shape_cast %548 : vector<16xf32> to vector<1x16xf32>
    %550 = vector.broadcast %549 : vector<1x16xf32> to vector<16x16xf32>
    %551 = arith.subf %547, %550 : vector<16x16xf32>
    %552 = math.exp %551 : vector<16x16xf32>
    %cst_189 = arith.constant dense<0.000000e+00> : vector<16xf32>
    %553 = vector.multi_reduction <add>, %552, %cst_189 [0] : vector<16x16xf32> to vector<16xf32>
    %554 = vector.shape_cast %553 : vector<16xf32> to vector<1x16xf32>
    %555 = tpu.reciprocal %554 {approx = true} : vector<1x16xf32> -> vector<1x16xf32>
    %556 = vector.broadcast %555 : vector<1x16xf32> to vector<16x16xf32>
    %557 = arith.mulf %552, %556 : vector<16x16xf32>
    %cst_190 = arith.constant dense<0.000000e+00> : vector<8x16xf32>
    %558 = tpu.matmul %472, %557, %cst_190 {dimension_numbers = #tpu.dot_dimension_numbers<[1], [0], [0], [1], [0, 0, 1, 1], [], []>} : vector<8x16xf32>, vector<16x16xf32>, vector<8x16xf32> -> vector<8x16xf32>
    %c-4_i32_191 = arith.constant -4 : i32
    %559 = vector.broadcast %c-4_i32_191 : i32 to vector<16x16xi32>
    %560 = arith.cmpi eq, %27, %559 : vector<16x16xi32>
    %cst_192 = arith.constant 0.000000e+00 : f32
    %561 = vector.broadcast %cst_192 : f32 to vector<16x16xf32>
    %562 = arith.select %560, %557, %561 : vector<16x16xi1>, vector<16x16xf32>
    %cst_193 = arith.constant dense<0.000000e+00> : vector<16xf32>
    %563 = vector.multi_reduction <add>, %562, %cst_193 [0] : vector<16x16xf32> to vector<16xf32>
    %564 = vector.shape_cast %563 : vector<16xf32> to vector<1x16xf32>
    %c-3_i32_194 = arith.constant -3 : i32
    %565 = vector.broadcast %c-3_i32_194 : i32 to vector<16x16xi32>
    %566 = arith.cmpi eq, %27, %565 : vector<16x16xi32>
    %cst_195 = arith.constant 0.000000e+00 : f32
    %567 = vector.broadcast %cst_195 : f32 to vector<16x16xf32>
    %568 = arith.select %566, %557, %567 : vector<16x16xi1>, vector<16x16xf32>
    %cst_196 = arith.constant dense<0.000000e+00> : vector<16xf32>
    %569 = vector.multi_reduction <add>, %568, %cst_196 [0] : vector<16x16xf32> to vector<16xf32>
    %570 = vector.shape_cast %569 : vector<16xf32> to vector<1x16xf32>
    %c-2_i32_197 = arith.constant -2 : i32
    %571 = vector.broadcast %c-2_i32_197 : i32 to vector<16x16xi32>
    %572 = arith.cmpi eq, %27, %571 : vector<16x16xi32>
    %cst_198 = arith.constant 0.000000e+00 : f32
    %573 = vector.broadcast %cst_198 : f32 to vector<16x16xf32>
    %574 = arith.select %572, %557, %573 : vector<16x16xi1>, vector<16x16xf32>
    %cst_199 = arith.constant dense<0.000000e+00> : vector<16xf32>
    %575 = vector.multi_reduction <add>, %574, %cst_199 [0] : vector<16x16xf32> to vector<16xf32>
    %576 = vector.shape_cast %575 : vector<16xf32> to vector<1x16xf32>
    %c-1_i32_200 = arith.constant -1 : i32
    %577 = vector.broadcast %c-1_i32_200 : i32 to vector<16x16xi32>
    %578 = arith.cmpi eq, %27, %577 : vector<16x16xi32>
    %cst_201 = arith.constant 0.000000e+00 : f32
    %579 = vector.broadcast %cst_201 : f32 to vector<16x16xf32>
    %580 = arith.select %578, %557, %579 : vector<16x16xi1>, vector<16x16xf32>
    %cst_202 = arith.constant dense<0.000000e+00> : vector<16xf32>
    %581 = vector.multi_reduction <add>, %580, %cst_202 [0] : vector<16x16xf32> to vector<16xf32>
    %582 = vector.shape_cast %581 : vector<16xf32> to vector<1x16xf32>
    %c0_i32_203 = arith.constant 0 : i32
    %583 = vector.broadcast %c0_i32_203 : i32 to vector<16x16xi32>
    %584 = arith.cmpi eq, %27, %583 : vector<16x16xi32>
    %cst_204 = arith.constant 0.000000e+00 : f32
    %585 = vector.broadcast %cst_204 : f32 to vector<16x16xf32>
    %586 = arith.select %584, %557, %585 : vector<16x16xi1>, vector<16x16xf32>
    %cst_205 = arith.constant dense<0.000000e+00> : vector<16xf32>
    %587 = vector.multi_reduction <add>, %586, %cst_205 [0] : vector<16x16xf32> to vector<16xf32>
    %588 = vector.shape_cast %587 : vector<16xf32> to vector<1x16xf32>
    %c1_i32_206 = arith.constant 1 : i32
    %589 = vector.broadcast %c1_i32_206 : i32 to vector<16x16xi32>
    %590 = arith.cmpi eq, %27, %589 : vector<16x16xi32>
    %cst_207 = arith.constant 0.000000e+00 : f32
    %591 = vector.broadcast %cst_207 : f32 to vector<16x16xf32>
    %592 = arith.select %590, %557, %591 : vector<16x16xi1>, vector<16x16xf32>
    %cst_208 = arith.constant dense<0.000000e+00> : vector<16xf32>
    %593 = vector.multi_reduction <add>, %592, %cst_208 [0] : vector<16x16xf32> to vector<16xf32>
    %594 = vector.shape_cast %593 : vector<16xf32> to vector<1x16xf32>
    %c2_i32_209 = arith.constant 2 : i32
    %595 = vector.broadcast %c2_i32_209 : i32 to vector<16x16xi32>
    %596 = arith.cmpi eq, %27, %595 : vector<16x16xi32>
    %cst_210 = arith.constant 0.000000e+00 : f32
    %597 = vector.broadcast %cst_210 : f32 to vector<16x16xf32>
    %598 = arith.select %596, %557, %597 : vector<16x16xi1>, vector<16x16xf32>
    %cst_211 = arith.constant dense<0.000000e+00> : vector<16xf32>
    %599 = vector.multi_reduction <add>, %598, %cst_211 [0] : vector<16x16xf32> to vector<16xf32>
    %600 = vector.shape_cast %599 : vector<16xf32> to vector<1x16xf32>
    %c3_i32_212 = arith.constant 3 : i32
    %601 = vector.broadcast %c3_i32_212 : i32 to vector<16x16xi32>
    %602 = arith.cmpi eq, %27, %601 : vector<16x16xi32>
    %cst_213 = arith.constant 0.000000e+00 : f32
    %603 = vector.broadcast %cst_213 : f32 to vector<16x16xf32>
    %604 = arith.select %602, %557, %603 : vector<16x16xi1>, vector<16x16xf32>
    %cst_214 = arith.constant dense<0.000000e+00> : vector<16xf32>
    %605 = vector.multi_reduction <add>, %604, %cst_214 [0] : vector<16x16xf32> to vector<16xf32>
    %606 = vector.shape_cast %605 : vector<16xf32> to vector<1x16xf32>
    %c4_i32_215 = arith.constant 4 : i32
    %607 = vector.broadcast %c4_i32_215 : i32 to vector<16x16xi32>
    %608 = arith.cmpi eq, %27, %607 : vector<16x16xi32>
    %cst_216 = arith.constant 0.000000e+00 : f32
    %609 = vector.broadcast %cst_216 : f32 to vector<16x16xf32>
    %610 = arith.select %608, %557, %609 : vector<16x16xi1>, vector<16x16xf32>
    %cst_217 = arith.constant dense<0.000000e+00> : vector<16xf32>
    %611 = vector.multi_reduction <add>, %610, %cst_217 [0] : vector<16x16xf32> to vector<16xf32>
    %612 = vector.shape_cast %611 : vector<16xf32> to vector<1x16xf32>
    %613 = tpu.concatenate %564, %570, %576, %582, %588, %594, %600, %606, %612 in 0 : vector<1x16xf32>, vector<1x16xf32>, vector<1x16xf32>, vector<1x16xf32>, vector<1x16xf32>, vector<1x16xf32>, vector<1x16xf32>, vector<1x16xf32>, vector<1x16xf32> -> vector<9x16xf32>
    %cst_218 = arith.constant dense<0.000000e+00> : vector<8x16xf32>
    %614 = tpu.matmul %28, %613, %cst_218 {dimension_numbers = #tpu.dot_dimension_numbers<[0], [0], [1], [1], [0, 1, 1, 1], [], []>} : vector<9x8xf32>, vector<9x16xf32>, vector<8x16xf32> -> vector<8x16xf32>
    %615 = arith.addf %558, %614 : vector<8x16xf32>
    %c24 = arith.constant 24 : index
    %c0_219 = arith.constant 0 : index
    %616 = vector.load %arg13[%c24, %c0_219] : memref<32x16xf32, #tpu.memory_space<vmem>>, vector<8x16xf32>
    tpu.vector_store %arg13[%c24, %c0_219], %615 {strides = array<i32>} : memref<32x16xf32, #tpu.memory_space<vmem>>, vector<8x16xf32>,
    %c0_220 = arith.constant 0 : index
    %c0_221 = arith.constant 0 : index
    %617 = vector.load %arg8[%c0_220, %c0_221] : memref<32x32xbf16, #tpu.memory_space<vmem>>, vector<32x32xbf16>
    %c0_222 = arith.constant 0 : index
    %c0_223 = arith.constant 0 : index
    %618 = vector.load %arg13[%c0_222, %c0_223] : memref<32x16xf32, #tpu.memory_space<vmem>>, vector<32x16xf32>
    %619 = arith.truncf %618 : vector<32x16xf32> to vector<32x16xbf16>
    %cst_224 = arith.constant dense<0.000000e+00> : vector<32x16xf32>
    %620 = tpu.matmul %617, %619, %cst_224 {dimension_numbers = #tpu.dot_dimension_numbers<[1], [0], [0], [1], [0, 0, 1, 1], [], []>} : vector<32x32xbf16>, vector<32x16xbf16>, vector<32x16xf32> -> vector<32x16xf32>
    %c0_225 = arith.constant 0 : index
    %c0_226 = arith.constant 0 : index
    %621 = vector.load %arg9[%c0_225, %c0_226] : memref<32x1xf32, #tpu.memory_space<vmem>>, vector<32x1xf32>
    %622 = vector.broadcast %621 : vector<32x1xf32> to vector<32x16xf32>
    %623 = arith.addf %620, %622 : vector<32x16xf32>
    %624 = arith.addf %1, %623 : vector<32x16xf32>
    %cst_227 = arith.constant dense<0.000000e+00> : vector<16xf32>
    %625 = vector.multi_reduction <add>, %624, %cst_227 [0] : vector<32x16xf32> to vector<16xf32>
    %626 = vector.shape_cast %625 : vector<16xf32> to vector<1x16xf32>
    %cst_228 = arith.constant 3.200000e+01 : f32
    %627 = vector.broadcast %cst_228 : f32 to vector<1x16xf32>
    %628 = arith.divf %626, %627 : vector<1x16xf32>
    %629 = vector.broadcast %628 : vector<1x16xf32> to vector<32x16xf32>
    %630 = arith.subf %624, %629 : vector<32x16xf32>
    %631 = arith.mulf %630, %630 : vector<32x16xf32>
    %cst_229 = arith.constant dense<0.000000e+00> : vector<16xf32>
    %632 = vector.multi_reduction <add>, %631, %cst_229 [0] : vector<32x16xf32> to vector<16xf32>
    %633 = vector.shape_cast %632 : vector<16xf32> to vector<1x16xf32>
    %cst_230 = arith.constant 3.200000e+01 : f32
    %634 = vector.broadcast %cst_230 : f32 to vector<1x16xf32>
    %635 = arith.divf %633, %634 : vector<1x16xf32>
    %636 = vector.broadcast %628 : vector<1x16xf32> to vector<32x16xf32>
    %637 = arith.subf %624, %636 : vector<32x16xf32>
    %cst_231 = arith.constant 9.99999974E-6 : f32
    %638 = vector.broadcast %cst_231 : f32 to vector<1x16xf32>
    %639 = arith.addf %635, %638 : vector<1x16xf32>
    %640 = math.rsqrt %639 : vector<1x16xf32>
    %641 = vector.broadcast %640 : vector<1x16xf32> to vector<32x16xf32>
    %642 = arith.mulf %637, %641 : vector<32x16xf32>
    %c0_232 = arith.constant 0 : index
    %c0_233 = arith.constant 0 : index
    %643 = vector.load %arg10[%c0_232, %c0_233] : memref<32x1xf32, #tpu.memory_space<vmem>>, vector<32x1xf32>
    %644 = vector.broadcast %643 : vector<32x1xf32> to vector<32x16xf32>
    %645 = arith.mulf %642, %644 : vector<32x16xf32>
    %c0_234 = arith.constant 0 : index
    %c0_235 = arith.constant 0 : index
    %646 = vector.load %arg11[%c0_234, %c0_235] : memref<32x1xf32, #tpu.memory_space<vmem>>, vector<32x1xf32>
    %647 = vector.broadcast %646 : vector<32x1xf32> to vector<32x16xf32>
    %648 = arith.addf %645, %647 : vector<32x16xf32>
    %c0_236 = arith.constant 0 : index
    %c0_237 = arith.constant 0 : index
    %c0_238 = arith.constant 0 : index
    %649 = vector.load %arg12[%c0_236, %c0_237, %c0_238] : memref<1x32x16xf32, #tpu.memory_space<vmem>>, vector<1x32x16xf32>
    %650 = vector.shape_cast %649 : vector<1x32x16xf32> to vector<32x16xf32>
    %651 = vector.shape_cast %648 : vector<32x16xf32> to vector<1x32x16xf32>
    tpu.vector_store %arg12[%c0_236, %c0_237, %c0_238], %651 {strides = array<i32>} : memref<1x32x16xf32, #tpu.memory_space<vmem>>, vector<1x32x16xf32>,
    return
  }
  func.func @transform_0(%arg0: i32) -> (i32, i32, i32) {
    %c0_i32 = arith.constant 0 : i32
    %c0_i32_0 = arith.constant 0 : i32
    %c0_i32_1 = arith.constant 0 : i32
    return %arg0, %c0_i32, %c0_i32_0 : i32, i32, i32
  }
  func.func @transform_1(%arg0: i32) -> (i32, i32) {
    %c0_i32 = arith.constant 0 : i32
    %c0_i32_0 = arith.constant 0 : i32
    %c0_i32_1 = arith.constant 0 : i32
    return %c0_i32, %c0_i32_0 : i32, i32
  }
  func.func @transform_2(%arg0: i32) -> (i32, i32) {
    %c0_i32 = arith.constant 0 : i32
    %c0_i32_0 = arith.constant 0 : i32
    %c0_i32_1 = arith.constant 0 : i32
    return %c0_i32, %c0_i32_0 : i32, i32
  }
  func.func @transform_3(%arg0: i32) -> (i32, i32) {
    %c0_i32 = arith.constant 0 : i32
    %c0_i32_0 = arith.constant 0 : i32
    %c0_i32_1 = arith.constant 0 : i32
    return %c0_i32, %c0_i32_0 : i32, i32
  }
  func.func @transform_4(%arg0: i32) -> (i32, i32) {
    %c0_i32 = arith.constant 0 : i32
    %c0_i32_0 = arith.constant 0 : i32
    %c0_i32_1 = arith.constant 0 : i32
    return %c0_i32, %c0_i32_0 : i32, i32
  }
  func.func @transform_5(%arg0: i32) -> (i32, i32, i32) {
    %c0_i32 = arith.constant 0 : i32
    %c0_i32_0 = arith.constant 0 : i32
    %c0_i32_1 = arith.constant 0 : i32
    return %arg0, %c0_i32, %c0_i32_0 : i32, i32, i32
  }
  func.func @transform_6(%arg0: i32) -> (i32, i32, i32) {
    %c0_i32 = arith.constant 0 : i32
    %c0_i32_0 = arith.constant 0 : i32
    %c0_i32_1 = arith.constant 0 : i32
    return %arg0, %c0_i32, %c0_i32_0 : i32, i32, i32
  }
  func.func @transform_7(%arg0: i32) -> (i32, i32) {
    %c0_i32 = arith.constant 0 : i32
    %c0_i32_0 = arith.constant 0 : i32
    %c0_i32_1 = arith.constant 0 : i32
    return %c0_i32, %c0_i32_0 : i32, i32
  }
  func.func @transform_8(%arg0: i32) -> (i32, i32) {
    %c0_i32 = arith.constant 0 : i32
    %c0_i32_0 = arith.constant 0 : i32
    %c0_i32_1 = arith.constant 0 : i32
    return %c0_i32, %c0_i32_0 : i32, i32
  }
  func.func @transform_9(%arg0: i32) -> (i32, i32) {
    %c0_i32 = arith.constant 0 : i32
    %c0_i32_0 = arith.constant 0 : i32
    %c0_i32_1 = arith.constant 0 : i32
    return %c0_i32, %c0_i32_0 : i32, i32
  }
  func.func @transform_10(%arg0: i32) -> (i32, i32) {
    %c0_i32 = arith.constant 0 : i32
    %c0_i32_0 = arith.constant 0 : i32
    %c0_i32_1 = arith.constant 0 : i32
    return %c0_i32, %c0_i32_0 : i32, i32
  }
  func.func @transform_11(%arg0: i32) -> (i32, i32, i32) {
    %c0_i32 = arith.constant 0 : i32
    %c0_i32_0 = arith.constant 0 : i32
    %c0_i32_1 = arith.constant 0 : i32
    return %arg0, %c0_i32, %c0_i32_0 : i32, i32, i32
  }
}

</mosaic_0001>

<bundles_post_ra>
// kernel: tpu_custom_call.1
= control target key start
LH: loop header
LB: loop body
LE: loop exit
PB: predicated region body
PF: predicated region fallthrough
CT: control target
= control target key end

     0   :  { %s3396_s17 = smov 0   ;;  %s4454_s0 = inlined_call_operand.vmem [shape: f32[2,32,16], index: 0, kind: input, shape index: {}]   ;;  %s4455_s1 = inlined_call_operand.vmem [shape: bf16[96,32], index: 1, kind: input, shape index: {}]   ;;  %s4456_s2 = inlined_call_operand.vmem [shape: f32[96,1], index: 2, kind: input, shape index: {}]   ;;  %s4457_s3 = inlined_call_operand.vmem [shape: f32[36,32], index: 3, kind: input, shape index: {}]   ;;  %s4458_s4 = inlined_call_operand.vmem [shape: f32[9,8], index: 4, kind: input, shape index: {}]   ;;  %s4459_s5 = inlined_call_operand.vmem [shape: f32[2,1,16], index: 5, kind: input, shape index: {}]   ;;  %s4460_s6 = inlined_call_operand.vmem [shape: f32[2,16,1], index: 6, kind: input, shape index: {}]   ;;  %s4461_s7 = inlined_call_operand.vmem [shape: bf16[32,32], index: 7, kind: input, shape index: {}]   ;;  %s4462_s8 = inlined_call_operand.vmem [shape: f32[32,1], index: 8, kind: input, shape index: {}]   ;;  %s4463_s9 = inlined_call_operand.vmem [shape: f32[32,1], index: 9, kind: input, shape index: {}]   ;;  %s4464_s10 = inlined_call_operand.vmem [shape: f32[32,1], index: 10, kind: input, shape index: {}]   ;;  %s4465_s11 = inlined_call_operand.vmem [shape: f32[2,32,16], index: 11, kind: output, shape index: {}]  }
   0x1 LB: > { %s2992_s18 = sadd.s32 4294967295, %s3329_s17   ;;  %p2996_p0 = scmp.ge.s32.totalorder %s3329_s17, 1  ;;  %s3329_s17 = sphi %s3396_s17, %s21_s17  }
   0x2   : > { %p355_p1 = scmp.lt.s32.totalorder %s3329_s17, 3 }
   0x4   : > { %p356_p2 = pnand %p2996_p0, %p355_p1 }
   0x6   : > { %359 = sbr.rel (%p356_p2) target bundleno = 1924 (0x784), region = 64 }
   0xd   : > { %p403_p3 = scmp.lt.s32.totalorder %s2992_s18, 1  ;;  %v444_v0 = vld [vmem:[%s4456_s2 + $0x20] sm:$0xff]  ;;  %v3331_v2 = vmov 0   ;;  %vm4468_vm0 = vcmask 261120   ;;  %v443_v9 = vld [vmem:[%s4456_s2 + $0x18] sm:$0xff]  ;;  %v441_v10 = vld [vmem:[%s4456_s2 + $0x8] sm:$0xff]  ;;  %v769_v30 = vlaneseq }
   0xe   : > { %v3285_v1 = vld [vmem:[%s4455_s1] sm:$0xff]   ;;  %3283 = vset.pattern.permute.xlu0 %v3331_v2  ;;  %3284 = vset.pattern.permute.xlu1 %v3331_v2  ;;  %v442_v14 = vld [vmem:[%s4456_s2 + $0x10] sm:$0xff]  ;;  %v3286_v16 = vld [vmem:[%s4455_s1 + $0x8] sm:$0xff]   ;;  %v4482_v28 = vmov 0.0|0.0   ;;  %vm4469_vm4 = vmmov 0   ;;  %v4466_v29 = vmov 0.0  }
   0xf   : > { %s4731_s18 = smov (!%p403_p3, %s2992_s18), 1  ;;  %474 = vperm.xlu0 %3283, %v444_v0   ;;  %3110 = vmatprep.mubr.msk.bf16.mxu0 %vm4468_vm0, %v3285_v1  ;;  %v440_v3 = vld [vmem:[%s4456_s2] sm:$0xff]  ;;  %v3287_v17 = vld [vmem:[%s4455_s1 + $0x10] sm:$0xff]   ;;  %v445_v21 = vld [vmem:[%s4456_s2 + $0x28] sm:$0xff]  ;;  %v3484_v31 = vshrl.u32 %v769_v30, 7  ;;  %vm4471_vm10 = vcmask 64512  }
  0x10   : > { %s3046_s25 = sshll.u32 %s4731_s18, 5  ;;  %s3047_s29 = sshll.u32 %s4731_s18, 4  ;;  %459 = vperm.xlu1 %3284, %v441_v10   ;;  %v3288_v22 = vld [vmem:[%s4455_s1 + $0x18] sm:$0xff]   ;;  %v3289_v23 = vld [vmem:[%s4455_s1 + $0x20] sm:$0xff]   ;;  %v3290_v24 = vld [vmem:[%s4455_s1 + $0x28] sm:$0xff]   ;;  %3229 = vmatprep.subr.bf16.mxu1 %v4482_v28 }
  0x11   : > { %s3422_s28 = scalar_lea.vmem %s4454_s0, %s3046_s25  ;;  %s415_s15 = scalar_lea.vmem %s4460_s6, %s3047_s29  ;;  %v785_v25 = vld [vmem:[%s4458_s4] sm:$0xff]  ;;  %v786_v26 = vld [vmem:[%s4458_s4 + $0x8] sm:$0x1]  ;;  %v447_v27 = vld [vmem:[%s4456_s2 + $0x38] sm:$0xff]  ;;  %3130 = vmatprep.mubr.msk.f32.mxu1 %vm4469_vm4, %v4466_v29  ;;  %v3487_v33 = vsub.s32 0, %v3484_v31 }
  0x12   : > { %v422_v4 = vld [vmem:[%s3422_s28] sm:$0xff]  ;;  %v423_v5 = vld [vmem:[%s3422_s28 + $0x8] sm:$0xff]  ;;  %v424_v6 = vld [vmem:[%s3422_s28 + $0x10] sm:$0xff]  ;;  %s410_s27 = scalar_lea.vmem %s4459_s5, %s4731_s18 }
  0x13   : > { %454 = vperm.xlu0 %3283, %v440_v3   ;;  %v438_v7 = vpack.c.bf16 %v423_v5, %v422_v4  ;;  %v425_v8 = vld [vmem:[%s3422_s28 + $0x18] sm:$0xff]  ;;  %v754_v12 = vld [vmem:[%s415_s15] sm:$0xff]  ;;  %v755_v13 = vld [vmem:[%s415_s15 + $0x8] sm:$0xff]  ;;  %s420_s15 = scalar_lea.vmem %s4465_s11, %s3046_s25 }
  0x14   : > { %v439_v11 = vpack.c.bf16 %v425_v8, %v424_v6  ;;  %vm756_vm1 = vcmp.gt.f32.partialorder %v754_v12, 0.5  ;;  %vm757_vm2 = vcmp.gt.f32.partialorder %v755_v13, 0.5  ;;  %464 = vperm.xlu1 %3284, %v442_v14   ;;  %v752_v18 = vld [vmem:[%s410_s27] sm:$0x1]  ;;  %v643_v0 = vld [vmem:[%s4457_s3 + $0x8] sm:$0xff]  ;;  %v644_v1 = vld [vmem:[%s4457_s3 + $0x10] sm:$0xff] }
  0x15   : > { %3106 = vmatprep.subr.bf16.mxu0 %v438_v7  ;;  %v758_v15 = vsel %vm756_vm1, 1, %v3331_v2  ;;  %v759_v19 = vsel %vm757_vm2, 1, %v3331_v2  ;;  %vm753_vm3 = vcmp.gt.f32.partialorder %v752_v18, 0.5  ;;  %v642_v62 = vld [vmem:[%s4457_s3] sm:$0xff]  ;;  %v446_v4 = vld [vmem:[%s4456_s2 + $0x30] sm:$0xff]  ;;  %v2721_v12 = vld [vmem:[%s4462_s8 + $0x8] sm:$0xff] }
  0x16   : > { %3107 = vmatpush3.bf16.msra.mxu0 %v438_v7  ;;  %v768_v20 = vsel %vm753_vm3, 1, %v3331_v2  ;;  %v645_v2 = vld [vmem:[%s4457_s3 + $0x18] sm:$0xff]  ;;  %v646_v3 = vld [vmem:[%s4457_s3 + $0x20] sm:$0xf]  ;;  %v450_v8 = vld [vmem:[%s4456_s2 + $0x50] sm:$0xff] }
  0x17   : > { %469 = vperm.xlu0 %3283, %v443_v9   ;;  %3108 = vmatprep.subr.bf16.mxu0 %v439_v11  ;;  %v772_v35 = vrot.slane %v768_v20, %v3487_v33  ;;  %v448_v6 = vld [vmem:[%s4456_s2 + $0x40] sm:$0xff]  ;;  %v449_v9 = vld [vmem:[%s4456_s2 + $0x48] sm:$0xff]  ;;  %v2723_v13 = vld [vmem:[%s4462_s8 + $0x18] sm:$0xff] }
  0x18   : > { %v2857_v14 = vld [vmem:[%s4463_s9 + $0x8] sm:$0xff] }
  0x19   : > { %vm773_vm5 = vcmp.eq.s32.totalorder %v772_v35, 1  ;;  %v2858_v35 = vld [vmem:[%s4463_s9 + $0x10] sm:$0xff] }
  0x1a   : > { %3109 = vmatpush3.bf16.msra.mxu0 %v439_v11 }
  0x1b   : > { %761 = vperm.xlu0 %3283, %v758_v15   ;;  %3239 = vmatprep.subr.bf16.mxu0 %v4482_v28  ;;  %v2859_v15 = vld [vmem:[%s4463_s9 + $0x18] sm:$0xff] }
  0x1d   : > { %3111 = vmatmul.mubr.msk.bf16.vlgmr.msra.gmra.mrb[0].mxu0 %vm4468_vm0, %v3286_v16  ;;  %v2885_v16 = vld [vmem:[%s4464_s10 + $0x8] sm:$0xff] }
  0x1e   : > { %3114 = vmatprep.mubr.msk.bf16.mxu0 %vm4468_vm0, %v3287_v17  ;;  %v2887_v17 = vld [vmem:[%s4464_s10 + $0x18] sm:$0xff] }
  0x1f   : > { %764 = vperm.xlu0 %3283, %v759_v19  }
  0x23   : > { %479 = vperm.xlu0 %3283, %v445_v21  }
  0x25   : > { %3115 = vmatmul.mubr.msk.bf16.gmra.mrb[4].mxu0 %vm4468_vm0, %v3288_v22 }
  0x26   : > { %3118 = vmatprep.mubr.msk.bf16.mxu0 %vm4468_vm0, %v3289_v23 }
  0x2d   : > { %3119 = vmatmul.mubr.msk.bf16.gmra.mrb[8].mxu0 %vm4468_vm0, %v3290_v24  ;;  %v451_v24 = vld [vmem:[%s4456_s2 + $0x58] sm:$0xff] }
  0x2e   : > { %3161 = vmatprep.mubr.msk.f32.mxu0 %vm4469_vm4, %v4466_v29 }
  0x41   : > { %1132 = vxpose.xlu0.b32.start [1/2] (short) (narrow) %v785_v25, 8  ;;  %v2720_v25 = vld [vmem:[%s4462_s8] sm:$0xff] }
  0x45   : > { %1133 = vxpose.xlu0.b32.end [2/2] (short) (narrow) %v786_v26, 8  ;;  %v2722_v26 = vld [vmem:[%s4462_s8 + $0x10] sm:$0xff] }
  0x6e   : > { %489 = vperm.xlu0 %3283, %v447_v27   ;;  %v2856_v27 = vld [vmem:[%s4463_s9] sm:$0xff] }
  0x8e   : > { %v475_v32 = vpop.permute.xlu0 %474 }
  0x8f   : > { %v460_v42 = vpop.permute.xlu1 %459 }
  0x92   : > { %v455_v34 = vpop.permute.xlu0 %454 }
  0x93   : > { %v465_v50 = vpop.permute.xlu1 %464 }
  0x96   : > { %v470_v36 = vpop.permute.xlu0 %469 }
  0x9a   : > { %v762_v37 = vpop.permute.xlu0 %761 }
  0x9b   : > { %vm766_vm6 = vcmp.eq.s32.totalorder %v762_v37, 1 }
  0x9c   : > { %vm3490_vm7 = vmand %vm766_vm6, %vm773_vm5 }
  0x9e   : > { %v765_v39 = vpop.permute.xlu0 %764 }
  0x9f   : > { %vm767_vm8 = vcmp.eq.s32.totalorder %v765_v39, 1  ;;  %v913_v39 = vsub.s32 1, %v3484_v31 }
  0xa0   : > { %vm3494_vm9 = vmand %vm767_vm8, %vm773_vm5 }
  0xa2   : > { %v480_v41 = vpop.permute.xlu0 %479 }
  0xc1   : > { %v3498_v46 = vpop.trf.xlu0 }
  0xed   : > { %v490_v55 = vpop.permute.xlu0 %489 }
  0xf0   : > { %v3112_v43 = vpop.f32.mrb[0].mxu0 }
  0xf1   : > { %v595_v44 = vpop.f32.mrb[1].mxu0  ;;  %v3505_v53 = vadd.f32 %v3112_v43, %v465_v50  ;;  %v933_v43 = vsub.s32 3, %v3484_v31 }
  0xf2   : > { %v3113_v45 = vpop.f32.mrb[2].mxu0  ;;  %v596_v48 = vadd.f32 %v595_v44, %v455_v34  ;;  %v943_v44 = vsub.s32 4, %v3484_v31 }
  0xf3   : > { %v598_v47 = vpop.f32.mrb[3].mxu0  ;;  %v3502_v51 = vadd.f32 %v3113_v45, %v470_v36  ;;  %v3615_v45 = vsub.s32 5, %v3484_v31 }
  0xf4   : > { %v3500_v49 = vadd.f32 %v598_v47, %v460_v42  ;;  %v923_v42 = vsub.s32 2, %v3484_v31  ;;  %v3618_v47 = vsub.s32 6, %v3484_v31 }
  0xf5   : > { %v3233_v59 = vpack.c.bf16 %v3502_v51, %v3505_v53 }
  0xf6   : > { %v3230_v52 = vpack.c.bf16 %v3500_v49, %v596_v48 }
  0xf8   : > { %v3507_v54 = vpop.f32.mrb[4].mxu0  ;;  %3231 = vmatpush3.bf16.msra.mxu1 %v3230_v52 }
  0xf9   : > { %v611_v56 = vpop.f32.mrb[5].mxu0  ;;  %3232 = vmatprep.subr.bf16.mxu1 %v4482_v28 }
  0xfa   : > { %v612_v57 = vadd.f32 %v611_v56, %v475_v32  ;;  %v3117_v58 = vpop.f32.mrb[6].mxu0 }
  0xfb   : > { %v623_v60 = vadd.f32 %v3117_v58, %v490_v55  ;;  %v614_v61 = vpop.f32.mrb[7].mxu0 }
  0xfc   : > { %795 = vxpose.xlu1.b32.start.end [1/1] (short) (narrow) %v612_v57, 16  ;;  %3234 = vmatpush3.bf16.msra.mxu1 %v3233_v59  ;;  %v615_v63 = vadd.f32 %v614_v61, %v480_v41  ;;  %v2884_v41 = vld [vmem:[%s4464_s10] sm:$0xff]  ;;  %v2886_v61 = vld [vmem:[%s4464_s10 + $0x10] sm:$0xff] }
  0xfd   : > { %2251 = vxpose.xlu0.b32.start.end [1/1] (short) (narrow) %v623_v60, 16  ;;  %3145 = vmatprep.subr.mxu1 %v596_v48 }
  0xff   : > { %3131 = vmatmul.mubr.msk.f32.vlgmr.msra.gmra.mrb[0].mxu1 %vm4468_vm0, %v642_v62 }
 0x100   : > { %3146 = vmatpush3.msra.mxu1 %v596_v48  ;;  %3133 = vmatprep.mubr.msk.f32.mxu1 %vm4469_vm4, %v4466_v29  ;;  %v3544_v5 = vpop.f32.mrb[8].mxu0  ;;  %v3621_v48 = vsub.s32 7, %v3484_v31 }
 0x101   : > { %1321 = vxpose.xlu1.b32.start.end [1/1] (short) (narrow) %v615_v63, 16  ;;  %3235 = vmatprep.subr.bf16.mxu1 %v4482_v28  ;;  %v3549_v7 = vpop.f32.mrb[9].mxu0 }
 0x102   : > { %v3557_v10 = vpop.f32.mrb[10].mxu0 }
 0x103   : > { %3134 = vmatmul.mubr.msk.f32.gmra.mrb[2].mxu1 %vm4468_vm0, %v643_v0  ;;  %4508 = vst [vmem:[#allocation3_spill] sm:$0xff] %v3557_v10  ;;  %v3559_v11 = vpop.f32.mrb[11].mxu0 }
 0x104   : > { %3136 = vmatprep.mubr.msk.f32.mxu1 %vm4469_vm4, %v4466_v29 }
 0x107   : > { %3137 = vmatmul.mubr.msk.f32.gmra.mrb[4].mxu1 %vm4468_vm0, %v644_v1 }
 0x108   : > { %3139 = vmatprep.mubr.msk.f32.mxu1 %vm4469_vm4, %v4466_v29 }
 0x10b   : > { %3140 = vmatmul.mubr.msk.f32.gmra.mrb[6].mxu1 %vm4468_vm0, %v645_v2 }
 0x10c   : > { %3142 = vmatprep.mubr.msk.f32.mxu1 %vm4469_vm4, %v4466_v29 }
 0x10f   : > { %3143 = vmatmul.mubr.msk.f32.gmra.mrb[8].mxu1 %vm4468_vm0, %v646_v3 }
 0x123   : > { %484 = vperm.xlu1 %3284, %v446_v4  }
 0x127   : > { %494 = vperm.xlu1 %3284, %v448_v6  }
 0x12a   : > { %504 = vperm.xlu0 %3283, %v450_v8  }
 0x12b   : > { %499 = vperm.xlu1 %3284, %v449_v9  }
 0x12e   : > { %2731 = vperm.xlu0 %3283, %v2721_v12  }
 0x132   : > { %2741 = vperm.xlu0 %3283, %v2723_v13  }
 0x136   : > { %2867 = vperm.xlu0 %3283, %v2857_v14  }
 0x13a   : > { %2877 = vperm.xlu0 %3283, %v2859_v15  }
 0x13e   : > { %2895 = vperm.xlu0 %3283, %v2885_v16  }
 0x142   : > { %2905 = vperm.xlu0 %3283, %v2887_v17  }
 0x17c   : > { %v811_v18 = vpop.trf.xlu1 }
 0x17d   : > { %3147 = vmatprep.mubr.msk.f32.mxu1 %vm4471_vm10, %v811_v18 }
 0x180   : > { %v812_v19 = vpop.trf.xlu1 }
 0x181   : > { %3148 = vmatmul.mubr.msk.f32.vlgmr.msra.gmra.mrb[10].mxu1 %vm4471_vm10, %v812_v19 }
 0x182   : > { %3154 = vmatprep.mubr.msk.f32.mxu1 %vm4469_vm4, %v4466_v29 }
 0x184   : > { %v3583_v20 = vpop.trf.xlu1 }
 0x188   : > { %v3585_v21 = vpop.trf.xlu1 }
 0x1a2   : > { %v485_v22 = vpop.permute.xlu1 %484 }
 0x1a3   : > { %v620_v23 = vadd.f32 %v3507_v54, %v485_v22 }
 0x1a5   : > { %1786 = vxpose.xlu1.b32.start.end [1/1] (short) (narrow) %v620_v23, 16 }
 0x1c7   : > { %509 = vperm.xlu1 %3284, %v451_v24  }
 0x1cb   : > { %2726 = vperm.xlu1 %3284, %v2720_v25   ;;  %v780_v25 = vadd.s32 8, %v3484_v31 }
 0x1cf   : > { %2736 = vperm.xlu1 %3284, %v2722_v26   ;;  %v782_v26 = vand.u32 127, %v769_v30 }
 0x1d2   : > { %v3600_v32 = vpop.f32.mrb[0].mxu1 }
 0x1d3   : > { %2862 = vperm.xlu1 %3284, %v2856_v27   ;;  %v3132_v34 = vpop.f32.mrb[1].mxu1  ;;  %v3715_v27 = vsub.s32 %v780_v25, %v782_v26 }
 0x1d4   : > { %v3718_v34 = vsub.s32 %v3484_v31, %v782_v26 }
 0x1d5   : > { %vm4501_vm11 = vcmp.eq.s32.totalorder %v3715_v27, 4294967292  ;;  %vm4503_vm13 = vcmp.eq.s32.totalorder %v3715_v27, 4294967293  ;;  %vm4484_vm15 = vcmp.eq.s32.totalorder %v3715_v27, 4294967294  ;;  %vm4473_vm2 = vcmp.eq.s32.totalorder %v3715_v27, 4294967295 }
 0x1d6   : > { %v3605_v36 = vpop.f32.mrb[2].mxu1  ;;  %vm4502_vm12 = vcmp.eq.s32.totalorder %v3718_v34, 4294967292  ;;  %vm4485_vm14 = vcmp.eq.s32.totalorder %v3718_v34, 4294967293  ;;  %vm4481_vm1 = vcmp.eq.s32.totalorder %v3718_v34, 4294967294  ;;  %vm4480_vm3 = vcmp.eq.s32.totalorder %v3718_v34, 4294967295 }
 0x1d7   : > { %2872 = vperm.xlu1 %3284, %v2858_v35   ;;  %v3135_v37 = vpop.f32.mrb[3].mxu1  ;;  %v3624_v50 = vrot.slane %v3605_v36, %v913_v39  ;;  %v3629_v54 = vrot.slane %v3605_v36, %v923_v42  ;;  %v3632_v55 = vrot.slane %v3605_v36, %v933_v43  ;;  %v3635_v56 = vrot.slane %v3605_v36, %v943_v44 }
 0x1d8   : > { %v3639_v57 = vrot.slane %v3605_v36, %v3615_v45  ;;  %v3643_v59 = vrot.slane %v3605_v36, %v3618_v47  ;;  %v3647_v60 = vrot.slane %v3605_v36, %v3621_v48  ;;  %v792_v35 = vrot.slane %v3600_v32, %v3487_v33 }
 0x1d9   : > { %v914_v37 = vrot.slane %v3600_v32, %v913_v39  ;;  %vm4472_vm5 = vcmp.eq.s32.totalorder %v3715_v27, 0  ;;  %vm4475_vm6 = vcmp.eq.s32.totalorder %v3718_v34, 0  ;;  %vm4474_vm8 = vcmp.eq.s32.totalorder %v3715_v27, 1 }
 0x1da   : > { %v3626_v52 = vpop.f32.mrb[4].mxu1  ;;  %vm4478_vm0 = vcmp.eq.s32.totalorder %v3718_v34, 1  ;;  %vm4476_vm4 = vcmp.eq.s32.totalorder %v3715_v27, 2  ;;  %vm4477_vm10 = vcmp.eq.s32.totalorder %v3718_v34, 2 }
 0x1db   : > { %2890 = vperm.xlu1 %3284, %v2884_v41   ;;  %v3138_v58 = vpop.f32.mrb[5].mxu1  ;;  %v3653_v62 = vrot.slane %v3626_v52, %v923_v42  ;;  %v3656_v63 = vrot.slane %v3626_v52, %v933_v43  ;;  %v3659_v0 = vrot.slane %v3626_v52, %v943_v44  ;;  %v3663_v1 = vrot.slane %v3626_v52, %v3615_v45 }
 0x1dc   : > { %v3667_v2 = vrot.slane %v3626_v52, %v3618_v47  ;;  %v3671_v3 = vrot.slane %v3626_v52, %v3621_v48  ;;  %v3693_v17 = vrot.slane %v3626_v52, %v913_v39  ;;  %v794_v41 = vsel %vm4501_vm11, %v792_v35, 0.0 }
 0x1dd   : > { %v924_v58 = vrot.slane %v3600_v32, %v923_v42 }
 0x1de   : > { %v3673_v4 = vpop.f32.mrb[6].mxu1 }
 0x1df   : > { %2900 = vperm.xlu1 %3284, %v2886_v61   ;;  %v3141_v6 = vpop.f32.mrb[7].mxu1  ;;  %v3676_v8 = vrot.slane %v3673_v4, %v913_v39  ;;  %v3679_v9 = vrot.slane %v3673_v4, %v923_v42  ;;  %v3696_v18 = vrot.slane %v3673_v4, %v933_v43  ;;  %v3699_v19 = vrot.slane %v3673_v4, %v943_v44 }
 0x1e0   : > { %v3703_v22 = vrot.slane %v3673_v4, %v3615_v45  ;;  %v3707_v23 = vrot.slane %v3673_v4, %v3618_v47  ;;  %v3711_v24 = vrot.slane %v3673_v4, %v3621_v48  ;;  %v793_v61 = vsel %vm4502_vm12, %v792_v35, 0.0 }
 0x1e1   : > { %v944_v35 = vrot.slane %v3600_v32, %v943_v44 }
 0x1e2   : > { %v3681_v12 = vpop.f32.mrb[8].mxu1  ;;  %4513 = vst [vmem:[#allocation8_spill] sm:$0xff] %v3703_v22  ;;  %4514 = vst [vmem:[#allocation9_spill] sm:$0xff] %v3707_v23 }
 0x1e3   : > { %4509 = vst [vmem:[#allocation4_spill] sm:$0xff] %v3681_v12  ;;  %v3684_v13 = vrot.slane %v3681_v12, %v913_v39  ;;  %v3687_v14 = vrot.slane %v3681_v12, %v923_v42  ;;  %v3690_v15 = vrot.slane %v3681_v12, %v933_v43  ;;  %v3144_v16 = vpop.f32.mrb[9].mxu1  ;;  %4515 = vst [vmem:[#allocation10_spill] sm:$0xff] %v3711_v24  ;;  %v916_v39 = vsel %vm4503_vm13, %v914_v37, 0.0 }
 0x1e4   : > { %v934_v16 = vrot.slane %v3600_v32, %v933_v43  ;;  %v915_v42 = vsel %vm4485_vm14, %v914_v37, 0.0  ;;  %v925_v43 = vsel %vm4481_vm1, %v924_v58, 0.0  ;;  %v954_v37 = vrot.slane %v3600_v32, %v3615_v45 }
 0x1e5   : > { %4510 = vst [vmem:[#allocation5_spill] sm:$0xff] %v3684_v13  ;;  %4511 = vst [vmem:[#allocation6_spill] sm:$0xff] %v3687_v14 }
 0x1e6   : > { %4512 = vst [vmem:[#allocation7_spill] sm:$0xff] %v3690_v15 }
 0x254   : > { %v3149_v30 = vpop.f32.mrb[10].mxu1 }
 0x255   : > { %v906_v31 = vadd.f32 %v3149_v30, %v794_v41  ;;  %v900_v6 = vpop.f32.mrb[11].mxu1  ;;  %v926_v41 = vsel %vm4484_vm15, %v924_v58, 0.0  ;;  %v946_v58 = vsel %vm4472_vm5, %v944_v35, 0.0  ;;  %vm4479_vm5 = vcmp.eq.s32.totalorder %v3715_v27, 3 }
 0x256   : > { %v901_v25 = vadd.f32 %v900_v6, %v793_v61  ;;  %v935_v6 = vsel %vm4480_vm3, %v934_v16, 0.0 }
 0x257   : > { %v918_v26 = vadd.f32 %v916_v39, %v906_v31  ;;  %v936_v31 = vsel %vm4473_vm2, %v934_v16, 0.0  ;;  %v964_v39 = vrot.slane %v3600_v32, %v3618_v47  ;;  %v974_v16 = vrot.slane %v3600_v32, %v3621_v48 }
 0x258   : > { %v917_v30 = vadd.f32 %v915_v42, %v901_v25  ;;  %v955_v47 = vsel %vm4478_vm0, %v954_v37, 0.0  ;;  %vm969_vm2 = vcmp.eq.s32.totalorder %v3718_v34, 3 }
 0x259   : > { %v928_v29 = vadd.f32 %v926_v41, %v918_v26  ;;  %v945_v26 = vsel %vm4475_vm6, %v944_v35, 0.0  ;;  %v966_v35 = vsel %vm4476_vm4, %v964_v39, 0.0  ;;  %v965_v32 = vsel %vm4477_vm10, %v964_v39, 0.0 }
 0x25a   : > { %v927_v61 = vadd.f32 %v925_v43, %v917_v30  ;;  %v984_v30 = vrot.slane %v3605_v36, %v3487_v33  ;;  %vm979_vm6 = vcmp.eq.s32.totalorder %v3718_v34, 4  ;;  %v976_v48 = vsel %vm4479_vm5, %v974_v16, 0.0 }
 0x25b   : > { %v938_v44 = vadd.f32 %v936_v31, %v928_v29  ;;  %v956_v29 = vsel %vm4474_vm8, %v954_v37, 0.0  ;;  %vm980_vm8 = vcmp.eq.s32.totalorder %v3715_v27, 4  ;;  %vm4493_vm4 = vcmask 130048  }
 0x25c   : > { %v937_v25 = vadd.f32 %v935_v6, %v927_v61  ;;  %v986_v36 = vsel %vm980_vm8, %v984_v30, 0.0  ;;  %vm3335_vm10 = vmmov 1  }
 0x25d   : > { %v948_v45 = vadd.f32 %v946_v58, %v938_v44  ;;  %v975_v44 = vsel %vm969_vm2, %v974_v16, 0.0  ;;  %vm3791_vm0 = vmxor %vm3494_vm9, %vm3335_vm10  ;;  %vm4521_vm9 = vcmp.eq.s32.totalorder %v3718_v34, 0 }
 0x25e   : > { %v947_v42 = vadd.f32 %v945_v26, %v937_v25  ;;  %v985_v25 = vsel %vm979_vm6, %v984_v30, 0.0  ;;  %vm3798_vm5 = vmxor %vm3490_vm7, %vm3335_vm10  ;;  %vm4520_vm7 = vcmp.eq.s32.totalorder %v3715_v27, 4294967295 }
 0x25f   : > { %v958_v41 = vadd.f32 %v956_v29, %v948_v45 }
 0x260   : > { %v957_v43 = vadd.f32 %v955_v47, %v947_v42 }
 0x261   : > { %v968_v31 = vadd.f32 %v966_v35, %v958_v41 }
 0x262   : > { %v967_v37 = vadd.f32 %v965_v32, %v957_v43 }
 0x263   : > { %v978_v61 = vadd.f32 %v976_v48, %v968_v31 }
 0x264   : > { %v977_v6 = vadd.f32 %v975_v44, %v967_v37 }
 0x265   : > { %v988_v58 = vadd.f32 %v986_v36, %v978_v61 }
 0x266   : > { %v987_v45 = vadd.f32 %v985_v25, %v977_v6 }
 0x267   : > { %v990_v29 = vsel %vm3791_vm0, -10000.0, %v988_v58 }
 0x268   : > { %v993_v16 = vsel %vm4493_vm4, %v990_v29, -inf  ;;  %v989_v40 = vsel %vm3798_vm5, -10000.0, %v987_v45 }
 0x269   : > { %v992_v42 = vsel %vm4493_vm4, %v989_v40, -inf }
 0x26a   : > { %v994_v41 = vmax.f32 %v992_v42, %v993_v16 }
 0x26c   : > { %v995_v47 = vrot.slane %v994_v41, 4 }
 0x26e   : > { %v996_v35 = vmax.f32 %v994_v41, %v995_v47 }
 0x270   : > { %v997_v30 = vrot.slane %v996_v35, 2 }
 0x272   : > { %v998_v43 = vmax.f32 %v996_v35, %v997_v30 }
 0x274   : > { %v999_v38 = vrot.slane %v998_v43, 1 }
 0x276   : > { %v1000_v31 = vmax.f32 %v998_v43, %v999_v38 }
 0x278   : > { %v1001_v32 = vsub.f32 %v989_v40, %v1000_v31  ;;  %v1002_v48 = vsub.f32 %v990_v29, %v1000_v31  ;;  %v495_v40 = vpop.permute.xlu1 %494 }
 0x279   : > { %v628_v31 = vadd.f32 %v3549_v7, %v495_v40 }
 0x27a   : > { %v1003_v37 = vmul.f32 1.442695, %v1001_v32  ;;  %v1005_v61 = vmul.f32 1.442695, %v1002_v48 }
 0x27c   : > { %3293 = vpow2.f32 %v1003_v37  ;;  %v3810_v30 = vpop.permute.xlu1 %499 }
 0x27d   : > { %3295 = vpow2.f32 %v1005_v61 }
 0x286   : > { %v3294_v44 = vpop.eup %3293 }
 0x287   : > { %v3296_v36 = vpop.eup %3295  ;;  %v1007_v6 = vsel %vm4493_vm4, %v3294_v44, 0.0 }
 0x288   : > { %v1008_v58 = vsel %vm4493_vm4, %v3296_v36, 0.0 }
 0x289   : > { %v1009_v25 = vadd.f32 %v1008_v58, %v1007_v6  ;;  %v1802_v58 = vpop.trf.xlu1 }
 0x28b   : > { %v1010_v45 = vrot.slane %v1009_v25, 4 }
 0x28d   : > { %v1011_v16 = vadd.f32 %v1010_v45, %v1009_v25 }
 0x28f   : > { %v1012_v42 = vrot.slane %v1011_v16, 2 }
 0x291   : > { %v1013_v41 = vadd.f32 %v1012_v42, %v1011_v16 }
 0x293   : > { %v1014_v47 = vrot.slane %v1013_v41, 1 }
 0x295   : > { %v1015_v35 = vadd.f32 %v1014_v47, %v1013_v41 }
 0x297   : > { %3297 = vrcp.f32 %v1015_v35 }
 0x2a1   : > { %v3298_v29 = vpop.eup %3297 }
 0x2a2   : > { %v3812_v43 = vmul.f32 %v3298_v29, %v3294_v44  ;;  %v3814_v38 = vmul.f32 %v3298_v29, %v3296_v36 }
 0x2a4   : > { %v3240_v32 = vpack.c.bf16 %v3814_v38, %v3812_v43  ;;  %v1019_v48 = vsel %vm4502_vm12, %v3812_v43, 0.0  ;;  %v1020_v37 = vsel %vm4501_vm11, %v3814_v38, 0.0  ;;  %v1030_v61 = vsel %vm4485_vm14, %v3812_v43, 0.0 }
 0x2a5   : > { %v1021_v44 = vsel %vm4493_vm4, %v1019_v48, 0.0  ;;  %v1022_v36 = vsel %vm4493_vm4, %v1020_v37, 0.0  ;;  %v1031_v7 = vsel %vm4503_vm13, %v3814_v38, 0.0  ;;  %v1032_v6 = vsel %vm4493_vm4, %v1030_v61, 0.0 }
 0x2a6   : > { %3241 = vmatpush3.bf16.msra.mxu0 %v3240_v32  ;;  %v1023_v25 = vadd.f32 %v1022_v36, %v1021_v44  ;;  %v1033_v45 = vsel %vm4493_vm4, %v1031_v7, 0.0  ;;  %v1041_v16 = vsel %vm4481_vm1, %v3812_v43, 0.0  ;;  %v1042_v42 = vsel %vm4484_vm15, %v3814_v38, 0.0 }
 0x2a7   : > { %3183 = vmatprep.subr.mxu0 %v3505_v53  ;;  %v1034_v41 = vadd.f32 %v1033_v45, %v1032_v6  ;;  %v1043_v47 = vsel %vm4493_vm4, %v1041_v16, 0.0  ;;  %v1044_v35 = vsel %vm4493_vm4, %v1042_v42, 0.0  ;;  %v1052_v40 = vsel %vm4480_vm3, %v3812_v43, 0.0 }
 0x2a8   : > { %v1024_v29 = vrot.slane %v1023_v25, 4  ;;  %v1045_v32 = vadd.f32 %v1044_v35, %v1043_v47  ;;  %v1053_v48 = vsel %vm4520_vm7, %v3814_v38, 0.0  ;;  %v1054_v37 = vsel %vm4493_vm4, %v1052_v40, 0.0 }
 0x2a9   : > { %3162 = vmatmul.mubr.msk.f32.vlgmr.msra.gmra.mrb[12].mxu0 %vm4493_vm4, %v628_v31  ;;  %v1035_v61 = vrot.slane %v1034_v41, 4  ;;  %v1055_v44 = vsel %vm4493_vm4, %v1053_v48, 0.0  ;;  %v1063_v36 = vsel %vm4521_vm9, %v3812_v43, 0.0  ;;  %vm4522_vm3 = vcmp.eq.s32.totalorder %v3715_v27, 0 }
 0x2aa   : > { %v1064_v7 = vsel %vm4522_vm3, %v3814_v38, 0.0  ;;  %3184 = vmatpush3.msra.mxu0 %v3505_v53  ;;  %vm4523_vm1 = vcmask 64512   ;;  %v1025_v6 = vadd.f32 %v1024_v29, %v1023_v25  ;;  %v1046_v45 = vrot.slane %v1045_v32, 4  ;;  %v1803_v53 = vpop.trf.xlu1 }
 0x2ab   : > { %3185 = vmatprep.mubr.msk.f32.mxu0 %vm4523_vm1, %v1802_v58  ;;  %v1056_v16 = vadd.f32 %v1055_v44, %v1054_v37  ;;  %v1065_v31 = vsel %vm4493_vm4, %v1063_v36, 0.0  ;;  %v1036_v42 = vadd.f32 %v1035_v61, %v1034_v41  ;;  %v1066_v47 = vsel %vm4493_vm4, %v1064_v7, 0.0  ;;  %3249 = vmatprep.subr.bf16.mxu0 %v4482_v28 }
 0x2ac   : > { %vm4524_vm7 = vcmp.eq.s32.totalorder %v3718_v34, 1  ;;  %vm4525_vm9 = vcmp.eq.s32.totalorder %v3715_v27, 1  ;;  %v1026_v58 = vrot.slane %v1025_v6, 2  ;;  %v1047_v25 = vadd.f32 %v1046_v45, %v1045_v32 }
 0x2ad   : > { %v1074_v35 = vsel %vm4524_vm7, %v3812_v43, 0.0  ;;  %v1075_v40 = vsel %vm4525_vm9, %v3814_v38, 0.0  ;;  %v1057_v29 = vrot.slane %v1056_v16, 4  ;;  %v1067_v48 = vadd.f32 %v1066_v47, %v1065_v31  ;;  %3186 = vmatmul.mubr.msk.f32.vlgmr.msra.gmra.mrb[14].mxu0 %vm4523_vm1, %v1803_v53 }
 0x2ae   : > { %v1037_v41 = vrot.slane %v1036_v42, 2  ;;  %v1076_v37 = vsel %vm4493_vm4, %v1074_v35, 0.0  ;;  %v1077_v61 = vsel %vm4493_vm4, %v1075_v40, 0.0  ;;  %vm4526_vm3 = vcmp.eq.s32.totalorder %v3718_v34, 2 }
 0x2af   : > { %v1085_v44 = vsel %vm4526_vm3, %v3812_v43, 0.0  ;;  %vm1118_vm7 = vcmask 1040384   ;;  %v1027_v36 = vadd.f32 %v1026_v58, %v1025_v6  ;;  %v1048_v7 = vrot.slane %v1047_v25, 2 }
 0x2b0   : > { %v1058_v28 = vadd.f32 %v1057_v29, %v1056_v16  ;;  %v1068_v10 = vrot.slane %v1067_v48, 4  ;;  %vm4494_vm9 = vcmask 1041408   ;;  %v4527_v32 = vmov 0.0  }
 0x2b1   : > { %vm4528_vm15 = vmmov 0   ;;  %v1038_v45 = vadd.f32 %v1037_v41, %v1036_v42  ;;  %v1078_v31 = vadd.f32 %v1077_v61, %v1076_v37  ;;  %vm4529_vm1 = vcmp.eq.s32.totalorder %v3715_v27, 2 }
 0x2b2   : > { %3192 = vmatprep.mubr.msk.f32.mxu0 %vm4528_vm15, %v4527_v32  ;;  %v1086_v47 = vsel %vm4529_vm1, %v3814_v38, 0.0  ;;  %v1087_v35 = vsel %vm4493_vm4, %v1085_v44, 0.0  ;;  %vm4500_vm14 = vcmask 1042432   ;;  %v1028_v40 = vrot.slane %v1027_v36, 1 }
 0x2b3   : > { %v1049_v53 = vadd.f32 %v1048_v7, %v1047_v25  ;;  %v1059_v15 = vrot.slane %v1058_v28, 2  ;;  %v1069_v6 = vadd.f32 %v1068_v10, %v1067_v48  ;;  %v1039_v58 = vrot.slane %v1038_v45, 1 }
 0x2b4   : > { %v1079_v16 = vrot.slane %v1078_v31, 4  ;;  %v1088_v29 = vsel %vm4493_vm4, %v1086_v47, 0.0  ;;  %v1096_v42 = vsel %vm969_vm2, %v3812_v43, 0.0  ;;  %v1029_v41 = vadd.f32 %v1028_v40, %v1027_v36 }
 0x2b5   : > { %v1050_v37 = vrot.slane %v1049_v53, 1  ;;  %v1060_v61 = vadd.f32 %v1059_v15, %v1058_v28  ;;  %v1070_v14 = vrot.slane %v1069_v6, 2  ;;  %v1040_v13 = vadd.f32 %v1039_v58, %v1038_v45 }
 0x2b6   : > { %v1080_v24 = vadd.f32 %v1079_v16, %v1078_v31  ;;  %v1089_v44 = vadd.f32 %v1088_v29, %v1087_v35  ;;  %vm4530_vm3 = vcmp.eq.s32.totalorder %v3715_v27, 3  ;;  %v1098_v47 = vsel %vm4493_vm4, %v1096_v42, 0.0 }
 0x2b7   : > { %v1097_v25 = vsel %vm4530_vm3, %v3814_v38, 0.0  ;;  %v1051_v10 = vadd.f32 %v1050_v37, %v1049_v53  ;;  %v1061_v48 = vrot.slane %v1060_v61, 1  ;;  %v1071_v7 = vadd.f32 %v1070_v14, %v1069_v6 }
 0x2b8   : > { %v1081_v23 = vrot.slane %v1080_v24, 2  ;;  %v1090_v12 = vrot.slane %v1089_v44, 4  ;;  %v1099_v22 = vsel %vm4493_vm4, %v1097_v25, 0.0  ;;  %v1107_v28 = vsel %vm979_vm6, %v3812_v43, 0.0 }
 0x2b9   : > { %v1072_v15 = vrot.slane %v1071_v7, 1  ;;  %v1100_v36 = vadd.f32 %v1099_v22, %v1098_v47  ;;  %v1108_v45 = vsel %vm980_vm8, %v3814_v38, 0.0  ;;  %vm4495_vm1 = vcmask 1043456  }
 0x2ba   : > { %v1082_v31 = vadd.f32 %v1081_v23, %v1080_v24  ;;  %v1091_v35 = vadd.f32 %v1090_v12, %v1089_v44  ;;  %v1109_v14 = vsel %vm4493_vm4, %v1107_v28, 0.0  ;;  %v1110_v40 = vsel %vm4493_vm4, %v1108_v45, 0.0 }
 0x2bb   : > { %v1062_v53 = vadd.f32 %v1061_v48, %v1060_v61  ;;  %v1101_v6 = vrot.slane %v1100_v36, 4  ;;  %v1111_v58 = vadd.f32 %v1110_v40, %v1109_v14  ;;  %v1119_v16 = vsel %vm1118_vm7, %v1029_v41, %v1040_v13 }
 0x2bc   : > { %v1073_v29 = vadd.f32 %v1072_v15, %v1071_v7  ;;  %v1083_v43 = vrot.slane %v1082_v31, 1  ;;  %v1092_v42 = vrot.slane %v1091_v35, 2  ;;  %v1121_v22 = vsel %vm4494_vm9, %v1119_v16, %v1051_v10 }
 0x2bd   : > { %v1102_v37 = vadd.f32 %v1101_v6, %v1100_v36  ;;  %v1112_v25 = vrot.slane %v1111_v58, 4  ;;  %v1123_v38 = vsel %vm4500_vm14, %v1121_v22, %v1062_v53  ;;  %vm4496_vm3 = vcmask 1044480  }
 0x2be   : > { %v1084_v12 = vadd.f32 %v1083_v43, %v1082_v31  ;;  %v1093_v23 = vadd.f32 %v1092_v42, %v1091_v35  ;;  %v1125_v24 = vsel %vm4495_vm1, %v1123_v38, %v1073_v29  ;;  %vm4499_vm4 = vcmask 1045504   ;;  %vm3908_vm1 = vmpackc.low %vm1118_vm7, %vm3335_vm10 }
 0x2bf   : > { %v1103_v44 = vrot.slane %v1102_v37, 2  ;;  %v1113_v61 = vadd.f32 %v1112_v25, %v1111_v58  ;;  %vm4497_vm9 = vcmask 1046528   ;;  %v4534_v53 = vmov 0.0|0.0  }
 0x2c0   : > { %v1094_v48 = vrot.slane %v1093_v23, 1  ;;  %v1127_v47 = vsel %vm4496_vm3, %v1125_v24, %v1084_v12  ;;  %vm4498_vm3 = vcmask 72704   ;;  %v1785_v16 = vsel %vm4501_vm11, %v3653_v62, 0.0 }
 0x2c1   : > { %v1104_v13 = vadd.f32 %v1103_v44, %v1102_v37  ;;  %v1114_v41 = vrot.slane %v1113_v61, 2  ;;  %vm4540_vm14 = vcmp.eq.s32.totalorder %v3718_v34, 4294967295 }
 0x2c2   : > { %v1095_v7 = vadd.f32 %v1094_v48, %v1093_v23  ;;  %v1942_v48 = vrot.slane %v3673_v4, %v3487_v33 }
 0x2c3   : > { %v1105_v28 = vrot.slane %v1104_v13, 1  ;;  %v1115_v10 = vadd.f32 %v1114_v41, %v1113_v61 }
 0x2c4   : > { %v1129_v15 = vsel %vm4499_vm4, %v1127_v47, %v1095_v7  ;;  %vm4539_vm4 = vcmp.eq.s32.totalorder %v3715_v27, 4294967295 }
 0x2c5   : > { %v1106_v36 = vadd.f32 %v1105_v28, %v1104_v13  ;;  %v1116_v45 = vrot.slane %v1115_v10, 1  ;;  %v1920_v23 = vsel %vm4539_vm4, %v3663_v1, 0.0  ;;  %vm4543_vm4 = vcmp.eq.s32.totalorder %v3715_v27, 1 }
 0x2c6   : > { %v1936_v41 = vsel %vm4543_vm4, %v3671_v3, 0.0  ;;  %vm4548_vm4 = vcmask 130048  }
 0x2c7   : > { %v1117_v31 = vadd.f32 %v1116_v45, %v1115_v10  ;;  %v1131_v35 = vsel %vm4497_vm9, %v1129_v15, %v1106_v36  ;;  %vm4533_vm9 = vcmask 64512  }
 0x2c8   : > { %vm4535_vm10 = vmmov %vm4533_vm9 }
 0x2c9   : > { %v3236_v40 = vpack.c.bf16 %v1117_v31, %v1131_v35  ;;  %v1951_v35 = vsel %vm969_vm2, %v3676_v8, 0.0 }
 0x2cb   : > { %3238 = vmatpush3.bf16.msk.msra.mxu1 %vm3908_vm1, %v3236_v40 }
 0x2cc   : > { %3164 = vmatprep.subr.mxu1 %v3500_v49 }
 0x2ce   : > { %3155 = vmatmul.mubr.msk.f32.vlgmr.msra.gmra.mrb[12].mxu1 %vm4498_vm3, %v3498_v46  ;;  %vm4538_vm3 = vcmp.eq.s32.totalorder %v3718_v34, 4294967294 }
 0x2cf   : > { %3165 = vmatpush3.msra.mxu1 %v3500_v49  ;;  %3166 = vmatprep.mubr.msk.f32.mxu1 %vm4533_vm9, %v3583_v20  ;;  %v1784_v49 = vsel %vm4502_vm12, %v3653_v62, 0.0  ;;  %vm4536_vm9 = vcmp.eq.s32.totalorder %v3718_v34, 4294967293  ;;  %v1911_v62 = vsel %vm4538_vm3, %v3659_v0, 0.0  ;;  %vm4542_vm3 = vcmp.eq.s32.totalorder %v3718_v34, 0 }
 0x2d0   : > { %3242 = vmatprep.subr.bf16.mxu1 %v4534_v53  ;;  %v1903_v37 = vsel %vm4536_vm9, %v3656_v63, 0.0  ;;  %vm4541_vm9 = vcmp.eq.s32.totalorder %v3715_v27, 0 }
 0x2d1   : > { %v1928_v61 = vsel %vm4541_vm9, %v3667_v2, 0.0  ;;  %vm4546_vm9 = vcmp.eq.s32.totalorder %v3718_v34, 2 }
 0x2d2   : > { %3167 = vmatmul.mubr.msk.f32.vlgmr.msra.gmra.mrb[14].mxu1 %vm4535_vm10, %v3585_v21  ;;  %v1904_v21 = vsel %vm4503_vm13, %v3656_v63, 0.0  ;;  %vm4537_vm10 = vcmp.eq.s32.totalorder %v3715_v27, 4294967294  ;;  %v1919_v63 = vsel %vm4540_vm14, %v3663_v1, 0.0  ;;  %vm4544_vm14 = vcmp.eq.s32.totalorder %v3718_v34, 1 }
 0x2d3   : > { %3173 = vmatprep.mubr.msk.f32.mxu1 %vm4528_vm15, %v4527_v32  ;;  %v1912_v25 = vsel %vm4537_vm10, %v3659_v0, 0.0  ;;  %v1927_v0 = vsel %vm4542_vm3, %v3667_v2, 0.0  ;;  %v1935_v1 = vsel %vm4544_vm14, %v3671_v3, 0.0  ;;  %vm4545_vm10 = vcmp.eq.s32.totalorder %v3715_v27, 2  ;;  %vm4549_vm14 = vmmov %vm4548_vm4 }
 0x2d4   : > { %v1944_v10 = vsel %vm4545_vm10, %v1942_v48, 0.0  ;;  %v1943_v36 = vsel %vm4546_vm9, %v1942_v48, 0.0  ;;  %vm4547_vm3 = vcmp.eq.s32.totalorder %v3715_v27, 3  ;;  %v1960_v3 = vsel %vm980_vm8, %v3679_v9, 0.0  ;;  %vm4550_vm10 = vmmov %vm4548_vm4 }
 0x2d5   : > { %v1952_v2 = vsel %vm4547_vm3, %v3676_v8, 0.0  ;;  %vm4551_vm9 = vcmp.eq.s32.totalorder %v3718_v34, 4294967293  ;;  %vm4552_vm3 = vcmp.eq.s32.totalorder %v3715_v27, 4294967294 }
 0x37c   : > { %v1310_v6 = vpop.f32.mrb[12].mxu0 }
 0x37d   : > { %v3163_v58 = vpop.f32.mrb[13].mxu0 }
 0x380   : > { %v3187_v29 = vpop.f32.mrb[14].mxu0 }
 0x381   : > { %v1896_v43 = vadd.f32 %v3187_v29, %v1785_v16  ;;  %v1890_v20 = vpop.f32.mrb[15].mxu0  ;;  %v1959_v16 = vsel %vm979_vm6, %v3679_v9, 0.0 }
 0x382   : > { %v1891_v42 = vadd.f32 %v1890_v20, %v1784_v49 }
 0x383   : > { %v1906_v22 = vadd.f32 %v1904_v21, %v1896_v43 }
 0x384   : > { %v1905_v38 = vadd.f32 %v1903_v37, %v1891_v42 }
 0x385   : > { %v1914_v12 = vadd.f32 %v1912_v25, %v1906_v22 }
 0x386   : > { %v1913_v24 = vadd.f32 %v1911_v62, %v1905_v38 }
 0x387   : > { %v1922_v44 = vadd.f32 %v1920_v23, %v1914_v12 }
 0x388   : > { %v1921_v47 = vadd.f32 %v1919_v63, %v1913_v24  ;;  %v1320_v24 = vsel %vm4501_vm11, %v3624_v50, 0.0 }
 0x389   : > { %v1930_v13 = vadd.f32 %v1928_v61, %v1922_v44  ;;  %v1319_v61 = vsel %vm4502_vm12, %v3624_v50, 0.0 }
 0x38a   : > { %v1929_v7 = vadd.f32 %v1927_v0, %v1921_v47 }
 0x38b   : > { %v1938_v28 = vadd.f32 %v1936_v41, %v1930_v13 }
 0x38c   : > { %v1937_v4 = vadd.f32 %v1935_v1, %v1929_v7  ;;  %v1438_v7 = vsel %vm4551_vm9, %v3629_v54, 0.0  ;;  %vm4556_vm9 = vcmp.eq.s32.totalorder %v3715_v27, 0 }
 0x38d   : > { %v1946_v15 = vadd.f32 %v1944_v10, %v1938_v28  ;;  %v1447_v10 = vsel %vm4552_vm3, %v3632_v55, 0.0  ;;  %vm4557_vm3 = vcmp.eq.s32.totalorder %v3718_v34, 0 }
 0x38e   : > { %v1945_v45 = vadd.f32 %v1943_v36, %v1937_v4 }
 0x38f   : > { %v1954_v31 = vadd.f32 %v1952_v2, %v1946_v15 }
 0x390   : > { %v1953_v40 = vadd.f32 %v1951_v35, %v1945_v45 }
 0x391   : > { %v1962_v58 = vadd.f32 %v1960_v3, %v1954_v31  ;;  %v1463_v31 = vsel %vm4556_vm9, %v3639_v57, 0.0  ;;  %vm4561_vm9 = vcmp.eq.s32.totalorder %v3718_v34, 2 }
 0x392   : > { %v1961_v29 = vadd.f32 %v1959_v16, %v1953_v40 }
 0x393   : > { %v1964_v43 = vsel %vm3791_vm0, -10000.0, %v1962_v58  ;;  %v1485_v58 = vrot.slane %v3626_v52, %v3487_v33 }
 0x394   : > { %v1966_v49 = vsel %vm4548_vm4, %v1964_v43, -inf  ;;  %v1963_v20 = vsel %vm3798_vm5, -10000.0, %v1961_v29  ;;  %vm4553_vm4 = vcmp.eq.s32.totalorder %v3718_v34, 4294967294 }
 0x395   : > { %v1965_v8 = vsel %vm4549_vm14, %v1963_v20, -inf  ;;  %v1446_v15 = vsel %vm4553_vm4, %v3632_v55, 0.0  ;;  %vm4554_vm14 = vcmp.eq.s32.totalorder %v3715_v27, 4294967295  ;;  %v1462_v55 = vsel %vm4557_vm3, %v3639_v57, 0.0 }
 0x396   : > { %v1967_v21 = vmax.f32 %v1965_v8, %v1966_v49  ;;  %v1455_v36 = vsel %vm4554_vm14, %v3635_v56, 0.0  ;;  %vm4558_vm4 = vcmp.eq.s32.totalorder %v3715_v27, 1  ;;  %vm4559_vm14 = vcmp.eq.s32.totalorder %v3718_v34, 1 }
 0x397   : > { %v1471_v40 = vsel %vm4558_vm4, %v3643_v59, 0.0  ;;  %v1478_v57 = vsel %vm4561_vm9, %v3647_v60, 0.0  ;;  %vm4562_vm3 = vcmp.eq.s32.totalorder %v3715_v27, 3  ;;  %vm4563_vm4 = vcmask 130048  }
 0x398   : > { %v1968_v42 = vrot.slane %v1967_v21, 4  ;;  %v1487_v8 = vsel %vm4562_vm3, %v1485_v58, 0.0  ;;  %vm4566_vm9 = vmmov %vm4563_vm4  ;;  %vm4567_vm3 = vcmp.eq.s32.totalorder %v3718_v34, 4294967293 }
 0x39a   : > { %v1969_v22 = vmax.f32 %v1967_v21, %v1968_v42  ;;  %v1486_v42 = vsel %vm969_vm2, %v1485_v58, 0.0 }
 0x39c   : > { %v1970_v37 = vrot.slane %v1969_v22, 2 }
 0x39e   : > { %v1971_v25 = vmax.f32 %v1969_v22, %v1970_v37 }
 0x3a0   : > { %v1972_v9 = vrot.slane %v1971_v25, 1 }
 0x3a1   : > { %v1237_v38 = vpop.f32.mrb[12].mxu1 }
 0x3a2   : > { %v1311_v12 = vadd.f32 %v1310_v6, %v1237_v38  ;;  %v3156_v62 = vpop.f32.mrb[13].mxu1  ;;  %v1973_v23 = vmax.f32 %v1971_v25, %v1972_v9  ;;  %v1439_v6 = vsel %vm4503_vm13, %v3629_v54, 0.0 }
 0x3a4   : > { %1314 = vst.msk [vmem:[#allocation2] sm:$0xff] %vm4550_vm10, %v1311_v12  ;;  %v1974_v47 = vsub.f32 %v1963_v20, %v1973_v23  ;;  %v1975_v13 = vsub.f32 %v1964_v43, %v1973_v23  ;;  %vm4555_vm10 = vcmp.eq.s32.totalorder %v3718_v34, 4294967295 }
 0x3a5   : > { %v3168_v44 = vpop.f32.mrb[14].mxu1  ;;  %v1454_v45 = vsel %vm4555_vm10, %v3635_v56, 0.0  ;;  %v1470_v56 = vsel %vm4559_vm14, %v3643_v59, 0.0  ;;  %vm4560_vm10 = vcmp.eq.s32.totalorder %v3715_v27, 2  ;;  %v1495_v59 = vsel %vm980_vm8, %v3693_v17, 0.0  ;;  %vm4564_vm14 = vmmov %vm4563_vm4 }
 0x3a6   : > { %v1431_v63 = vadd.f32 %v3168_v44, %v1320_v24  ;;  %v1425_v48 = vpop.f32.mrb[15].mxu1  ;;  %v1976_v28 = vmul.f32 1.442695, %v1974_v47  ;;  %v1978_v1 = vmul.f32 1.442695, %v1975_v13  ;;  %v1479_v43 = vsel %vm4560_vm10, %v3647_v60, 0.0  ;;  %vm4565_vm10 = vmmov %vm4563_vm4 }
 0x3a7   : > { %v1426_v0 = vadd.f32 %v1425_v48, %v1319_v61  ;;  %v1494_v60 = vsel %vm979_vm6, %v3693_v17, 0.0 }
 0x3a8   : > { %v1441_v41 = vadd.f32 %v1439_v6, %v1431_v63  ;;  %3299 = vpow2.f32 %v1976_v28 }
 0x3a9   : > { %v1440_v50 = vadd.f32 %v1438_v7, %v1426_v0  ;;  %3301 = vpow2.f32 %v1978_v1 }
 0x3aa   : > { %v1449_v4 = vadd.f32 %v1447_v10, %v1441_v41 }
 0x3ab   : > { %v1448_v2 = vadd.f32 %v1446_v15, %v1440_v50 }
 0x3ac   : > { %v1457_v54 = vadd.f32 %v1455_v36, %v1449_v4 }
 0x3ad   : > { %v1456_v35 = vadd.f32 %v1454_v45, %v1448_v2 }
 0x3ae   : > { %v1465_v3 = vadd.f32 %v1463_v31, %v1457_v54 }
 0x3af   : > { %v1464_v16 = vadd.f32 %v1462_v55, %v1456_v35 }
 0x3b0   : > { %v1473_v29 = vadd.f32 %v1471_v40, %v1465_v3 }
 0x3b1   : > { %v1472_v49 = vadd.f32 %v1470_v56, %v1464_v16 }
 0x3b2   : > { %v1481_v20 = vadd.f32 %v1479_v43, %v1473_v29  ;;  %v3300_v22 = vpop.eup %3299 }
 0x3b3   : > { %v1480_v52 = vadd.f32 %v1478_v57, %v1472_v49  ;;  %v3302_v25 = vpop.eup %3301  ;;  %v1980_v38 = vsel %vm4563_vm4, %v3300_v22, 0.0 }
 0x3b4   : > { %v1489_v21 = vadd.f32 %v1487_v8, %v1481_v20  ;;  %v1981_v62 = vsel %vm4564_vm14, %v3302_v25, 0.0  ;;  %vm4568_vm14 = vmmov %vm4563_vm4 }
 0x3b5   : > { %v1488_v37 = vadd.f32 %v1486_v42, %v1480_v52  ;;  %v1982_v23 = vadd.f32 %v1981_v62, %v1980_v38 }
 0x3b6   : > { %v1497_v12 = vadd.f32 %v1495_v59, %v1489_v21 }
 0x3b7   : > { %v1496_v9 = vadd.f32 %v1494_v60, %v1488_v37  ;;  %v1983_v61 = vrot.slane %v1982_v23, 4 }
 0x3b8   : > { %v1499_v24 = vsel %vm3791_vm0, -10000.0, %v1497_v12 }
 0x3b9   : > { %v1501_v44 = vsel %vm4565_vm10, %v1499_v24, -inf  ;;  %v1498_v63 = vsel %vm3798_vm5, -10000.0, %v1496_v9  ;;  %v1984_v13 = vadd.f32 %v1983_v61, %v1982_v23  ;;  %vm4569_vm10 = vmmov %vm4563_vm4 }
 0x3ba   : > { %v1500_v48 = vsel %vm4566_vm9, %v1498_v63, -inf  ;;  %vm4570_vm9 = vmmov %vm4563_vm4 }
 0x3bb   : > { %v1502_v47 = vmax.f32 %v1500_v48, %v1501_v44  ;;  %v1985_v0 = vrot.slane %v1984_v13, 2 }
 0x3bd   : > { %v1503_v6 = vrot.slane %v1502_v47, 4  ;;  %v1986_v41 = vadd.f32 %v1985_v0, %v1984_v13 }
 0x3bf   : > { %v1504_v17 = vmax.f32 %v1502_v47, %v1503_v6  ;;  %v1987_v28 = vrot.slane %v1986_v41, 1 }
 0x3c1   : > { %v1505_v7 = vrot.slane %v1504_v17, 2  ;;  %v1988_v10 = vadd.f32 %v1987_v28, %v1986_v41 }
 0x3c3   : > { %v1506_v1 = vmax.f32 %v1504_v17, %v1505_v7  ;;  %3303 = vrcp.f32 %v1988_v10 }
 0x3c5   : > { %v1507_v50 = vrot.slane %v1506_v1, 1 }
 0x3c7   : > { %v1508_v4 = vmax.f32 %v1506_v1, %v1507_v50 }
 0x3c9   : > { %v1509_v15 = vsub.f32 %v1498_v63, %v1508_v4  ;;  %v1510_v36 = vsub.f32 %v1499_v24, %v1508_v4 }
 0x3cb   : > { %v1511_v2 = vmul.f32 1.442695, %v1509_v15  ;;  %v1513_v54 = vmul.f32 1.442695, %v1510_v36 }
 0x3cd   : > { %3305 = vpow2.f32 %v1511_v2  ;;  %v3304_v45 = vpop.eup %3303 }
 0x3ce   : > { %3307 = vpow2.f32 %v1513_v54  ;;  %v4048_v31 = vmul.f32 %v3304_v45, %v3300_v22  ;;  %v4050_v35 = vmul.f32 %v3304_v45, %v3302_v25 }
 0x3d0   : > { %v1992_v3 = vsel %vm4502_vm12, %v4048_v31, 0.0  ;;  %v1993_v55 = vsel %vm4501_vm11, %v4050_v35, 0.0  ;;  %v2003_v40 = vsel %vm4567_vm3, %v4048_v31, 0.0  ;;  %v2004_v58 = vsel %vm4503_vm13, %v4050_v35, 0.0  ;;  %vm4573_vm12 = vmmov %vm4563_vm4 }
 0x3d1   : > { %v1994_v16 = vsel %vm4563_vm4, %v1992_v3, 0.0  ;;  %v1995_v29 = vsel %vm4568_vm14, %v1993_v55, 0.0  ;;  %v2005_v56 = vsel %vm4569_vm10, %v2003_v40, 0.0  ;;  %v2006_v43 = vsel %vm4570_vm9, %v2004_v58, 0.0  ;;  %vm4574_vm13 = vmmov %vm4563_vm4 }
 0x3d2   : > { %v1996_v49 = vadd.f32 %v1995_v29, %v1994_v16  ;;  %v2007_v20 = vadd.f32 %v2006_v43, %v2005_v56  ;;  %vm4571_vm11 = vcmp.eq.s32.totalorder %v3718_v34, 4294967294  ;;  %vm4572_vm3 = vcmp.eq.s32.totalorder %v3715_v27, 4294967294 }
 0x3d3   : > { %v2014_v57 = vsel %vm4571_vm11, %v4048_v31, 0.0  ;;  %v2015_v8 = vsel %vm4572_vm3, %v4050_v35, 0.0  ;;  %vm4575_vm4 = vcmp.eq.s32.totalorder %v3718_v34, 4294967295  ;;  %vm4576_vm14 = vcmp.eq.s32.totalorder %v3715_v27, 4294967295  ;;  %vm4577_vm11 = vmmov %vm4570_vm9 }
 0x3d4   : > { %v2016_v52 = vsel %vm4573_vm12, %v2014_v57, 0.0  ;;  %v2017_v21 = vsel %vm4574_vm13, %v2015_v8, 0.0  ;;  %v2025_v42 = vsel %vm4575_vm4, %v4048_v31, 0.0  ;;  %v2026_v22 = vsel %vm4576_vm14, %v4050_v35, 0.0  ;;  %vm4578_vm12 = vmmov %vm4570_vm9 }
 0x3d5   : > { %v1997_v37 = vrot.slane %v1996_v49, 4  ;;  %v2008_v25 = vrot.slane %v2007_v20, 4  ;;  %v2018_v38 = vadd.f32 %v2017_v21, %v2016_v52  ;;  %v2027_v12 = vsel %vm4577_vm11, %v2025_v42, 0.0  ;;  %vm4579_vm13 = vmmov %vm4570_vm9 }
 0x3d6   : > { %v2028_v9 = vsel %vm4579_vm13, %v2026_v22, 0.0  ;;  %vm4580_vm10 = vcmp.eq.s32.totalorder %v3718_v34, 0  ;;  %vm4581_vm9 = vcmp.eq.s32.totalorder %v3715_v27, 0  ;;  %vm4582_vm3 = vmmov %vm4577_vm11  ;;  %vm4585_vm11 = vcmp.eq.s32.totalorder %v3718_v34, 1 }
 0x3d7   : > { %v4082_v59 = vpop.eup %3305  ;;  %v2036_v23 = vsel %vm4580_vm10, %v4048_v31, 0.0  ;;  %v2037_v24 = vsel %vm4581_vm9, %v4050_v35, 0.0  ;;  %v1998_v63 = vadd.f32 %v1997_v37, %v1996_v49  ;;  %v2009_v61 = vadd.f32 %v2008_v25, %v2007_v20  ;;  %vm4583_vm4 = vmmov %vm4582_vm3 }
 0x3d8   : > { %v4085_v60 = vpop.eup %3307  ;;  %v1515_v62 = vsel %vm4578_vm12, %v4082_v59, 0.0  ;;  %v2019_v48 = vrot.slane %v2018_v38, 4  ;;  %v2029_v13 = vadd.f32 %v2028_v9, %v2027_v12  ;;  %v2038_v6 = vsel %vm4583_vm4, %v2036_v23, 0.0  ;;  %vm4584_vm14 = vmmov %vm4582_vm3 }
 0x3d9   : > { %v1516_v44 = vsel %vm4582_vm3, %v4085_v60, 0.0  ;;  %v2039_v0 = vsel %vm4584_vm14, %v2037_v24, 0.0  ;;  %v1999_v17 = vrot.slane %v1998_v63, 2  ;;  %v2010_v41 = vrot.slane %v2009_v61, 2  ;;  %vm4587_vm13 = vmmov %vm4582_vm3 }
 0x3da   : > { %v1517_v47 = vadd.f32 %v1516_v44, %v1515_v62  ;;  %v2020_v7 = vadd.f32 %v2019_v48, %v2018_v38  ;;  %v2040_v28 = vadd.f32 %v2039_v0, %v2038_v6  ;;  %v2030_v10 = vrot.slane %v2029_v13, 4  ;;  %vm4588_vm10 = vmmov %vm4582_vm3 }
 0x3db   : > { %v2047_v50 = vsel %vm4585_vm11, %v4048_v31, 0.0  ;;  %vm4586_vm12 = vcmp.eq.s32.totalorder %v3715_v27, 1  ;;  %v2000_v15 = vadd.f32 %v1999_v17, %v1998_v63  ;;  %v2011_v36 = vadd.f32 %v2010_v41, %v2009_v61  ;;  %vm4591_vm14 = vmmov %vm4583_vm4 }
 0x3dc   : > { %v1518_v1 = vrot.slane %v1517_v47, 4  ;;  %v2048_v4 = vsel %vm4586_vm12, %v4050_v35, 0.0  ;;  %v2021_v2 = vrot.slane %v2020_v7, 2  ;;  %v2041_v54 = vrot.slane %v2040_v28, 4  ;;  %vm4593_vm12 = vmmov %vm4583_vm4 }
 0x3dd   : > { %v2031_v3 = vadd.f32 %v2030_v10, %v2029_v13  ;;  %v2049_v55 = vsel %vm4587_vm13, %v2047_v50, 0.0  ;;  %v2050_v40 = vsel %vm4588_vm10, %v2048_v4, 0.0  ;;  %v2001_v58 = vrot.slane %v2000_v15, 1  ;;  %vm4594_vm13 = vmmov %vm4583_vm4 }
 0x3de   : > { %v1519_v45 = vadd.f32 %v1518_v1, %v1517_v47  ;;  %v2012_v16 = vrot.slane %v2011_v36, 1  ;;  %v2022_v29 = vadd.f32 %v2021_v2, %v2020_v7  ;;  %v2042_v56 = vadd.f32 %v2041_v54, %v2040_v28  ;;  %vm4595_vm10 = vmmov %vm4583_vm4 }
 0x3df   : > { %v2032_v49 = vrot.slane %v2031_v3, 2  ;;  %v2051_v20 = vadd.f32 %v2050_v40, %v2049_v55  ;;  %vm4589_vm9 = vcmp.eq.s32.totalorder %v3718_v34, 2  ;;  %vm4590_vm3 = vcmp.eq.s32.totalorder %v3715_v27, 2 }
 0x3e0   : > { %v1520_v43 = vrot.slane %v1519_v45, 2  ;;  %v2058_v57 = vsel %vm4589_vm9, %v4048_v31, 0.0  ;;  %v2023_v8 = vrot.slane %v2022_v29, 1  ;;  %v2043_v52 = vrot.slane %v2042_v56, 2  ;;  %vm4596_vm9 = vmmov %vm4583_vm4 }
 0x3e1   : > { %v2033_v42 = vadd.f32 %v2032_v49, %v2031_v3  ;;  %v2052_v22 = vrot.slane %v2051_v20, 4  ;;  %v2059_v37 = vsel %vm4590_vm3, %v4050_v35, 0.0  ;;  %v2002_v25 = vadd.f32 %v2001_v58, %v2000_v15 }
 0x3e2   : > { %v1521_v21 = vadd.f32 %v1520_v43, %v1519_v45  ;;  %v2044_v38 = vadd.f32 %v2043_v52, %v2042_v56  ;;  %v2060_v12 = vsel %vm4583_vm4, %v2058_v57, 0.0  ;;  %v2061_v62 = vsel %vm4591_vm14, %v2059_v37, 0.0 }
 0x3e3   : > { %v2013_v23 = vadd.f32 %v2012_v16, %v2011_v36  ;;  %v2053_v24 = vadd.f32 %v2052_v22, %v2051_v20  ;;  %v2062_v44 = vadd.f32 %v2061_v62, %v2060_v12  ;;  %v2024_v63 = vadd.f32 %v2023_v8, %v2022_v29 }
 0x3e4   : > { %v1522_v9 = vrot.slane %v1521_v21, 1  ;;  %v2034_v61 = vrot.slane %v2033_v42, 1  ;;  %v2069_v48 = vsel %vm969_vm2, %v4048_v31, 0.0  ;;  %vm4592_vm11 = vcmp.eq.s32.totalorder %v3715_v27, 3 }
 0x3e5   : > { %v2070_v47 = vsel %vm4592_vm11, %v4050_v35, 0.0  ;;  %v2054_v6 = vrot.slane %v2053_v24, 2  ;;  %v2063_v0 = vrot.slane %v2062_v44, 4  ;;  %v2080_v17 = vsel %vm979_vm6, %v4048_v31, 0.0 }
 0x3e6   : > { %v1523_v13 = vadd.f32 %v1522_v9, %v1521_v21  ;;  %v2045_v41 = vrot.slane %v2044_v38, 1  ;;  %v2071_v7 = vsel %vm4593_vm12, %v2069_v48, 0.0  ;;  %v2072_v28 = vsel %vm4594_vm13, %v2070_v47, 0.0 }
 0x3e7   : > { %v2081_v1 = vsel %vm980_vm8, %v4050_v35, 0.0  ;;  %v2055_v10 = vadd.f32 %v2054_v6, %v2053_v24  ;;  %v2064_v50 = vadd.f32 %v2063_v0, %v2062_v44  ;;  %v2073_v4 = vadd.f32 %v2072_v28, %v2071_v7 }
 0x3e8   : > { %3309 = vrcp.f32 %v1523_v13  ;;  %v2082_v15 = vsel %vm4595_vm10, %v2080_v17, 0.0  ;;  %v2083_v36 = vsel %vm4596_vm9, %v2081_v1, 0.0  ;;  %v2091_v2 = vsel %vm1118_vm7, %v2002_v25, %v2013_v23 }
 0x3e9   : > { %v3254_v54 = vpack.c.bf16 %v4050_v35, %v4048_v31  ;;  %v2056_v45 = vrot.slane %v2055_v10, 1  ;;  %v2065_v3 = vrot.slane %v2064_v50, 2  ;;  %v2074_v55 = vrot.slane %v2073_v4, 4 }
 0x3ea   : > { %v2084_v40 = vadd.f32 %v2083_v36, %v2082_v15  ;;  %v2035_v58 = vadd.f32 %v2034_v61, %v2033_v42  ;;  %vm4597_vm3 = vcmask 1041408   ;;  %v2046_v29 = vadd.f32 %v2045_v41, %v2044_v38 }
 0x3eb   : > { %v2092_v16 = vsel %vm4597_vm3, %v2091_v2, %v2024_v63  ;;  %v2066_v56 = vadd.f32 %v2065_v3, %v2064_v50  ;;  %v2075_v43 = vadd.f32 %v2074_v55, %v2073_v4  ;;  %v2057_v20 = vadd.f32 %v2056_v45, %v2055_v10  ;;  %v4146_v63 = vpop.trf.xlu0 }
 0x3ec   : > { %v2085_v49 = vrot.slane %v2084_v40, 4  ;;  %vm4598_vm4 = vcmask 1042432   ;;  %vm4599_vm14 = vcmask 1043456   ;;  %vm4600_vm11 = vcmask 1044480  }
 0x3ed   : > { %v2093_v57 = vsel %vm4598_vm4, %v2092_v16, %v2035_v58  ;;  %v2067_v8 = vrot.slane %v2066_v56, 1  ;;  %v2076_v52 = vrot.slane %v2075_v43, 2  ;;  %vm4601_vm12 = vcmask 1045504  }
 0x3ee   : > { %v2086_v21 = vadd.f32 %v2085_v49, %v2084_v40  ;;  %v2094_v22 = vsel %vm4599_vm14, %v2093_v57, %v2046_v29  ;;  %vm4602_vm13 = vcmp.eq.s32.totalorder %v3718_v34, 4294967292  ;;  %vm4603_vm10 = vcmp.eq.s32.totalorder %v3715_v27, 4294967292 }
 0x3ef   : > { %v2095_v37 = vsel %vm4600_vm11, %v2094_v22, %v2057_v20  ;;  %v2068_v25 = vadd.f32 %v2067_v8, %v2066_v56  ;;  %v2077_v12 = vadd.f32 %v2076_v52, %v2075_v43  ;;  %vm4604_vm9 = vcmp.eq.s32.totalorder %v3718_v34, 4294967293  ;;  %v4179_v40 = vpop.trf.xlu0 }
 0x3f0   : > { %v2087_v62 = vrot.slane %v2086_v21, 2  ;;  %vm4605_vm3 = vcmp.eq.s32.totalorder %v3715_v27, 4294967293  ;;  %vm4606_vm4 = vcmask 1046528   ;;  %vm4607_vm14 = vcmask 130048  }
 0x3f1   : > { %v2078_v9 = vrot.slane %v2077_v12, 1  ;;  %v2096_v38 = vsel %vm4601_vm12, %v2095_v37, %v2068_v25  ;;  %vm4608_vm11 = vmmov %vm4607_vm14 }
 0x3f2   : > { %v3310_v42 = vpop.eup %3309  ;;  %v2088_v23 = vadd.f32 %v2087_v62, %v2086_v21  ;;  %vm4609_vm12 = vmmov %vm4608_vm11 }
 0x3f3   : > { %v4141_v24 = vmul.f32 %v3310_v42, %v4082_v59  ;;  %v4144_v44 = vmul.f32 %v3310_v42, %v4085_v60  ;;  %v2079_v61 = vadd.f32 %v2078_v9, %v2077_v12 }
 0x3f4   : > { %v2089_v48 = vrot.slane %v2088_v23, 1 }
 0x3f5   : > { %v1527_v47 = vsel %vm4602_vm13, %v4141_v24, 0.0  ;;  %v1528_v13 = vsel %vm4603_vm10, %v4144_v44, 0.0  ;;  %v1538_v59 = vsel %vm4604_vm9, %v4141_v24, 0.0  ;;  %v1539_v60 = vsel %vm4605_vm3, %v4144_v44, 0.0  ;;  %vm4610_vm13 = vmmov %vm4608_vm11 }
 0x3f6   : > { %v2090_v6 = vadd.f32 %v2089_v48, %v2088_v23  ;;  %v2097_v0 = vsel %vm4606_vm4, %v2096_v38, %v2079_v61  ;;  %v1529_v17 = vsel %vm4607_vm14, %v1527_v47, 0.0  ;;  %v1530_v41 = vsel %vm4608_vm11, %v1528_v13, 0.0  ;;  %vm4613_vm3 = vmmov %vm4608_vm11 }
 0x3f7   : > { %v1531_v7 = vadd.f32 %v1530_v41, %v1529_v17  ;;  %v1540_v28 = vsel %vm4609_vm12, %v1538_v59, 0.0  ;;  %v1541_v1 = vsel %vm4610_vm13, %v1539_v60, 0.0  ;;  %vm4611_vm10 = vcmp.eq.s32.totalorder %v3718_v34, 4294967294  ;;  %vm4614_vm4 = vmmov %vm4613_vm3  ;;  %v505_v59 = vpop.permute.xlu0 %504 }
 0x3f8   : > { %v1549_v10 = vsel %vm4611_vm10, %v4141_v24, 0.0  ;;  %v3250_v50 = vpack.c.bf16 %v2090_v6, %v2097_v0  ;;  %v1542_v4 = vadd.f32 %v1541_v1, %v1540_v28  ;;  %vm4612_vm9 = vcmp.eq.s32.totalorder %v3715_v27, 4294967294  ;;  %vm4617_vm12 = vmmov %vm4613_vm3 }
 0x3f9   : > { %v1550_v15 = vsel %vm4612_vm9, %v4144_v44, 0.0  ;;  %v1551_v36 = vsel %vm4613_vm3, %v1549_v10, 0.0  ;;  %v1532_v2 = vrot.slane %v1531_v7, 4  ;;  %vm4615_vm14 = vcmp.eq.s32.totalorder %v3718_v34, 4294967295  ;;  %vm4618_vm13 = vmmov %vm4613_vm3 }
 0x3fa   : > { %v1552_v45 = vsel %vm4614_vm4, %v1550_v15, 0.0  ;;  %v1560_v3 = vsel %vm4615_vm14, %v4141_v24, 0.0  ;;  %vm4616_vm11 = vcmp.eq.s32.totalorder %v3715_v27, 4294967295  ;;  %3252 = vmatpush3.bf16.msk.msra.mxu0 %vm3908_vm1, %v3250_v50  ;;  %v1543_v58 = vrot.slane %v1542_v4, 4  ;;  %vm4621_vm4 = vmmov %vm4613_vm3 }
 0x3fb   : > { %v1561_v55 = vsel %vm4616_vm11, %v4144_v44, 0.0  ;;  %v1553_v16 = vadd.f32 %v1552_v45, %v1551_v36  ;;  %v1562_v29 = vsel %vm4617_vm12, %v1560_v3, 0.0  ;;  %3253 = vmatprep.subr.bf16.mxu0 %v4534_v53  ;;  %v1533_v43 = vadd.f32 %v1532_v2, %v1531_v7 }
 0x3fc   : > { %v1563_v56 = vsel %vm4618_vm13, %v1561_v55, 0.0  ;;  %vm4619_vm10 = vcmp.eq.s32.totalorder %v3718_v34, 0  ;;  %vm4620_vm9 = vcmp.eq.s32.totalorder %v3715_v27, 0  ;;  %v1544_v8 = vadd.f32 %v1543_v58, %v1542_v4  ;;  %vm4625_vm13 = vmmov %vm4613_vm3 }
 0x3fd   : > { %v1564_v49 = vadd.f32 %v1563_v56, %v1562_v29  ;;  %v1571_v20 = vsel %vm4619_vm10, %v4141_v24, 0.0  ;;  %v1572_v57 = vsel %vm4620_vm9, %v4144_v44, 0.0  ;;  %v1554_v52 = vrot.slane %v1553_v16, 4  ;;  %vm4626_vm10 = vmmov %vm4613_vm3 }
 0x3fe   : > { %v1573_v21 = vsel %vm4613_vm3, %v1571_v20, 0.0  ;;  %v1574_v22 = vsel %vm4621_vm4, %v1572_v57, 0.0  ;;  %vm4622_vm14 = vcmask 72704   ;;  %v1534_v37 = vrot.slane %v1533_v43, 2 }
 0x3ff   : > { %3193 = vmatmul.mubr.msk.f32.vlgmr.msra.gmra.mrb[16].mxu0 %vm4622_vm14, %v3498_v46  ;;  %v1565_v25 = vrot.slane %v1564_v49, 4  ;;  %v1575_v12 = vadd.f32 %v1574_v22, %v1573_v21  ;;  %vm4623_vm11 = vcmp.eq.s32.totalorder %v3718_v34, 1  ;;  %v1545_v42 = vrot.slane %v1544_v8, 2  ;;  %vm4629_vm14 = vmmov %vm4621_vm4 }
 0x400   : > { %v1582_v62 = vsel %vm4623_vm11, %v4141_v24, 0.0  ;;  %3255 = vmatpush3.bf16.msra.mxu0 %v3254_v54  ;;  %3199 = vmatprep.mubr.msk.f32.mxu0 %vm4528_vm15, %v4527_v32  ;;  %v1555_v9 = vadd.f32 %v1554_v52, %v1553_v16  ;;  %vm4624_vm12 = vcmp.eq.s32.totalorder %v3715_v27, 1  ;;  %v1535_v61 = vadd.f32 %v1534_v37, %v1533_v43  ;;  %vm4630_vm11 = vmmov %vm4621_vm4 }
 0x401   : > { %v1583_v23 = vsel %vm4624_vm12, %v4144_v44, 0.0  ;;  %v1584_v38 = vsel %vm4625_vm13, %v1582_v62, 0.0  ;;  %v1566_v48 = vadd.f32 %v1565_v25, %v1564_v49  ;;  %v1576_v47 = vrot.slane %v1575_v12, 4  ;;  %vm4632_vm13 = vmmov %vm4621_vm4 }
 0x402   : > { %v1585_v13 = vsel %vm4626_vm10, %v1583_v23, 0.0  ;;  %v1546_v60 = vadd.f32 %v1545_v42, %v1544_v8  ;;  %v1556_v31 = vrot.slane %v1555_v9, 2  ;;  %vm4627_vm9 = vcmp.eq.s32.totalorder %v3718_v34, 2  ;;  %vm4633_vm10 = vmmov %vm4621_vm4 }
 0x403   : > { %v1586_v35 = vadd.f32 %v1585_v13, %v1584_v38  ;;  %v1593_v54 = vsel %vm4627_vm9, %v4141_v24, 0.0  ;;  %v1536_v6 = vrot.slane %v1535_v61, 1  ;;  %v1567_v0 = vrot.slane %v1566_v48, 2  ;;  %vm4634_vm9 = vmmov %vm4621_vm4 }
 0x404   : > { %v1577_v17 = vadd.f32 %v1576_v47, %v1575_v12  ;;  %vm4628_vm3 = vcmp.eq.s32.totalorder %v3715_v27, 2  ;;  %v1547_v7 = vrot.slane %v1546_v60, 1  ;;  %v1557_v28 = vadd.f32 %v1556_v31, %v1555_v9 }
 0x405   : > { %v1594_v41 = vsel %vm4628_vm3, %v4144_v44, 0.0  ;;  %v1587_v1 = vrot.slane %v1586_v35, 4  ;;  %v1595_v10 = vsel %vm4621_vm4, %v1593_v54, 0.0  ;;  %v636_v50 = vadd.f32 %v3544_v5, %v505_v59  ;;  %vm4635_vm3 = vmmov %vm4621_vm4 }
 0x406   : > { %v1568_v4 = vadd.f32 %v1567_v0, %v1566_v48  ;;  %v1578_v15 = vrot.slane %v1577_v17, 2  ;;  %v1596_v36 = vsel %vm4629_vm14, %v1594_v41, 0.0  ;;  %v1537_v2 = vadd.f32 %v1536_v6, %v1535_v61 }
 0x407   : > { %v1558_v45 = vrot.slane %v1557_v28, 1  ;;  %v1588_v3 = vadd.f32 %v1587_v1, %v1586_v35  ;;  %v1597_v55 = vadd.f32 %v1596_v36, %v1595_v10  ;;  %3200 = vmatmul.mubr.msk.f32.vlgmr.msra.gmra.mrb[16].mxu0 %vm4630_vm11, %v636_v50  ;;  %v1548_v58 = vadd.f32 %v1547_v7, %v1546_v60 }
 0x408   : > { %v1579_v16 = vadd.f32 %v1578_v15, %v1577_v17  ;;  %v1604_v29 = vsel %vm969_vm2, %v4141_v24, 0.0  ;;  %vm4631_vm12 = vcmp.eq.s32.totalorder %v3715_v27, 3  ;;  %v1569_v56 = vrot.slane %v1568_v4, 1 }
 0x409   : > { %v1605_v5 = vsel %vm4631_vm12, %v4144_v44, 0.0  ;;  %v1589_v43 = vrot.slane %v1588_v3, 2  ;;  %v1598_v49 = vrot.slane %v1597_v55, 4  ;;  %v1606_v20 = vsel %vm4632_vm13, %v1604_v29, 0.0 }
 0x40a   : > { %v1559_v57 = vadd.f32 %v1558_v45, %v1557_v28  ;;  %v1580_v8 = vrot.slane %v1579_v16, 1  ;;  %v1607_v52 = vsel %vm4633_vm10, %v1605_v5, 0.0  ;;  %v1615_v21 = vsel %vm979_vm6, %v4141_v24, 0.0 }
 0x40b   : > { %v1590_v22 = vadd.f32 %v1589_v43, %v1588_v3  ;;  %v1599_v37 = vadd.f32 %v1598_v49, %v1597_v55  ;;  %v1608_v25 = vadd.f32 %v1607_v52, %v1606_v20  ;;  %v1616_v12 = vsel %vm980_vm8, %v4144_v44, 0.0 }
 0x40c   : > { %v1617_v62 = vsel %vm4634_vm9, %v1615_v21, 0.0  ;;  %v1618_v42 = vsel %vm4635_vm3, %v1616_v12, 0.0  ;;  %v1626_v9 = vsel %vm1118_vm7, %v1537_v2, %v1548_v58  ;;  %v1570_v47 = vadd.f32 %v1569_v56, %v1568_v4 }
 0x40d   : > { %v1591_v23 = vrot.slane %v1590_v22, 1  ;;  %v1600_v38 = vrot.slane %v1599_v37, 2  ;;  %v1609_v61 = vrot.slane %v1608_v25, 4  ;;  %v1619_v48 = vadd.f32 %v1618_v42, %v1617_v62  ;;  %v4654_v62 = vld [vmem:[#allocation4_spill] sm:$0xff] }
 0x40e   : > { %vm4636_vm4 = vcmask 1041408   ;;  %v3247_v59 = vpack.c.bf16 %v4144_v44, %v4141_v24  ;;  %v1581_v60 = vadd.f32 %v1580_v8, %v1579_v16  ;;  %vm4637_vm14 = vcmask 1042432   ;;  %v4651_v8 = vld [vmem:[#allocation8_spill] sm:$0xff] }
 0x40f   : > { %v1627_v13 = vsel %vm4636_vm4, %v1626_v9, %v1559_v57  ;;  %v1601_v31 = vadd.f32 %v1600_v38, %v1599_v37  ;;  %v1610_v35 = vadd.f32 %v1609_v61, %v1608_v25  ;;  %v1620_v54 = vrot.slane %v1619_v48, 4  ;;  %v4655_v9 = vld [vmem:[#allocation9_spill] sm:$0xff] }
 0x410   : > { %v1592_v6 = vadd.f32 %v1591_v23, %v1590_v22  ;;  %v1628_v0 = vsel %vm4637_vm14, %v1627_v13, %v1570_v47  ;;  %vm4638_vm11 = vcmask 1043456   ;;  %vm4639_vm12 = vcmask 1044480   ;;  %v2714_v22 = vld [vmem:[#allocation2] sm:$0xff] }
 0x411   : > { %v1602_v17 = vrot.slane %v1601_v31, 1  ;;  %v1611_v41 = vrot.slane %v1610_v35, 2  ;;  %v1621_v7 = vadd.f32 %v1620_v54, %v1619_v48  ;;  %v1629_v28 = vsel %vm4638_vm11, %v1628_v0, %v1581_v60  ;;  %vm4645_vm11 = vmmov %vm4635_vm3  ;;  %v4658_v48 = vld [vmem:[#allocation10_spill] sm:$0xff] }
 0x412   : > { %v1630_v1 = vsel %vm4639_vm12, %v1629_v28, %v1592_v6  ;;  %vm4640_vm13 = vcmask 1045504   ;;  %vm4641_vm10 = vcmask 1046528   ;;  %vm4642_vm9 = vcmask 72704   ;;  %vm4646_vm12 = vmmov %vm4635_vm3  ;;  %v4663_v6 = vld [vmem:[#allocation5_spill] sm:$0xff]  ;;  %v4666_v28 = vld [vmem:[#allocation6_spill] sm:$0xff] }
 0x413   : > { %v1603_v10 = vadd.f32 %v1602_v17, %v1601_v31  ;;  %v1612_v50 = vadd.f32 %v1611_v41, %v1610_v35  ;;  %v1622_v4 = vrot.slane %v1621_v7, 2  ;;  %v631_v58 = vadd.f32 %v3559_v11, %v3810_v30 }
 0x414   : > { %vm4643_vm4 = vcmask 64512   ;;  %v2399_v42 = vrot.slane %v4654_v62, %v3487_v33 }
 0x415   : > { %v1613_v15 = vrot.slane %v1612_v50, 1  ;;  %v1623_v36 = vadd.f32 %v1622_v4, %v1621_v7  ;;  %v1631_v24 = vsel %vm4640_vm13, %v1630_v1, %v1603_v10  ;;  %vm4644_vm14 = vmmov %vm4643_vm4  ;;  %vm4647_vm13 = vcmp.eq.s32.totalorder %v3715_v27, 4294967292 }
 0x417   : > { %v1614_v44 = vadd.f32 %v1613_v15, %v1612_v50  ;;  %v1624_v2 = vrot.slane %v1623_v36, 1  ;;  %v2416_v50 = vsel %vm969_vm2, %v4666_v28, 0.0  ;;  %v4668_v15 = vld [vmem:[#allocation7_spill] sm:$0xff] }
 0x419   : > { %v1625_v45 = vadd.f32 %v1624_v2, %v1623_v36  ;;  %v1632_v3 = vsel %vm4641_vm10, %v1631_v24, %v1614_v44  ;;  %vm4648_vm10 = vcmp.eq.s32.totalorder %v3718_v34, 4294967292  ;;  %v2425_v36 = vsel %vm980_vm8, %v4668_v15, 0.0 }
 0x41a   : > { %v2424_v44 = vsel %vm979_vm6, %v4668_v15, 0.0 }
 0x41b   : > { %v3243_v55 = vpack.c.bf16 %v1625_v45, %v1632_v3 }
 0x41d   : > { %3245 = vmatpush3.bf16.msk.msra.mxu1 %vm3908_vm1, %v3243_v55 }
 0x41e   : > { %3246 = vmatprep.subr.bf16.mxu1 %v4534_v53 }
 0x420   : > { %3174 = vmatmul.mubr.msk.f32.vlgmr.msra.gmra.mrb[16].mxu1 %vm4642_vm9, %v3498_v46  ;;  %vm4649_vm9 = vcmp.eq.s32.totalorder %v3715_v27, 4294967293 }
 0x421   : > { %3248 = vmatpush3.bf16.msra.mxu1 %v3247_v59  ;;  %3180 = vmatprep.mubr.msk.f32.mxu1 %vm4528_vm15, %v4527_v32  ;;  %v2369_v43 = vsel %vm4649_vm9, %v3699_v19, 0.0  ;;  %vm4661_vm9 = vcmp.eq.s32.totalorder %v3715_v27, 1 }
 0x422   : > { %3202 = vmatprep.subr.mxu1 %v3502_v51  ;;  %v2401_v60 = vsel %vm4661_vm9, %v2399_v42, 0.0  ;;  %vm4674_vm9 = vcmp.eq.s32.totalorder %v3715_v27, 4294967292 }
 0x428   : > { %3181 = vmatmul.mubr.msk.f32.vlgmr.msra.gmra.mrb[16].mxu1 %vm4635_vm3, %v631_v58  ;;  %vm4650_vm3 = vcmp.eq.s32.totalorder %v3718_v34, 4294967293 }
 0x429   : > { %3203 = vmatpush3.msra.mxu1 %v3502_v51  ;;  %3204 = vmatprep.mubr.msk.f32.mxu1 %vm4643_vm4, %v4146_v63  ;;  %v2250_v51 = vsel %vm4647_vm13, %v3696_v18, 0.0  ;;  %v2368_v57 = vsel %vm4650_vm3, %v3699_v19, 0.0  ;;  %vm4652_vm4 = vcmp.eq.s32.totalorder %v3715_v27, 4294967294  ;;  %vm4659_vm13 = vcmp.eq.s32.totalorder %v3715_v27, 0 }
 0x42a   : > { %3256 = vmatprep.subr.bf16.mxu1 %v4534_v53  ;;  %v2377_v52 = vsel %vm4652_vm4, %v4651_v8, 0.0  ;;  %v2393_v47 = vsel %vm4659_vm13, %v4658_v48, 0.0  ;;  %vm4662_vm3 = vcmp.eq.s32.totalorder %v3718_v34, 1  ;;  %vm4664_vm4 = vcmp.eq.s32.totalorder %v3715_v27, 2 }
 0x42b   : > { %v2400_v35 = vsel %vm4662_vm3, %v2399_v42, 0.0  ;;  %v2409_v0 = vsel %vm4664_vm4, %v4663_v6, 0.0  ;;  %vm4675_vm3 = vcmp.eq.s32.totalorder %v3718_v34, 4294967293  ;;  %vm4676_vm4 = vcmp.eq.s32.totalorder %v3715_v27, 4294967293 }
 0x42c   : > { %3205 = vmatmul.mubr.msk.f32.vlgmr.msra.gmra.mrb[18].mxu1 %vm4644_vm14, %v4179_v40  ;;  %v2249_v40 = vsel %vm4648_vm10, %v3696_v18, 0.0  ;;  %vm4653_vm14 = vcmp.eq.s32.totalorder %v3718_v34, 4294967294  ;;  %vm4660_vm10 = vcmp.eq.s32.totalorder %v3718_v34, 0 }
 0x42d   : > { %3211 = vmatprep.mubr.msk.f32.mxu1 %vm4528_vm15, %v4527_v32  ;;  %v2376_v18 = vsel %vm4653_vm14, %v4651_v8, 0.0  ;;  %v2392_v33 = vsel %vm4660_vm10, %v4658_v48, 0.0  ;;  %vm4665_vm14 = vcmp.eq.s32.totalorder %v3718_v34, 2  ;;  %vm4673_vm10 = vcmp.eq.s32.totalorder %v3718_v34, 4294967292 }
 0x42e   : > { %v2408_v41 = vsel %vm4665_vm14, %v4663_v6, 0.0 }
 0x4da   : > { %v2240_v16 = vpop.f32.mrb[16].mxu0 }
 0x4db   : > { %2244 = vst.msk [vmem:[#allocation2 + $0x10] sm:$0xff] %vm4645_vm11, %v2240_v16  ;;  %v3201_v29 = vpop.f32.mrb[17].mxu0  ;;  %vm4656_vm11 = vcmp.eq.s32.totalorder %v3715_v27, 4294967295 }
 0x4dc   : > { %v2385_v19 = vsel %vm4656_vm11, %v4655_v9, 0.0  ;;  %vm4667_vm11 = vcmp.eq.s32.totalorder %v3715_v27, 3 }
 0x4dd   : > { %v2417_v1 = vsel %vm4667_vm11, %v4666_v28, 0.0 }
 0x4fb   : > { %v1775_v11 = vpop.f32.mrb[16].mxu1 }
 0x4fc   : > { %1779 = vst.msk [vmem:[#allocation2 + $0x8] sm:$0xff] %vm4646_vm12, %v1775_v11  ;;  %v3182_v30 = vpop.f32.mrb[17].mxu1  ;;  %vm4657_vm12 = vcmp.eq.s32.totalorder %v3718_v34, 4294967295 }
 0x4fd   : > { %v2384_v61 = vsel %vm4657_vm12, %v4655_v9, 0.0  ;;  %vm4669_vm12 = vcmask 130048  }
 0x4fe   : > { %vm4670_vm13 = vmmov %vm4669_vm12 }
 0x4ff   : > { %v3206_v63 = vpop.f32.mrb[18].mxu1 }
 0x500   : > { %v2361_v5 = vadd.f32 %v3206_v63, %v2250_v51  ;;  %v2355_v56 = vpop.f32.mrb[19].mxu1 }
 0x501   : > { %v2356_v49 = vadd.f32 %v2355_v56, %v2249_v40 }
 0x502   : > { %v2371_v20 = vadd.f32 %v2369_v43, %v2361_v5 }
 0x503   : > { %v2370_v21 = vadd.f32 %v2368_v57, %v2356_v49  ;;  %v2715_v37 = vld [vmem:[#allocation2 + $0x8] sm:$0xff] }
 0x504   : > { %v2379_v25 = vadd.f32 %v2377_v52, %v2371_v20  ;;  %v2718_v12 = vpack.c.bf16 %v2715_v37, %v2714_v22 }
 0x505   : > { %v2378_v23 = vadd.f32 %v2376_v18, %v2370_v21 }
 0x506   : > { %v2387_v38 = vadd.f32 %v2385_v19, %v2379_v25  ;;  %3221 = vmatprep.subr.bf16.mxu0 %v2718_v12 }
 0x507   : > { %v2386_v13 = vadd.f32 %v2384_v61, %v2378_v23  ;;  %3222 = vmatpush3.bf16.msra.mxu0 %v2718_v12 }
 0x508   : > { %v2395_v59 = vadd.f32 %v2393_v47, %v2387_v38 }
 0x509   : > { %v2394_v31 = vadd.f32 %v2392_v33, %v2386_v13 }
 0x50a   : > { %v2403_v54 = vadd.f32 %v2401_v60, %v2395_v59 }
 0x50b   : > { %v2402_v17 = vadd.f32 %v2400_v35, %v2394_v31 }
 0x50c   : > { %v2411_v7 = vadd.f32 %v2409_v0, %v2403_v54 }
 0x50d   : > { %v2410_v10 = vadd.f32 %v2408_v41, %v2402_v17 }
 0x50e   : > { %v2419_v4 = vadd.f32 %v2417_v1, %v2411_v7 }
 0x50f   : > { %v2418_v24 = vadd.f32 %v2416_v50, %v2410_v10 }
 0x510   : > { %v2427_v2 = vadd.f32 %v2425_v36, %v2419_v4 }
 0x511   : > { %v2426_v45 = vadd.f32 %v2424_v44, %v2418_v24 }
 0x512   : > { %v2429_v3 = vsel %vm3791_vm0, -10000.0, %v2427_v2  ;;  %vm4671_vm0 = vmmov %vm4669_vm12 }
 0x513   : > { %v2431_v55 = vsel %vm4669_vm12, %v2429_v3, -inf  ;;  %v2428_v58 = vsel %vm3798_vm5, -10000.0, %v2426_v45  ;;  %vm4672_vm5 = vmmov %vm4671_vm0 }
 0x514   : > { %v2430_v16 = vsel %vm4670_vm13, %v2428_v58, -inf  ;;  %vm4677_vm14 = vmmov %vm4671_vm0 }
 0x515   : > { %v2432_v29 = vmax.f32 %v2430_v16, %v2431_v55  ;;  %vm4678_vm11 = vmmov %vm4671_vm0 }
 0x516   : > { %vm4679_vm12 = vmmov %vm4671_vm0 }
 0x517   : > { %v2433_v11 = vrot.slane %v2432_v29, 4  ;;  %vm4680_vm13 = vmmov %vm4671_vm0 }
 0x519   : > { %v2434_v30 = vmax.f32 %v2432_v29, %v2433_v11 }
 0x51b   : > { %v2435_v51 = vrot.slane %v2434_v30, 2 }
 0x51d   : > { %v2436_v63 = vmax.f32 %v2434_v30, %v2435_v51 }
 0x51f   : > { %v2437_v5 = vrot.slane %v2436_v63, 1 }
 0x521   : > { %v2438_v40 = vmax.f32 %v2436_v63, %v2437_v5 }
 0x523   : > { %v2439_v56 = vsub.f32 %v2428_v58, %v2438_v40  ;;  %v2440_v43 = vsub.f32 %v2429_v3, %v2438_v40 }
 0x525   : > { %v2441_v49 = vmul.f32 1.442695, %v2439_v56  ;;  %v2443_v20 = vmul.f32 1.442695, %v2440_v43 }
 0x527   : > { %3311 = vpow2.f32 %v2441_v49 }
 0x528   : > { %3313 = vpow2.f32 %v2443_v20 }
 0x531   : > { %v3312_v39 = vpop.eup %3311 }
 0x532   : > { %v3314_v57 = vpop.eup %3313  ;;  %v2445_v26 = vsel %vm4671_vm0, %v3312_v39, 0.0  ;;  %vm4681_vm0 = vcmp.eq.s32.totalorder %v3718_v34, 4294967294 }
 0x533   : > { %v2446_v8 = vsel %vm4672_vm5, %v3314_v57, 0.0  ;;  %vm4682_vm5 = vcmp.eq.s32.totalorder %v3715_v27, 4294967294 }
 0x534   : > { %v2447_v52 = vadd.f32 %v2446_v8, %v2445_v26 }
 0x536   : > { %v2448_v21 = vrot.slane %v2447_v52, 4 }
 0x538   : > { %v2449_v22 = vadd.f32 %v2448_v21, %v2447_v52 }
 0x53a   : > { %v2450_v37 = vrot.slane %v2449_v22, 2 }
 0x53c   : > { %v2451_v25 = vadd.f32 %v2450_v37, %v2449_v22 }
 0x53e   : > { %v2452_v18 = vrot.slane %v2451_v25, 1 }
 0x540   : > { %v2453_v12 = vadd.f32 %v2452_v18, %v2451_v25 }
 0x542   : > { %3315 = vrcp.f32 %v2453_v12 }
 0x54c   : > { %v3316_v62 = vpop.eup %3315 }
 0x54d   : > { %v4327_v42 = vmul.f32 %v3316_v62, %v3312_v39  ;;  %v4329_v9 = vmul.f32 %v3316_v62, %v3314_v57 }
 0x54f   : > { %v2457_v19 = vsel %vm4673_vm10, %v4327_v42, 0.0  ;;  %v2458_v23 = vsel %vm4674_vm9, %v4329_v9, 0.0  ;;  %v2468_v38 = vsel %vm4675_vm3, %v4327_v42, 0.0  ;;  %v2469_v61 = vsel %vm4676_vm4, %v4329_v9, 0.0  ;;  %vm4683_vm10 = vmmov %vm4678_vm11 }
 0x550   : > { %v2459_v48 = vsel %vm4677_vm14, %v2457_v19, 0.0  ;;  %v2460_v47 = vsel %vm4678_vm11, %v2458_v23, 0.0  ;;  %v2470_v13 = vsel %vm4679_vm12, %v2468_v38, 0.0  ;;  %v2471_v59 = vsel %vm4680_vm13, %v2469_v61, 0.0  ;;  %vm4684_vm9 = vmmov %vm4683_vm10 }
 0x551   : > { %v2461_v33 = vadd.f32 %v2460_v47, %v2459_v48  ;;  %v2472_v60 = vadd.f32 %v2471_v59, %v2470_v13  ;;  %v2479_v31 = vsel %vm4681_vm0, %v4327_v42, 0.0  ;;  %v2480_v35 = vsel %vm4682_vm5, %v4329_v9, 0.0  ;;  %vm4687_vm14 = vmmov %vm4684_vm9 }
 0x552   : > { %v2481_v54 = vsel %vm4683_vm10, %v2479_v31, 0.0  ;;  %v2482_v6 = vsel %vm4684_vm9, %v2480_v35, 0.0  ;;  %vm4685_vm3 = vcmp.eq.s32.totalorder %v3718_v34, 4294967295  ;;  %vm4686_vm4 = vcmp.eq.s32.totalorder %v3715_v27, 4294967295  ;;  %vm4688_vm11 = vmmov %vm4684_vm9 }
 0x553   : > { %v2490_v0 = vsel %vm4685_vm3, %v4327_v42, 0.0  ;;  %v2491_v17 = vsel %vm4686_vm4, %v4329_v9, 0.0  ;;  %v2462_v41 = vrot.slane %v2461_v33, 4  ;;  %v2473_v7 = vrot.slane %v2472_v60, 4  ;;  %vm4692_vm5 = vmmov %vm4684_vm9 }
 0x554   : > { %v2483_v28 = vadd.f32 %v2482_v6, %v2481_v54  ;;  %v2492_v1 = vsel %vm4687_vm14, %v2490_v0, 0.0  ;;  %v2493_v10 = vsel %vm4688_vm11, %v2491_v17, 0.0  ;;  %vm4689_vm12 = vcmp.eq.s32.totalorder %v3718_v34, 0  ;;  %vm4693_vm10 = vmmov %vm4692_vm5 }
 0x555   : > { %v2501_v50 = vsel %vm4689_vm12, %v4327_v42, 0.0  ;;  %vm4690_vm13 = vcmp.eq.s32.totalorder %v3715_v27, 0  ;;  %vm4691_vm0 = vcmp.eq.s32.totalorder %v3718_v34, 1  ;;  %v2463_v36 = vadd.f32 %v2462_v41, %v2461_v33  ;;  %vm4695_vm3 = vmmov %vm4692_vm5 }
 0x556   : > { %v2502_v4 = vsel %vm4690_vm13, %v4329_v9, 0.0  ;;  %v2512_v15 = vsel %vm4691_vm0, %v4327_v42, 0.0  ;;  %v2474_v24 = vadd.f32 %v2473_v7, %v2472_v60  ;;  %v2484_v44 = vrot.slane %v2483_v28, 4  ;;  %vm4696_vm4 = vmmov %vm4695_vm3 }
 0x557   : > { %v2494_v2 = vadd.f32 %v2493_v10, %v2492_v1  ;;  %v2503_v45 = vsel %vm4692_vm5, %v2501_v50, 0.0  ;;  %v2504_v3 = vsel %vm4693_vm10, %v2502_v4, 0.0  ;;  %vm4694_vm9 = vcmp.eq.s32.totalorder %v3715_v27, 1  ;;  %vm4699_vm12 = vmmov %vm4695_vm3 }
 0x558   : > { %v2513_v55 = vsel %vm4694_vm9, %v4329_v9, 0.0  ;;  %v2514_v58 = vsel %vm4695_vm3, %v2512_v15, 0.0  ;;  %v2464_v16 = vrot.slane %v2463_v36, 2  ;;  %v2475_v29 = vrot.slane %v2474_v24, 2  ;;  %vm4700_vm13 = vmmov %vm4695_vm3 }
 0x559   : > { %v2485_v11 = vadd.f32 %v2484_v44, %v2483_v28  ;;  %v2495_v30 = vrot.slane %v2494_v2, 4  ;;  %v2505_v51 = vadd.f32 %v2504_v3, %v2503_v45  ;;  %v2515_v63 = vsel %vm4696_vm4, %v2513_v55, 0.0  ;;  %vm4702_vm5 = vmmov %vm4695_vm3 }
 0x55a   : > { %vm4697_vm14 = vcmp.eq.s32.totalorder %v3718_v34, 2  ;;  %vm4698_vm11 = vcmp.eq.s32.totalorder %v3715_v27, 2  ;;  %v2465_v56 = vadd.f32 %v2464_v16, %v2463_v36  ;;  %v2476_v43 = vadd.f32 %v2475_v29, %v2474_v24  ;;  %vm4703_vm10 = vmmov %vm4695_vm3 }
 0x55b   : > { %v2523_v5 = vsel %vm4697_vm14, %v4327_v42, 0.0  ;;  %v2524_v40 = vsel %vm4698_vm11, %v4329_v9, 0.0  ;;  %v2486_v49 = vrot.slane %v2485_v11, 2  ;;  %v2496_v20 = vadd.f32 %v2495_v30, %v2494_v2 }
 0x55c   : > { %v2506_v39 = vrot.slane %v2505_v51, 4  ;;  %v2516_v57 = vadd.f32 %v2515_v63, %v2514_v58  ;;  %v2525_v26 = vsel %vm4699_vm12, %v2523_v5, 0.0  ;;  %v2526_v8 = vsel %vm4700_vm13, %v2524_v40, 0.0 }
 0x55d   : > { %v2466_v52 = vrot.slane %v2465_v56, 1  ;;  %v2477_v21 = vrot.slane %v2476_v43, 1  ;;  %v2487_v22 = vadd.f32 %v2486_v49, %v2485_v11  ;;  %v2497_v37 = vrot.slane %v2496_v20, 2 }
 0x55e   : > { %v2507_v25 = vadd.f32 %v2506_v39, %v2505_v51  ;;  %v2517_v18 = vrot.slane %v2516_v57, 4  ;;  %v2527_v12 = vadd.f32 %v2526_v8, %v2525_v26  ;;  %v2534_v62 = vsel %vm969_vm2, %v4327_v42, 0.0  ;;  %vm4704_vm2 = vmmov %vm4695_vm3 }
 0x55f   : > { %v2467_v19 = vadd.f32 %v2466_v52, %v2465_v56  ;;  %v2478_v23 = vadd.f32 %v2477_v21, %v2476_v43  ;;  %v2488_v38 = vrot.slane %v2487_v22, 1  ;;  %v2498_v61 = vadd.f32 %v2497_v37, %v2496_v20  ;;  %vm4705_vm9 = vmmov %vm4704_vm2  ;;  %v510_v52 = vpop.permute.xlu1 %509  ;;  %v4713_v21 = vld [vmem:[#allocation3_spill] sm:$0xff] }
 0x560   : > { %v2508_v48 = vrot.slane %v2507_v25, 2  ;;  %v2518_v47 = vadd.f32 %v2517_v18, %v2516_v57  ;;  %v2528_v13 = vrot.slane %v2527_v12, 4  ;;  %vm4701_vm0 = vcmp.eq.s32.totalorder %v3715_v27, 3  ;;  %vm4714_vm12 = vmmov %vm4704_vm2  ;;  %v3291_v37 = vld [vmem:[%s4461_s7] sm:$0xff]  }
 0x561   : > { %v2535_v59 = vsel %vm4701_vm0, %v4329_v9, 0.0  ;;  %v2489_v33 = vadd.f32 %v2488_v38, %v2487_v22  ;;  %v2499_v60 = vrot.slane %v2498_v61, 1  ;;  %v2536_v31 = vsel %vm4702_vm5, %v2534_v62, 0.0  ;;  %v2732_v62 = vpop.permute.xlu0 %2731 }
 0x562   : > { %v2537_v35 = vsel %vm4703_vm10, %v2535_v59, 0.0  ;;  %v2509_v54 = vadd.f32 %v2508_v48, %v2507_v25  ;;  %v2519_v6 = vrot.slane %v2518_v47, 2  ;;  %v2529_v0 = vadd.f32 %v2528_v13, %v2527_v12 }
 0x563   : > { %v2538_v17 = vadd.f32 %v2537_v35, %v2536_v31  ;;  %v2500_v41 = vadd.f32 %v2499_v60, %v2498_v61  ;;  %v2545_v7 = vsel %vm979_vm6, %v4327_v42, 0.0  ;;  %v2546_v28 = vsel %vm980_vm8, %v4329_v9, 0.0  ;;  %v2727_v12 = vpop.permute.xlu1 %2726 }
 0x564   : > { %v2556_v1 = vsel %vm1118_vm7, %v2467_v19, %v2478_v23  ;;  %v2510_v10 = vrot.slane %v2509_v54, 1  ;;  %v2520_v50 = vadd.f32 %v2519_v6, %v2518_v47  ;;  %v2530_v4 = vrot.slane %v2529_v0, 2 }
 0x565   : > { %v2539_v15 = vrot.slane %v2538_v17, 4  ;;  %v2547_v36 = vsel %vm4704_vm2, %v2545_v7, 0.0  ;;  %v2548_v24 = vsel %vm4705_vm9, %v2546_v28, 0.0  ;;  %vm4706_vm3 = vcmask 1041408   ;;  %v2742_v13 = vpop.permute.xlu0 %2741  ;;  %v3322_v7 = vld [vmem:[%s3422_s28 + $0x18] sm:$0xff] }
 0x566   : > { %v2557_v44 = vsel %vm4706_vm3, %v2556_v1, %v2489_v33  ;;  %v3261_v34 = vpack.c.bf16 %v4329_v9, %v4327_v42  ;;  %v2511_v2 = vadd.f32 %v2510_v10, %v2509_v54  ;;  %v2521_v45 = vrot.slane %v2520_v50, 1  ;;  %v3319_v33 = vld [vmem:[%s3422_s28] sm:$0xff]  ;;  %v3320_v54 = vld [vmem:[%s3422_s28 + $0x10] sm:$0xff] }
 0x567   : > { %v2531_v3 = vadd.f32 %v2530_v4, %v2529_v0  ;;  %v2540_v27 = vadd.f32 %v2539_v15, %v2538_v17  ;;  %v2549_v55 = vadd.f32 %v2548_v24, %v2547_v36  ;;  %vm4707_vm6 = vcmask 1042432   ;;  %v2737_v23 = vpop.permute.xlu1 %2736  ;;  %v3321_v0 = vld [vmem:[%s3422_s28 + $0x8] sm:$0xff] }
 0x568   : > { %v2558_v58 = vsel %vm4707_vm6, %v2557_v44, %v2500_v41  ;;  %v2522_v16 = vadd.f32 %v2521_v45, %v2520_v50  ;;  %vm4708_vm8 = vcmask 1043456   ;;  %vm4709_vm7 = vcmask 1044480  }
 0x569   : > { %v2532_v29 = vrot.slane %v2531_v3, 1  ;;  %v2541_v11 = vrot.slane %v2540_v27, 2  ;;  %v2559_v30 = vsel %vm4708_vm8, %v2558_v58, %v2511_v2  ;;  %v2550_v51 = vrot.slane %v2549_v55, 4 }
 0x56a   : > { %v2560_v40 = vsel %vm4709_vm7, %v2559_v30, %v2522_v16  ;;  %vm4710_vm4 = vcmask 1045504   ;;  %vm4711_vm14 = vcmask 1046528   ;;  %vm4712_vm11 = vcmask 72704  }
 0x56b   : > { %v2533_v63 = vadd.f32 %v2532_v29, %v2531_v3  ;;  %v2542_v5 = vadd.f32 %v2541_v11, %v2540_v27  ;;  %v2551_v56 = vadd.f32 %v2550_v51, %v2549_v55  ;;  %v639_v22 = vadd.f32 %v4713_v21, %v510_v52  ;;  %v2868_v21 = vpop.permute.xlu0 %2867 }
 0x56c   : > { %vm4715_vm13 = vcmask 261120  }
 0x56d   : > { %v2543_v43 = vrot.slane %v2542_v5, 1  ;;  %v2561_v42 = vsel %vm4710_vm4, %v2560_v40, %v2533_v63  ;;  %v2552_v9 = vrot.slane %v2551_v56, 2  ;;  %3225 = vmatprep.mubr.msk.bf16.mxu0 %vm4715_vm13, %v3291_v37 }
 0x56f   : > { %v2544_v49 = vadd.f32 %v2543_v43, %v2542_v5  ;;  %v2553_v20 = vadd.f32 %v2552_v9, %v2551_v56 }
 0x571   : > { %v2562_v39 = vsel %vm4711_vm14, %v2561_v42, %v2544_v49  ;;  %v2554_v57 = vrot.slane %v2553_v20, 1 }
 0x573   : > { %v2555_v26 = vadd.f32 %v2554_v57, %v2553_v20 }
 0x575   : > { %v3257_v8 = vpack.c.bf16 %v2555_v26, %v2562_v39 }
 0x577   : > { %3259 = vmatpush3.bf16.msk.msra.mxu1 %vm3908_vm1, %v3257_v8  ;;  %vm4716_vm1 = vmmov %vm4704_vm2 }
 0x578   : > { %3260 = vmatprep.subr.bf16.mxu1 %v4534_v53  ;;  %vm4718_vm0 = vmmov %vm4716_vm1 }
 0x579   : > { %vm4719_vm5 = vmmov %vm4718_vm0 }
 0x57a   : > { %3212 = vmatmul.mubr.msk.f32.vlgmr.msra.gmra.mrb[20].mxu1 %vm4712_vm11, %v3498_v46  ;;  %v2716_v46 = vld [vmem:[#allocation2 + $0x10] sm:$0xff]  ;;  %vm4720_vm10 = vmmov %vm4718_vm0 }
 0x57b   : > { %3262 = vmatpush3.bf16.msra.mxu1 %v3261_v34  ;;  %3218 = vmatprep.mubr.msk.f32.mxu1 %vm4528_vm15, %v4527_v32  ;;  %v3292_v32 = vld [vmem:[%s4461_s7 + $0x8] sm:$0xff]   ;;  %vm4717_vm15 = vmmov %vm4715_vm13 }
 0x57c   : > { %vm4721_vm2 = vmmov %vm4718_vm0 }
 0x57d   : > { %vm4722_vm9 = vmmov %vm4718_vm0 }
 0x57e   : > { %vm4723_vm3 = vmmov %vm4718_vm0 }
 0x57f   : > { %vm4724_vm6 = vmmov %vm4718_vm0 }
 0x580   : > { %vm4725_vm8 = vmmov %vm4718_vm0 }
 0x581   : > { %vm4726_vm7 = vmmov %vm4718_vm0 }
 0x582   : > { %3219 = vmatmul.mubr.msk.f32.vlgmr.msra.gmra.mrb[20].mxu1 %vm4714_vm12, %v639_v22  ;;  %v2863_v22 = vpop.permute.xlu1 %2862  ;;  %vm4727_vm4 = vmmov %vm4718_vm0 }
 0x583   : > { %vm4728_vm14 = vmmov %vm4718_vm0 }
 0x584   : > { %vm4729_vm11 = vmmov %vm4718_vm0 }
 0x655   : > { %v2705_v14 = vpop.f32.mrb[20].mxu1 }
 0x656   : > { %2709 = vst.msk [vmem:[#allocation2 + $0x18] sm:$0xff] %vm4716_vm1, %v2705_v14  ;;  %v3220_v53 = vpop.f32.mrb[21].mxu1 }
 0x657   : > { %v2878_v53 = vpop.permute.xlu0 %2877 }
 0x65d   : > { %v2717_v25 = vld [vmem:[#allocation2 + $0x18] sm:$0xff] }
 0x65e   : > { %v2719_v18 = vpack.c.bf16 %v2717_v25, %v2716_v46  ;;  %v2873_v46 = vpop.permute.xlu1 %2872  ;;  %v2896_v25 = vpop.permute.xlu0 %2895 }
 0x660   : > { %3223 = vmatprep.subr.bf16.mxu0 %v2719_v18 }
 0x661   : > { %3224 = vmatpush3.bf16.msra.mxu0 %v2719_v18 }
 0x662   : > { %v2891_v18 = vpop.permute.xlu1 %2890 }
 0x664   : > { %3226 = vmatmul.mubr.msk.bf16.vlgmr.msra.gmra.mrb[20].mxu0 %vm4717_vm15, %v3292_v32 }
 0x737   : > { %v3227_v19 = vpop.f32.mrb[20].mxu0 }
 0x738   : > { %v2794_v38 = vpop.f32.mrb[21].mxu0  ;;  %v2803_v61 = vadd.f32 %v3227_v19, %v2737_v23 }
 0x739   : > { %v2795_v48 = vadd.f32 %v2794_v38, %v2727_v12  ;;  %v3228_v47 = vpop.f32.mrb[22].mxu0 }
 0x73a   : > { %v2797_v59 = vpop.f32.mrb[23].mxu0  ;;  %v2806_v31 = vadd.f32 %v3228_v47, %v2742_v13  ;;  %v2811_v6 = vadd.f32 %v3320_v54, %v2803_v61  ;;  %v2906_v13 = vpop.permute.xlu0 %2905 }
 0x73b   : > { %v2809_v60 = vadd.f32 %v3319_v33, %v2795_v48  ;;  %v2798_v35 = vadd.f32 %v2797_v59, %v2732_v62  ;;  %v2901_v59 = vpop.permute.xlu1 %2900 }
 0x73c   : > { %v2812_v28 = vadd.f32 %v3322_v7, %v2806_v31  ;;  %v2816_v50 = vsel %vm4720_vm10, %v2811_v6, 0.0 }
 0x73d   : > { %v2810_v17 = vadd.f32 %v3321_v0, %v2798_v35  ;;  %v2813_v41 = vsel %vm4718_vm0, %v2809_v60, 0.0 }
 0x73e   : > { %v2818_v15 = vsel %vm4721_vm2, %v2812_v28, 0.0 }
 0x73f   : > { %v2814_v1 = vsel %vm4719_vm5, %v2810_v17, 0.0 }
 0x740   : > { %v2815_v10 = vadd.f32 %v2814_v1, %v2813_v41 }
 0x742   : > { %v2817_v4 = vadd.f32 %v2816_v50, %v2815_v10 }
 0x744   : > { %v2819_v36 = vadd.f32 %v2818_v15, %v2817_v4 }
 0x746   : > { %v2820_v24 = vrot.slane %v2819_v36, 4 }
 0x748   : > { %v2821_v44 = vadd.f32 %v2820_v24, %v2819_v36 }
 0x74a   : > { %v2822_v34 = vrot.slane %v2821_v44, 2 }
 0x74c   : > { %v2823_v2 = vadd.f32 %v2822_v34, %v2821_v44 }
 0x74e   : > { %v2824_v45 = vrot.slane %v2823_v2, 1 }
 0x750   : > { %v2825_v3 = vadd.f32 %v2824_v45, %v2823_v2 }
 0x752   : > { %v2827_v27 = vmul.f32 0.03125, %v2825_v3 }
 0x754   : > { %v2828_v55 = vsub.f32 %v2809_v60, %v2827_v27  ;;  %v2829_v58 = vsub.f32 %v2810_v17, %v2827_v27  ;;  %v2830_v16 = vsub.f32 %v2811_v6, %v2827_v27  ;;  %v2831_v29 = vsub.f32 %v2812_v28, %v2827_v27 }
 0x756   : > { %v2832_v11 = vmul.f32 %v2828_v55, %v2828_v55  ;;  %v2833_v30 = vmul.f32 %v2829_v58, %v2829_v58  ;;  %v2834_v51 = vmul.f32 %v2830_v16, %v2830_v16  ;;  %v2835_v63 = vmul.f32 %v2831_v29, %v2831_v29 }
 0x758   : > { %v2836_v5 = vsel %vm4722_vm9, %v2832_v11, 0.0  ;;  %v2837_v40 = vsel %vm4723_vm3, %v2833_v30, 0.0  ;;  %v2839_v43 = vsel %vm4724_vm6, %v2834_v51, 0.0  ;;  %v2841_v9 = vsel %vm4725_vm8, %v2835_v63, 0.0 }
 0x759   : > { %v2838_v56 = vadd.f32 %v2837_v40, %v2836_v5 }
 0x75b   : > { %v2840_v42 = vadd.f32 %v2839_v43, %v2838_v56 }
 0x75d   : > { %v2842_v49 = vadd.f32 %v2841_v9, %v2840_v42 }
 0x75f   : > { %v2843_v20 = vrot.slane %v2842_v49, 4 }
 0x761   : > { %v2844_v39 = vadd.f32 %v2843_v20, %v2842_v49 }
 0x763   : > { %v2845_v57 = vrot.slane %v2844_v39, 2 }
 0x765   : > { %v2846_v26 = vadd.f32 %v2845_v57, %v2844_v39 }
 0x767   : > { %v2847_v8 = vrot.slane %v2846_v26, 1 }
 0x769   : > { %v2848_v52 = vadd.f32 %v2847_v8, %v2846_v26 }
 0x76b   : > { %v2849_v37 = vmul.f32 0.03125, %v2848_v52 }
 0x76d   : > { %v2850_v14 = vadd.f32 1e-05, %v2849_v37 }
 0x76f   : > { %3317 = vrsqrt.f32 %v2850_v14 }
 0x779   : > { %v3318_v32 = vpop.eup %3317 }
 0x77a   : > { %v2852_v12 = vmul.f32 %v3318_v32, %v2828_v55  ;;  %v2853_v62 = vmul.f32 %v3318_v32, %v2829_v58  ;;  %v2854_v19 = vmul.f32 %v3318_v32, %v2830_v16  ;;  %v2855_v23 = vmul.f32 %v3318_v32, %v2831_v29 }
 0x77c   : > { %v2880_v38 = vmul.f32 %v2863_v22, %v2852_v12  ;;  %v2881_v61 = vmul.f32 %v2868_v21, %v2853_v62  ;;  %v2882_v48 = vmul.f32 %v2873_v46, %v2854_v19  ;;  %v2883_v47 = vmul.f32 %v2878_v53, %v2855_v23 }
 0x77e   : > { %v2908_v33 = vadd.f32 %v2891_v18, %v2880_v38  ;;  %v2909_v60 = vadd.f32 %v2896_v25, %v2881_v61  ;;  %v2910_v31 = vadd.f32 %v2901_v59, %v2882_v48  ;;  %v2911_v35 = vadd.f32 %v2906_v13, %v2883_v47 }
 0x780   : > { %2912 = vst.msk [vmem:[%s420_s15] sm:$0xff] %vm4726_vm7, %v2908_v33 }
 0x781   : > { %2913 = vst.msk [vmem:[%s420_s15 + $0x8] sm:$0xff] %vm4727_vm4, %v2909_v60 }
 0x782   : > { %2914 = vst.msk [vmem:[%s420_s15 + $0x10] sm:$0xff] %vm4728_vm14, %v2910_v31 }
 0x783   : > { %2915 = vst.msk [vmem:[%s420_s15 + $0x18] sm:$0xff] %vm4729_vm11, %v2911_v35 }
 0x784 PF: > { %s21_s17 = sadd.s32 1, %s3329_s17  }
 0x785   : > { %p18_p4 = scmp.ge.s32.totalorder %s21_s17, 4  }
 0x787   :  { %20 = sbr.rel (!%p18_p4) target bundleno = 1 (0x1), region = 100 }

</bundles_post_ra>
